<compile_context>
chip_gen: v7x
topology: tpu7x:2x2x1
jax: 0.10.0
libtpu: 0.0.40
codegen_flags: <defaults>
</compile_context>

<pallas_src>
import functools

import jax
import jax.numpy as jnp
from jax.experimental import pallas as pl
from jax.experimental.pallas import tpu as pltpu


def _round_up(x, m):
    return (x + m - 1) // m * m


# ----------------------------- Pallas kernel --------------------------------


def _encoder_kernel(
    # inputs
    gi_f_ref, gi_b_ref, len_ref,
    whh_f_ref, bhn_f_ref, whh_b_ref, bhn_b_ref,
    wout_f_ref, wout_b_ref, bout_ref,
    # outputs
    mu_ref, sigma_ref,
    # scratch
    h_fwd_sc, h_bwd_sc,
    *, T_BLK, Hp, Lp,
):
    c = pl.program_id(1)                       # time-chunk index ("arbitrary" axis)
    n_chunks = pl.num_programs(1)

    @pl.when(c == 0)
    def _():
        h_fwd_sc[...] = jnp.zeros_like(h_fwd_sc)
        h_bwd_sc[...] = jnp.zeros_like(h_bwd_sc)

    Bb = h_fwd_sc.shape[0]
    lens = len_ref[...]                        # (Bb, 1) int32

    # Hoist weight / bias loads and the bias broadcast out of the time loop.
    whh_f = whh_f_ref[...]
    whh_b = whh_b_ref[...]
    bhn_f = jnp.broadcast_to(bhn_f_ref[...], (Bb, Hp))
    bhn_b = jnp.broadcast_to(bhn_b_ref[...], (Bb, Hp))

    t0_f = c * T_BLK                           # global start time of fwd chunk
    t0_b = (n_chunks - 1 - c) * T_BLK          # global start time of bwd chunk

    def gru_step(gi_t, h_prev, whh, bhn, mask):
        # gi_t already contains x @ W_ih + b_ih (+ b_hh for r,z) from the wrapper.
        gh = jnp.dot(h_prev, whh, preferred_element_type=jnp.float32)  # (Bb, 3Hp)
        r = jax.nn.sigmoid(gi_t[:, 0:Hp] + gh[:, 0:Hp])
        z = jax.nn.sigmoid(gi_t[:, Hp:2 * Hp] + gh[:, Hp:2 * Hp])
        n = jnp.tanh(gi_t[:, 2 * Hp:3 * Hp] + r * (gh[:, 2 * Hp:3 * Hp] + bhn))
        h_new = (1.0 - z) * n + z * h_prev
        return jnp.where(mask, h_new, h_prev)

    def body(i, carry):
        h_f, h_b = carry
        # forward direction, global time t0_f + i
        h_f = gru_step(gi_f_ref[i], h_f, whh_f, bhn_f, lens > (t0_f + i))
        # backward direction, global time t0_b + (T_BLK - 1 - i)
        i_b = T_BLK - 1 - i
        h_b = gru_step(gi_b_ref[i_b], h_b, whh_b, bhn_b, lens > (t0_b + i_b))
        return (h_f, h_b)

    h_f, h_b = jax.lax.fori_loop(
        0, T_BLK, body, (h_fwd_sc[...], h_bwd_sc[...]), unroll=True)
    h_fwd_sc[...] = h_f
    h_bwd_sc[...] = h_b

    # finalize: [h_f | h_b] @ [Wmu | Wsig] + b ; softplus on the sigma half.
    @pl.when(c == n_chunks - 1)
    def _():
        out = (jnp.dot(h_f, wout_f_ref[...], preferred_element_type=jnp.float32)
               + jnp.dot(h_b, wout_b_ref[...], preferred_element_type=jnp.float32)
               + bout_ref[...])
        mu_ref[...] = out[:, :Lp]
        sigma_ref[...] = jnp.logaddexp(out[:, Lp:], 0.0)   # softplus


# ------------------------------ XLA wrapper ----------------------------------


def _pad_gate_cols(a, H, Hp):
    """(..., 3H) in gate order (r,z,n) -> (..., 3Hp), zero-padded per gate block."""
    pads = [(0, 0)] * (a.ndim - 1) + [(0, Hp - H)]
    parts = [jnp.pad(a[..., g * H:(g + 1) * H], pads) for g in range(3)]
    return jnp.concatenate(parts, axis=-1)


def _pad2(a, rows, cols):
    return jnp.pad(a, ((0, rows - a.shape[0]), (0, cols - a.shape[1])))


@functools.partial(jax.jit, static_argnames=("t_blk",))
def sentence_vae_encoder(x, lengths, params, *, t_blk=8):
    """x: (S, B, E) f32, lengths: (B,) int. Returns (mu, sigma), each (B, L)."""
    S, B, E = x.shape
    H = params["whh_f"].shape[0]
    L = params["wmu"].shape[1]

    Hp = _round_up(H, 128)          # lane-align hidden / gate dimension
    Lp = _round_up(L, 128)          # lane-align latent dimension
    Bp = _round_up(B, 8)            # f32 sublane
    b_blk = Bp if Bp <= 128 else 128
    Bp = _round_up(Bp, b_blk)
    Sp = _round_up(S, t_blk)
    n_chunks = Sp // t_blk
    n_bblk = Bp // b_blk

    f32 = jnp.float32
    x = x.astype(f32)

    # ---- hoisted input projections: one big MXU matmul per direction ----
    def proj(wih, bih, bhh):
        wih_p = _pad_gate_cols(wih.astype(f32), H, Hp)                 # (E, 3Hp)
        # fold b_hh into the r/z gates; the n-gate b_hh stays in the kernel
        bias = jnp.concatenate(
            [bih[:, 0:H] + bhh[:, 0:H],
             bih[:, H:2 * H] + bhh[:, H:2 * H],
             bih[:, 2 * H:3 * H]], axis=-1).astype(f32)
        bias_p = _pad_gate_cols(bias, H, Hp)                           # (1, 3Hp)
        gi = jnp.dot(x.reshape(S * B, E), wih_p,
                     preferred_element_type=f32) + bias_p
        gi = gi.reshape(S, B, 3 * Hp)
        return jnp.pad(gi, ((0, Sp - S), (0, Bp - B), (0, 0)))

    gi_f = proj(params["wih_f"], params["bih_f"], params["bhh_f"])
    gi_b = proj(params["wih_b"], params["bih_b"], params["bhh_b"])

    def rec_weights(whh, bhh):
        whh_p = jnp.pad(_pad_gate_cols(whh.astype(f32), H, Hp),
                        ((0, Hp - H), (0, 0)))                         # (Hp, 3Hp)
        bhn_p = _pad2(bhh[:, 2 * H:3 * H].astype(f32), 1, Hp)          # (1, Hp)
        return whh_p, bhn_p

    whh_f_p, bhn_f_p = rec_weights(params["whh_f"], params["bhh_f"])
    whh_b_p, bhn_b_p = rec_weights(params["whh_b"], params["bhh_b"])

    # fused (mu | sigma) output weights, split by direction (no in-kernel concat)
    wmu, wsig = params["wmu"].astype(f32), params["wsig"].astype(f32)
    wout_f = jnp.concatenate([_pad2(wmu[:H], Hp, Lp), _pad2(wsig[:H], Hp, Lp)], axis=1)
    wout_b = jnp.concatenate([_pad2(wmu[H:], Hp, Lp), _pad2(wsig[H:], Hp, Lp)], axis=1)
    bout = jnp.concatenate([_pad2(params["bmu"].astype(f32), 1, Lp),
                            _pad2(params["bsig"].astype(f32), 1, Lp)], axis=1)

    lens_p = _pad2(lengths.astype(jnp.int32).reshape(B, 1), Bp, 1)     # padded rows -> 0

    const = lambda shape: pl.BlockSpec(shape, lambda b, c: (0,) * len(shape))

    grid_spec = pltpu.PrefetchScalarGridSpec(
        num_scalar_prefetch=0,
        grid=(n_bblk, n_chunks),
        in_specs=[
            pl.BlockSpec((t_blk, b_blk, 3 * Hp), lambda b, c: (c, b, 0)),   # gi_f chunk
            pl.BlockSpec((t_blk, b_blk, 3 * Hp),
                         lambda b, c: (n_chunks - 1 - c, b, 0)),            # gi_b chunk (mirrored)
            pl.BlockSpec((b_blk, 1), lambda b, c: (b, 0)),                  # lengths
            const((Hp, 3 * Hp)), const((1, Hp)),                            # whh_f, bhn_f
            const((Hp, 3 * Hp)), const((1, Hp)),                            # whh_b, bhn_b
            const((Hp, 2 * Lp)), const((Hp, 2 * Lp)), const((1, 2 * Lp)),   # wout_f, wout_b, bout
        ],
        out_specs=[
            pl.BlockSpec((b_blk, Lp), lambda b, c: (b, 0)),
            pl.BlockSpec((b_blk, Lp), lambda b, c: (b, 0)),
        ],
        scratch_shapes=[
            pltpu.VMEM((b_blk, Hp), f32),
            pltpu.VMEM((b_blk, Hp), f32),
        ],
    )

    kernel = functools.partial(_encoder_kernel, T_BLK=t_blk, Hp=Hp, Lp=Lp)

    mu_p, sigma_p = pl.pallas_call(
        kernel,
        out_shape=(jax.ShapeDtypeStruct((Bp, Lp), f32),
                   jax.ShapeDtypeStruct((Bp, Lp), f32)),
        grid_spec=grid_spec,
        compiler_params=pltpu.CompilerParams(
            dimension_semantics=("parallel", "arbitrary"),
            vmem_limit_bytes=64 * 1024 * 1024),
    )(gi_f, gi_b, lens_p,
      whh_f_p, bhn_f_p, whh_b_p, bhn_b_p,
      wout_f, wout_b, bout)

    return mu_p[:B, :L], sigma_p[:B, :L]


# ------------------------- pure-JAX reference (check) ------------------------


def _ref_gru_dir(x, lengths, wih, whh, bih, bhh, reverse):
    S, B, E = x.shape
    H = whh.shape[0]
    order = jnp.arange(S)[::-1] if reverse else jnp.arange(S)
    xs = x[order]
    masks = order[:, None] < lengths[None, :]        # (S, B)

    def cell(h, inp):
        x_t, m = inp
        gi = x_t @ wih + bih
        gh = h @ whh + bhh
        r = jax.nn.sigmoid(gi[:, :H] + gh[:, :H])
        z = jax.nn.sigmoid(gi[:, H:2 * H] + gh[:, H:2 * H])
        n = jnp.tanh(gi[:, 2 * H:] + r * gh[:, 2 * H:])
        h_new = (1 - z) * n + z * h
        return jnp.where(m[:, None], h_new, h), None

    h0 = jnp.zeros((B, H), jnp.float32)
    hT, _ = jax.lax.scan(cell, h0, (xs, masks))
    return hT


def reference(x, lengths, p):
    h_f = _ref_gru_dir(x, lengths, p["wih_f"], p["whh_f"], p["bih_f"], p["bhh_f"], False)
    h_b = _ref_gru_dir(x, lengths, p["wih_b"], p["whh_b"], p["bih_b"], p["bhh_b"], True)
    hcat = jnp.concatenate([h_f, h_b], axis=-1)
    mu = hcat @ p["wmu"] + p["bmu"]
    sigma = jnp.logaddexp(hcat @ p["wsig"] + p["bsig"], 0.0)
    return mu, sigma


# ----------------------------------- main ------------------------------------


if __name__ == "__main__":
    S, B, E, H, L = 8, 2, 16, 32, 8     # seq, batch, input_dim, hidden_dim, latent_dim

    key = jax.random.PRNGKey(0)
    ks = jax.random.split(key, 16)
    k_ = 1.0 / jnp.sqrt(jnp.float32(H))
    u = lambda kk, shape: jax.random.uniform(kk, shape, jnp.float32, -k_, k_)

    params = {
        "wih_f": u(ks[0], (E, 3 * H)), "whh_f": u(ks[1], (H, 3 * H)),
        "bih_f": u(ks[2], (1, 3 * H)), "bhh_f": u(ks[3], (1, 3 * H)),
        "wih_b": u(ks[4], (E, 3 * H)), "whh_b": u(ks[5], (H, 3 * H)),
        "bih_b": u(ks[6], (1, 3 * H)), "bhh_b": u(ks[7], (1, 3 * H)),
        "wmu":  u(ks[8], (2 * H, L)),  "bmu":  u(ks[9], (1, L)),
        "wsig": u(ks[10], (2 * H, L)), "bsig": u(ks[11], (1, L)),
    }

    x = jax.random.normal(ks[12], (S, B, E), jnp.float32)
    lengths = jnp.array([8, 5], dtype=jnp.int32)      # per-batch valid lengths

    mu, sigma = sentence_vae_encoder(x, lengths, params)
    jax.block_until_ready((mu, sigma))

    mu_ref, sigma_ref = reference(x, lengths, params)
    assert jnp.allclose(mu, mu_ref, atol=2e-3, rtol=2e-3), "mu mismatch"
    assert jnp.allclose(sigma, sigma_ref, atol=2e-3, rtol=2e-3), "sigma mismatch"
    assert bool(jnp.all(sigma > 0)), "softplus output must be positive"

    print("KERNEL_OK")
</pallas_src>

<mosaic_0001>
module attributes {stable_mosaic.version = 11 : i64} {
  func.func @_encoder_kernel(%arg0: i32, %arg1: i32, %arg2: memref<8x8x384xf32, #tpu.memory_space<vmem>>, %arg3: memref<8x8x384xf32, #tpu.memory_space<vmem>>, %arg4: memref<8x1xi32, #tpu.memory_space<vmem>>, %arg5: memref<128x384xf32, #tpu.memory_space<vmem>>, %arg6: memref<1x128xf32, #tpu.memory_space<vmem>>, %arg7: memref<128x384xf32, #tpu.memory_space<vmem>>, %arg8: memref<1x128xf32, #tpu.memory_space<vmem>>, %arg9: memref<128x256xf32, #tpu.memory_space<vmem>>, %arg10: memref<128x256xf32, #tpu.memory_space<vmem>>, %arg11: memref<1x256xf32, #tpu.memory_space<vmem>>, %arg12: memref<8x128xf32, #tpu.memory_space<vmem>>, %arg13: memref<8x128xf32, #tpu.memory_space<vmem>>, %arg14: memref<8x128xf32, #tpu.memory_space<vmem>>, %arg15: memref<8x128xf32, #tpu.memory_space<vmem>>) attributes {dimension_semantics = [#tpu.dimension_semantics<parallel>, #tpu.dimension_semantics<arbitrary>], iteration_bounds = array<i64: 1, 1>, scalar_prefetch = 0 : i64, scratch_operands = 2 : i64, tpu.core_type = #tpu.core_type<tc>, window_params = [{transform_indices = @transform_0, window_bounds = array<i64: 8, 8, 384>}, {transform_indices = @transform_1, window_bounds = array<i64: 8, 8, 384>}, {transform_indices = @transform_2, window_bounds = array<i64: 8, 1>}, {pipeline_mode = #tpu.pipeline_mode<synchronous>, transform_indices = @transform_3, window_bounds = array<i64: 128, 384>}, {pipeline_mode = #tpu.pipeline_mode<synchronous>, transform_indices = @transform_4, window_bounds = array<i64: 1, 128>}, {pipeline_mode = #tpu.pipeline_mode<synchronous>, transform_indices = @transform_5, window_bounds = array<i64: 128, 384>}, {pipeline_mode = #tpu.pipeline_mode<synchronous>, transform_indices = @transform_6, window_bounds = array<i64: 1, 128>}, {pipeline_mode = #tpu.pipeline_mode<synchronous>, transform_indices = @transform_7, window_bounds = array<i64: 128, 256>}, {pipeline_mode = #tpu.pipeline_mode<synchronous>, transform_indices = @transform_8, window_bounds = array<i64: 128, 256>}, {pipeline_mode = #tpu.pipeline_mode<synchronous>, transform_indices = @transform_9, window_bounds = array<i64: 1, 256>}, {transform_indices = @transform_10, window_bounds = array<i64: 8, 128>}, {transform_indices = @transform_11, window_bounds = array<i64: 8, 128>}]} {
    %c0_i32 = arith.constant 0 : i32
    %0 = arith.cmpi eq, %arg1, %c0_i32 : i32
    %1 = arith.extui %0 : i1 to i32
    %c0_i32_0 = arith.constant 0 : i32
    %2 = arith.cmpi ne, %1, %c0_i32_0 : i32
    scf.if %2 {
      %cst_127 = arith.constant 0.000000e+00 : f32
      %622 = vector.broadcast %cst_127 : f32 to vector<8x128xf32>
      %c0_128 = arith.constant 0 : index
      %c0_129 = arith.constant 0 : index
      %623 = vector.load %arg14[%c0_128, %c0_129] : memref<8x128xf32, #tpu.memory_space<vmem>>, vector<8x128xf32>
      tpu.vector_store %arg14[%c0_128, %c0_129], %622 {strides = array<i32>} : memref<8x128xf32, #tpu.memory_space<vmem>>, vector<8x128xf32>,
      %cst_130 = arith.constant 0.000000e+00 : f32
      %624 = vector.broadcast %cst_130 : f32 to vector<8x128xf32>
      %c0_131 = arith.constant 0 : index
      %c0_132 = arith.constant 0 : index
      %625 = vector.load %arg15[%c0_131, %c0_132] : memref<8x128xf32, #tpu.memory_space<vmem>>, vector<8x128xf32>
      tpu.vector_store %arg15[%c0_131, %c0_132], %624 {strides = array<i32>} : memref<8x128xf32, #tpu.memory_space<vmem>>, vector<8x128xf32>,
    } else {
    }
    %c0 = arith.constant 0 : index
    %c0_1 = arith.constant 0 : index
    %3 = vector.load %arg4[%c0, %c0_1] : memref<8x1xi32, #tpu.memory_space<vmem>>, vector<8x1xi32>
    %c0_2 = arith.constant 0 : index
    %c0_3 = arith.constant 0 : index
    %4 = vector.load %arg5[%c0_2, %c0_3] : memref<128x384xf32, #tpu.memory_space<vmem>>, vector<128x384xf32>
    %c0_4 = arith.constant 0 : index
    %c0_5 = arith.constant 0 : index
    %5 = vector.load %arg7[%c0_4, %c0_5] : memref<128x384xf32, #tpu.memory_space<vmem>>, vector<128x384xf32>
    %c0_6 = arith.constant 0 : index
    %c0_7 = arith.constant 0 : index
    %6 = vector.load %arg6[%c0_6, %c0_7] : memref<1x128xf32, #tpu.memory_space<vmem>>, vector<1x128xf32>
    %7 = vector.shape_cast %6 : vector<1x128xf32> to vector<1x128xf32>
    %8 = vector.broadcast %7 : vector<1x128xf32> to vector<8x128xf32>
    %c0_8 = arith.constant 0 : index
    %c0_9 = arith.constant 0 : index
    %9 = vector.load %arg8[%c0_8, %c0_9] : memref<1x128xf32, #tpu.memory_space<vmem>>, vector<1x128xf32>
    %10 = vector.shape_cast %9 : vector<1x128xf32> to vector<1x128xf32>
    %11 = vector.broadcast %10 : vector<1x128xf32> to vector<8x128xf32>
    %c8_i32 = arith.constant 8 : i32
    %12 = arith.muli %arg1, %c8_i32 : i32
    %c0_i32_10 = arith.constant 0 : i32
    %13 = arith.subi %c0_i32_10, %arg1 : i32
    %c8_i32_11 = arith.constant 8 : i32
    %14 = arith.muli %13, %c8_i32_11 : i32
    %c0_12 = arith.constant 0 : index
    %c0_13 = arith.constant 0 : index
    %15 = vector.load %arg14[%c0_12, %c0_13] : memref<8x128xf32, #tpu.memory_space<vmem>>, vector<8x128xf32>
    %c0_14 = arith.constant 0 : index
    %c0_15 = arith.constant 0 : index
    %16 = vector.load %arg15[%c0_14, %c0_15] : memref<8x128xf32, #tpu.memory_space<vmem>>, vector<8x128xf32>
    %c0_i32_16 = arith.constant 0 : i32
    %17 = arith.index_cast %c0_i32_16 : i32 to index
    %c0_17 = arith.constant 0 : index
    %c0_18 = arith.constant 0 : index
    %18 = vector.load %arg2[%17, %c0_17, %c0_18] : memref<8x8x384xf32, #tpu.memory_space<vmem>>, vector<1x8x384xf32>
    %19 = vector.shape_cast %18 : vector<1x8x384xf32> to vector<8x384xf32>
    %20 = arith.addi %12, %c0_i32_16 : i32
    %21 = vector.broadcast %20 : i32 to vector<8x1xi32>
    %22 = arith.cmpi sgt, %3, %21 : vector<8x1xi32>
    %cst = arith.constant dense<0.000000e+00> : vector<8x384xf32>
    %23 = tpu.matmul %15, %4, %cst {dimension_numbers = #tpu.dot_dimension_numbers<[1], [0], [0], [1], [0, 0, 1, 1], [], []>} : vector<8x128xf32>, vector<128x384xf32>, vector<8x384xf32> -> vector<8x384xf32>
    %24 = vector.extract_strided_slice %19 {offsets = [0, 0], sizes = [8, 128], strides = [1, 1]} : vector<8x384xf32> to vector<8x128xf32>
    %25 = vector.extract_strided_slice %23 {offsets = [0, 0], sizes = [8, 128], strides = [1, 1]} : vector<8x384xf32> to vector<8x128xf32>
    %26 = arith.addf %24, %25 : vector<8x128xf32>
    %27 = arith.negf %26 : vector<8x128xf32>
    %28 = math.exp %27 : vector<8x128xf32>
    %cst_19 = arith.constant 1.000000e+00 : f32
    %29 = vector.broadcast %cst_19 : f32 to vector<8x128xf32>
    %30 = arith.addf %29, %28 : vector<8x128xf32>
    %31 = arith.divf %29, %30 : vector<8x128xf32>
    %32 = vector.extract_strided_slice %19 {offsets = [0, 128], sizes = [8, 128], strides = [1, 1]} : vector<8x384xf32> to vector<8x128xf32>
    %33 = vector.extract_strided_slice %23 {offsets = [0, 128], sizes = [8, 128], strides = [1, 1]} : vector<8x384xf32> to vector<8x128xf32>
    %34 = arith.addf %32, %33 : vector<8x128xf32>
    %35 = arith.negf %34 : vector<8x128xf32>
    %36 = math.exp %35 : vector<8x128xf32>
    %cst_20 = arith.constant 1.000000e+00 : f32
    %37 = vector.broadcast %cst_20 : f32 to vector<8x128xf32>
    %38 = arith.addf %37, %36 : vector<8x128xf32>
    %39 = arith.divf %37, %38 : vector<8x128xf32>
    %40 = vector.extract_strided_slice %19 {offsets = [0, 256], sizes = [8, 128], strides = [1, 1]} : vector<8x384xf32> to vector<8x128xf32>
    %41 = vector.extract_strided_slice %23 {offsets = [0, 256], sizes = [8, 128], strides = [1, 1]} : vector<8x384xf32> to vector<8x128xf32>
    %42 = arith.addf %41, %8 : vector<8x128xf32>
    %43 = arith.mulf %31, %42 : vector<8x128xf32>
    %44 = arith.addf %40, %43 : vector<8x128xf32>
    %45 = math.tanh %44 : vector<8x128xf32>
    %cst_21 = arith.constant 1.000000e+00 : f32
    %46 = vector.broadcast %cst_21 : f32 to vector<8x128xf32>
    %47 = arith.subf %46, %39 : vector<8x128xf32>
    %48 = arith.mulf %47, %45 : vector<8x128xf32>
    %49 = arith.mulf %39, %15 : vector<8x128xf32>
    %50 = arith.addf %48, %49 : vector<8x128xf32>
    %51 = vector.shape_cast %22 : vector<8x1xi1> to vector<8x1xi1>
    %52 = vector.broadcast %51 : vector<8x1xi1> to vector<8x128xi1>
    %53 = arith.select %52, %50, %15 : vector<8x128xi1>, vector<8x128xf32>
    %c7_i32 = arith.constant 7 : i32
    %54 = arith.subi %c7_i32, %c0_i32_16 : i32
    %55 = arith.index_cast %54 : i32 to index
    %c0_22 = arith.constant 0 : index
    %c0_23 = arith.constant 0 : index
    %56 = vector.load %arg3[%55, %c0_22, %c0_23] : memref<8x8x384xf32, #tpu.memory_space<vmem>>, vector<1x8x384xf32>
    %57 = vector.shape_cast %56 : vector<1x8x384xf32> to vector<8x384xf32>
    %58 = arith.addi %14, %54 : i32
    %59 = vector.broadcast %58 : i32 to vector<8x1xi32>
    %60 = arith.cmpi sgt, %3, %59 : vector<8x1xi32>
    %cst_24 = arith.constant dense<0.000000e+00> : vector<8x384xf32>
    %61 = tpu.matmul %16, %5, %cst_24 {dimension_numbers = #tpu.dot_dimension_numbers<[1], [0], [0], [1], [0, 0, 1, 1], [], []>} : vector<8x128xf32>, vector<128x384xf32>, vector<8x384xf32> -> vector<8x384xf32>
    %62 = vector.extract_strided_slice %57 {offsets = [0, 0], sizes = [8, 128], strides = [1, 1]} : vector<8x384xf32> to vector<8x128xf32>
    %63 = vector.extract_strided_slice %61 {offsets = [0, 0], sizes = [8, 128], strides = [1, 1]} : vector<8x384xf32> to vector<8x128xf32>
    %64 = arith.addf %62, %63 : vector<8x128xf32>
    %65 = arith.negf %64 : vector<8x128xf32>
    %66 = math.exp %65 : vector<8x128xf32>
    %cst_25 = arith.constant 1.000000e+00 : f32
    %67 = vector.broadcast %cst_25 : f32 to vector<8x128xf32>
    %68 = arith.addf %67, %66 : vector<8x128xf32>
    %69 = arith.divf %67, %68 : vector<8x128xf32>
    %70 = vector.extract_strided_slice %57 {offsets = [0, 128], sizes = [8, 128], strides = [1, 1]} : vector<8x384xf32> to vector<8x128xf32>
    %71 = vector.extract_strided_slice %61 {offsets = [0, 128], sizes = [8, 128], strides = [1, 1]} : vector<8x384xf32> to vector<8x128xf32>
    %72 = arith.addf %70, %71 : vector<8x128xf32>
    %73 = arith.negf %72 : vector<8x128xf32>
    %74 = math.exp %73 : vector<8x128xf32>
    %cst_26 = arith.constant 1.000000e+00 : f32
    %75 = vector.broadcast %cst_26 : f32 to vector<8x128xf32>
    %76 = arith.addf %75, %74 : vector<8x128xf32>
    %77 = arith.divf %75, %76 : vector<8x128xf32>
    %78 = vector.extract_strided_slice %57 {offsets = [0, 256], sizes = [8, 128], strides = [1, 1]} : vector<8x384xf32> to vector<8x128xf32>
    %79 = vector.extract_strided_slice %61 {offsets = [0, 256], sizes = [8, 128], strides = [1, 1]} : vector<8x384xf32> to vector<8x128xf32>
    %80 = arith.addf %79, %11 : vector<8x128xf32>
    %81 = arith.mulf %69, %80 : vector<8x128xf32>
    %82 = arith.addf %78, %81 : vector<8x128xf32>
    %83 = math.tanh %82 : vector<8x128xf32>
    %cst_27 = arith.constant 1.000000e+00 : f32
    %84 = vector.broadcast %cst_27 : f32 to vector<8x128xf32>
    %85 = arith.subf %84, %77 : vector<8x128xf32>
    %86 = arith.mulf %85, %83 : vector<8x128xf32>
    %87 = arith.mulf %77, %16 : vector<8x128xf32>
    %88 = arith.addf %86, %87 : vector<8x128xf32>
    %89 = vector.shape_cast %60 : vector<8x1xi1> to vector<8x1xi1>
    %90 = vector.broadcast %89 : vector<8x1xi1> to vector<8x128xi1>
    %91 = arith.select %90, %88, %16 : vector<8x128xi1>, vector<8x128xf32>
    %c1_i32 = arith.constant 1 : i32
    %92 = arith.index_cast %c1_i32 : i32 to index
    %c0_28 = arith.constant 0 : index
    %c0_29 = arith.constant 0 : index
    %93 = vector.load %arg2[%92, %c0_28, %c0_29] : memref<8x8x384xf32, #tpu.memory_space<vmem>>, vector<1x8x384xf32>
    %94 = vector.shape_cast %93 : vector<1x8x384xf32> to vector<8x384xf32>
    %95 = arith.addi %12, %c1_i32 : i32
    %96 = vector.broadcast %95 : i32 to vector<8x1xi32>
    %97 = arith.cmpi sgt, %3, %96 : vector<8x1xi32>
    %cst_30 = arith.constant dense<0.000000e+00> : vector<8x384xf32>
    %98 = tpu.matmul %53, %4, %cst_30 {dimension_numbers = #tpu.dot_dimension_numbers<[1], [0], [0], [1], [0, 0, 1, 1], [], []>} : vector<8x128xf32>, vector<128x384xf32>, vector<8x384xf32> -> vector<8x384xf32>
    %99 = vector.extract_strided_slice %94 {offsets = [0, 0], sizes = [8, 128], strides = [1, 1]} : vector<8x384xf32> to vector<8x128xf32>
    %100 = vector.extract_strided_slice %98 {offsets = [0, 0], sizes = [8, 128], strides = [1, 1]} : vector<8x384xf32> to vector<8x128xf32>
    %101 = arith.addf %99, %100 : vector<8x128xf32>
    %102 = arith.negf %101 : vector<8x128xf32>
    %103 = math.exp %102 : vector<8x128xf32>
    %cst_31 = arith.constant 1.000000e+00 : f32
    %104 = vector.broadcast %cst_31 : f32 to vector<8x128xf32>
    %105 = arith.addf %104, %103 : vector<8x128xf32>
    %106 = arith.divf %104, %105 : vector<8x128xf32>
    %107 = vector.extract_strided_slice %94 {offsets = [0, 128], sizes = [8, 128], strides = [1, 1]} : vector<8x384xf32> to vector<8x128xf32>
    %108 = vector.extract_strided_slice %98 {offsets = [0, 128], sizes = [8, 128], strides = [1, 1]} : vector<8x384xf32> to vector<8x128xf32>
    %109 = arith.addf %107, %108 : vector<8x128xf32>
    %110 = arith.negf %109 : vector<8x128xf32>
    %111 = math.exp %110 : vector<8x128xf32>
    %cst_32 = arith.constant 1.000000e+00 : f32
    %112 = vector.broadcast %cst_32 : f32 to vector<8x128xf32>
    %113 = arith.addf %112, %111 : vector<8x128xf32>
    %114 = arith.divf %112, %113 : vector<8x128xf32>
    %115 = vector.extract_strided_slice %94 {offsets = [0, 256], sizes = [8, 128], strides = [1, 1]} : vector<8x384xf32> to vector<8x128xf32>
    %116 = vector.extract_strided_slice %98 {offsets = [0, 256], sizes = [8, 128], strides = [1, 1]} : vector<8x384xf32> to vector<8x128xf32>
    %117 = arith.addf %116, %8 : vector<8x128xf32>
    %118 = arith.mulf %106, %117 : vector<8x128xf32>
    %119 = arith.addf %115, %118 : vector<8x128xf32>
    %120 = math.tanh %119 : vector<8x128xf32>
    %cst_33 = arith.constant 1.000000e+00 : f32
    %121 = vector.broadcast %cst_33 : f32 to vector<8x128xf32>
    %122 = arith.subf %121, %114 : vector<8x128xf32>
    %123 = arith.mulf %122, %120 : vector<8x128xf32>
    %124 = arith.mulf %114, %53 : vector<8x128xf32>
    %125 = arith.addf %123, %124 : vector<8x128xf32>
    %126 = vector.shape_cast %97 : vector<8x1xi1> to vector<8x1xi1>
    %127 = vector.broadcast %126 : vector<8x1xi1> to vector<8x128xi1>
    %128 = arith.select %127, %125, %53 : vector<8x128xi1>, vector<8x128xf32>
    %c7_i32_34 = arith.constant 7 : i32
    %129 = arith.subi %c7_i32_34, %c1_i32 : i32
    %130 = arith.index_cast %129 : i32 to index
    %c0_35 = arith.constant 0 : index
    %c0_36 = arith.constant 0 : index
    %131 = vector.load %arg3[%130, %c0_35, %c0_36] : memref<8x8x384xf32, #tpu.memory_space<vmem>>, vector<1x8x384xf32>
    %132 = vector.shape_cast %131 : vector<1x8x384xf32> to vector<8x384xf32>
    %133 = arith.addi %14, %129 : i32
    %134 = vector.broadcast %133 : i32 to vector<8x1xi32>
    %135 = arith.cmpi sgt, %3, %134 : vector<8x1xi32>
    %cst_37 = arith.constant dense<0.000000e+00> : vector<8x384xf32>
    %136 = tpu.matmul %91, %5, %cst_37 {dimension_numbers = #tpu.dot_dimension_numbers<[1], [0], [0], [1], [0, 0, 1, 1], [], []>} : vector<8x128xf32>, vector<128x384xf32>, vector<8x384xf32> -> vector<8x384xf32>
    %137 = vector.extract_strided_slice %132 {offsets = [0, 0], sizes = [8, 128], strides = [1, 1]} : vector<8x384xf32> to vector<8x128xf32>
    %138 = vector.extract_strided_slice %136 {offsets = [0, 0], sizes = [8, 128], strides = [1, 1]} : vector<8x384xf32> to vector<8x128xf32>
    %139 = arith.addf %137, %138 : vector<8x128xf32>
    %140 = arith.negf %139 : vector<8x128xf32>
    %141 = math.exp %140 : vector<8x128xf32>
    %cst_38 = arith.constant 1.000000e+00 : f32
    %142 = vector.broadcast %cst_38 : f32 to vector<8x128xf32>
    %143 = arith.addf %142, %141 : vector<8x128xf32>
    %144 = arith.divf %142, %143 : vector<8x128xf32>
    %145 = vector.extract_strided_slice %132 {offsets = [0, 128], sizes = [8, 128], strides = [1, 1]} : vector<8x384xf32> to vector<8x128xf32>
    %146 = vector.extract_strided_slice %136 {offsets = [0, 128], sizes = [8, 128], strides = [1, 1]} : vector<8x384xf32> to vector<8x128xf32>
    %147 = arith.addf %145, %146 : vector<8x128xf32>
    %148 = arith.negf %147 : vector<8x128xf32>
    %149 = math.exp %148 : vector<8x128xf32>
    %cst_39 = arith.constant 1.000000e+00 : f32
    %150 = vector.broadcast %cst_39 : f32 to vector<8x128xf32>
    %151 = arith.addf %150, %149 : vector<8x128xf32>
    %152 = arith.divf %150, %151 : vector<8x128xf32>
    %153 = vector.extract_strided_slice %132 {offsets = [0, 256], sizes = [8, 128], strides = [1, 1]} : vector<8x384xf32> to vector<8x128xf32>
    %154 = vector.extract_strided_slice %136 {offsets = [0, 256], sizes = [8, 128], strides = [1, 1]} : vector<8x384xf32> to vector<8x128xf32>
    %155 = arith.addf %154, %11 : vector<8x128xf32>
    %156 = arith.mulf %144, %155 : vector<8x128xf32>
    %157 = arith.addf %153, %156 : vector<8x128xf32>
    %158 = math.tanh %157 : vector<8x128xf32>
    %cst_40 = arith.constant 1.000000e+00 : f32
    %159 = vector.broadcast %cst_40 : f32 to vector<8x128xf32>
    %160 = arith.subf %159, %152 : vector<8x128xf32>
    %161 = arith.mulf %160, %158 : vector<8x128xf32>
    %162 = arith.mulf %152, %91 : vector<8x128xf32>
    %163 = arith.addf %161, %162 : vector<8x128xf32>
    %164 = vector.shape_cast %135 : vector<8x1xi1> to vector<8x1xi1>
    %165 = vector.broadcast %164 : vector<8x1xi1> to vector<8x128xi1>
    %166 = arith.select %165, %163, %91 : vector<8x128xi1>, vector<8x128xf32>
    %c2_i32 = arith.constant 2 : i32
    %167 = arith.index_cast %c2_i32 : i32 to index
    %c0_41 = arith.constant 0 : index
    %c0_42 = arith.constant 0 : index
    %168 = vector.load %arg2[%167, %c0_41, %c0_42] : memref<8x8x384xf32, #tpu.memory_space<vmem>>, vector<1x8x384xf32>
    %169 = vector.shape_cast %168 : vector<1x8x384xf32> to vector<8x384xf32>
    %170 = arith.addi %12, %c2_i32 : i32
    %171 = vector.broadcast %170 : i32 to vector<8x1xi32>
    %172 = arith.cmpi sgt, %3, %171 : vector<8x1xi32>
    %cst_43 = arith.constant dense<0.000000e+00> : vector<8x384xf32>
    %173 = tpu.matmul %128, %4, %cst_43 {dimension_numbers = #tpu.dot_dimension_numbers<[1], [0], [0], [1], [0, 0, 1, 1], [], []>} : vector<8x128xf32>, vector<128x384xf32>, vector<8x384xf32> -> vector<8x384xf32>
    %174 = vector.extract_strided_slice %169 {offsets = [0, 0], sizes = [8, 128], strides = [1, 1]} : vector<8x384xf32> to vector<8x128xf32>
    %175 = vector.extract_strided_slice %173 {offsets = [0, 0], sizes = [8, 128], strides = [1, 1]} : vector<8x384xf32> to vector<8x128xf32>
    %176 = arith.addf %174, %175 : vector<8x128xf32>
    %177 = arith.negf %176 : vector<8x128xf32>
    %178 = math.exp %177 : vector<8x128xf32>
    %cst_44 = arith.constant 1.000000e+00 : f32
    %179 = vector.broadcast %cst_44 : f32 to vector<8x128xf32>
    %180 = arith.addf %179, %178 : vector<8x128xf32>
    %181 = arith.divf %179, %180 : vector<8x128xf32>
    %182 = vector.extract_strided_slice %169 {offsets = [0, 128], sizes = [8, 128], strides = [1, 1]} : vector<8x384xf32> to vector<8x128xf32>
    %183 = vector.extract_strided_slice %173 {offsets = [0, 128], sizes = [8, 128], strides = [1, 1]} : vector<8x384xf32> to vector<8x128xf32>
    %184 = arith.addf %182, %183 : vector<8x128xf32>
    %185 = arith.negf %184 : vector<8x128xf32>
    %186 = math.exp %185 : vector<8x128xf32>
    %cst_45 = arith.constant 1.000000e+00 : f32
    %187 = vector.broadcast %cst_45 : f32 to vector<8x128xf32>
    %188 = arith.addf %187, %186 : vector<8x128xf32>
    %189 = arith.divf %187, %188 : vector<8x128xf32>
    %190 = vector.extract_strided_slice %169 {offsets = [0, 256], sizes = [8, 128], strides = [1, 1]} : vector<8x384xf32> to vector<8x128xf32>
    %191 = vector.extract_strided_slice %173 {offsets = [0, 256], sizes = [8, 128], strides = [1, 1]} : vector<8x384xf32> to vector<8x128xf32>
    %192 = arith.addf %191, %8 : vector<8x128xf32>
    %193 = arith.mulf %181, %192 : vector<8x128xf32>
    %194 = arith.addf %190, %193 : vector<8x128xf32>
    %195 = math.tanh %194 : vector<8x128xf32>
    %cst_46 = arith.constant 1.000000e+00 : f32
    %196 = vector.broadcast %cst_46 : f32 to vector<8x128xf32>
    %197 = arith.subf %196, %189 : vector<8x128xf32>
    %198 = arith.mulf %197, %195 : vector<8x128xf32>
    %199 = arith.mulf %189, %128 : vector<8x128xf32>
    %200 = arith.addf %198, %199 : vector<8x128xf32>
    %201 = vector.shape_cast %172 : vector<8x1xi1> to vector<8x1xi1>
    %202 = vector.broadcast %201 : vector<8x1xi1> to vector<8x128xi1>
    %203 = arith.select %202, %200, %128 : vector<8x128xi1>, vector<8x128xf32>
    %c7_i32_47 = arith.constant 7 : i32
    %204 = arith.subi %c7_i32_47, %c2_i32 : i32
    %205 = arith.index_cast %204 : i32 to index
    %c0_48 = arith.constant 0 : index
    %c0_49 = arith.constant 0 : index
    %206 = vector.load %arg3[%205, %c0_48, %c0_49] : memref<8x8x384xf32, #tpu.memory_space<vmem>>, vector<1x8x384xf32>
    %207 = vector.shape_cast %206 : vector<1x8x384xf32> to vector<8x384xf32>
    %208 = arith.addi %14, %204 : i32
    %209 = vector.broadcast %208 : i32 to vector<8x1xi32>
    %210 = arith.cmpi sgt, %3, %209 : vector<8x1xi32>
    %cst_50 = arith.constant dense<0.000000e+00> : vector<8x384xf32>
    %211 = tpu.matmul %166, %5, %cst_50 {dimension_numbers = #tpu.dot_dimension_numbers<[1], [0], [0], [1], [0, 0, 1, 1], [], []>} : vector<8x128xf32>, vector<128x384xf32>, vector<8x384xf32> -> vector<8x384xf32>
    %212 = vector.extract_strided_slice %207 {offsets = [0, 0], sizes = [8, 128], strides = [1, 1]} : vector<8x384xf32> to vector<8x128xf32>
    %213 = vector.extract_strided_slice %211 {offsets = [0, 0], sizes = [8, 128], strides = [1, 1]} : vector<8x384xf32> to vector<8x128xf32>
    %214 = arith.addf %212, %213 : vector<8x128xf32>
    %215 = arith.negf %214 : vector<8x128xf32>
    %216 = math.exp %215 : vector<8x128xf32>
    %cst_51 = arith.constant 1.000000e+00 : f32
    %217 = vector.broadcast %cst_51 : f32 to vector<8x128xf32>
    %218 = arith.addf %217, %216 : vector<8x128xf32>
    %219 = arith.divf %217, %218 : vector<8x128xf32>
    %220 = vector.extract_strided_slice %207 {offsets = [0, 128], sizes = [8, 128], strides = [1, 1]} : vector<8x384xf32> to vector<8x128xf32>
    %221 = vector.extract_strided_slice %211 {offsets = [0, 128], sizes = [8, 128], strides = [1, 1]} : vector<8x384xf32> to vector<8x128xf32>
    %222 = arith.addf %220, %221 : vector<8x128xf32>
    %223 = arith.negf %222 : vector<8x128xf32>
    %224 = math.exp %223 : vector<8x128xf32>
    %cst_52 = arith.constant 1.000000e+00 : f32
    %225 = vector.broadcast %cst_52 : f32 to vector<8x128xf32>
    %226 = arith.addf %225, %224 : vector<8x128xf32>
    %227 = arith.divf %225, %226 : vector<8x128xf32>
    %228 = vector.extract_strided_slice %207 {offsets = [0, 256], sizes = [8, 128], strides = [1, 1]} : vector<8x384xf32> to vector<8x128xf32>
    %229 = vector.extract_strided_slice %211 {offsets = [0, 256], sizes = [8, 128], strides = [1, 1]} : vector<8x384xf32> to vector<8x128xf32>
    %230 = arith.addf %229, %11 : vector<8x128xf32>
    %231 = arith.mulf %219, %230 : vector<8x128xf32>
    %232 = arith.addf %228, %231 : vector<8x128xf32>
    %233 = math.tanh %232 : vector<8x128xf32>
    %cst_53 = arith.constant 1.000000e+00 : f32
    %234 = vector.broadcast %cst_53 : f32 to vector<8x128xf32>
    %235 = arith.subf %234, %227 : vector<8x128xf32>
    %236 = arith.mulf %235, %233 : vector<8x128xf32>
    %237 = arith.mulf %227, %166 : vector<8x128xf32>
    %238 = arith.addf %236, %237 : vector<8x128xf32>
    %239 = vector.shape_cast %210 : vector<8x1xi1> to vector<8x1xi1>
    %240 = vector.broadcast %239 : vector<8x1xi1> to vector<8x128xi1>
    %241 = arith.select %240, %238, %166 : vector<8x128xi1>, vector<8x128xf32>
    %c3_i32 = arith.constant 3 : i32
    %242 = arith.index_cast %c3_i32 : i32 to index
    %c0_54 = arith.constant 0 : index
    %c0_55 = arith.constant 0 : index
    %243 = vector.load %arg2[%242, %c0_54, %c0_55] : memref<8x8x384xf32, #tpu.memory_space<vmem>>, vector<1x8x384xf32>
    %244 = vector.shape_cast %243 : vector<1x8x384xf32> to vector<8x384xf32>
    %245 = arith.addi %12, %c3_i32 : i32
    %246 = vector.broadcast %245 : i32 to vector<8x1xi32>
    %247 = arith.cmpi sgt, %3, %246 : vector<8x1xi32>
    %cst_56 = arith.constant dense<0.000000e+00> : vector<8x384xf32>
    %248 = tpu.matmul %203, %4, %cst_56 {dimension_numbers = #tpu.dot_dimension_numbers<[1], [0], [0], [1], [0, 0, 1, 1], [], []>} : vector<8x128xf32>, vector<128x384xf32>, vector<8x384xf32> -> vector<8x384xf32>
    %249 = vector.extract_strided_slice %244 {offsets = [0, 0], sizes = [8, 128], strides = [1, 1]} : vector<8x384xf32> to vector<8x128xf32>
    %250 = vector.extract_strided_slice %248 {offsets = [0, 0], sizes = [8, 128], strides = [1, 1]} : vector<8x384xf32> to vector<8x128xf32>
    %251 = arith.addf %249, %250 : vector<8x128xf32>
    %252 = arith.negf %251 : vector<8x128xf32>
    %253 = math.exp %252 : vector<8x128xf32>
    %cst_57 = arith.constant 1.000000e+00 : f32
    %254 = vector.broadcast %cst_57 : f32 to vector<8x128xf32>
    %255 = arith.addf %254, %253 : vector<8x128xf32>
    %256 = arith.divf %254, %255 : vector<8x128xf32>
    %257 = vector.extract_strided_slice %244 {offsets = [0, 128], sizes = [8, 128], strides = [1, 1]} : vector<8x384xf32> to vector<8x128xf32>
    %258 = vector.extract_strided_slice %248 {offsets = [0, 128], sizes = [8, 128], strides = [1, 1]} : vector<8x384xf32> to vector<8x128xf32>
    %259 = arith.addf %257, %258 : vector<8x128xf32>
    %260 = arith.negf %259 : vector<8x128xf32>
    %261 = math.exp %260 : vector<8x128xf32>
    %cst_58 = arith.constant 1.000000e+00 : f32
    %262 = vector.broadcast %cst_58 : f32 to vector<8x128xf32>
    %263 = arith.addf %262, %261 : vector<8x128xf32>
    %264 = arith.divf %262, %263 : vector<8x128xf32>
    %265 = vector.extract_strided_slice %244 {offsets = [0, 256], sizes = [8, 128], strides = [1, 1]} : vector<8x384xf32> to vector<8x128xf32>
    %266 = vector.extract_strided_slice %248 {offsets = [0, 256], sizes = [8, 128], strides = [1, 1]} : vector<8x384xf32> to vector<8x128xf32>
    %267 = arith.addf %266, %8 : vector<8x128xf32>
    %268 = arith.mulf %256, %267 : vector<8x128xf32>
    %269 = arith.addf %265, %268 : vector<8x128xf32>
    %270 = math.tanh %269 : vector<8x128xf32>
    %cst_59 = arith.constant 1.000000e+00 : f32
    %271 = vector.broadcast %cst_59 : f32 to vector<8x128xf32>
    %272 = arith.subf %271, %264 : vector<8x128xf32>
    %273 = arith.mulf %272, %270 : vector<8x128xf32>
    %274 = arith.mulf %264, %203 : vector<8x128xf32>
    %275 = arith.addf %273, %274 : vector<8x128xf32>
    %276 = vector.shape_cast %247 : vector<8x1xi1> to vector<8x1xi1>
    %277 = vector.broadcast %276 : vector<8x1xi1> to vector<8x128xi1>
    %278 = arith.select %277, %275, %203 : vector<8x128xi1>, vector<8x128xf32>
    %c7_i32_60 = arith.constant 7 : i32
    %279 = arith.subi %c7_i32_60, %c3_i32 : i32
    %280 = arith.index_cast %279 : i32 to index
    %c0_61 = arith.constant 0 : index
    %c0_62 = arith.constant 0 : index
    %281 = vector.load %arg3[%280, %c0_61, %c0_62] : memref<8x8x384xf32, #tpu.memory_space<vmem>>, vector<1x8x384xf32>
    %282 = vector.shape_cast %281 : vector<1x8x384xf32> to vector<8x384xf32>
    %283 = arith.addi %14, %279 : i32
    %284 = vector.broadcast %283 : i32 to vector<8x1xi32>
    %285 = arith.cmpi sgt, %3, %284 : vector<8x1xi32>
    %cst_63 = arith.constant dense<0.000000e+00> : vector<8x384xf32>
    %286 = tpu.matmul %241, %5, %cst_63 {dimension_numbers = #tpu.dot_dimension_numbers<[1], [0], [0], [1], [0, 0, 1, 1], [], []>} : vector<8x128xf32>, vector<128x384xf32>, vector<8x384xf32> -> vector<8x384xf32>
    %287 = vector.extract_strided_slice %282 {offsets = [0, 0], sizes = [8, 128], strides = [1, 1]} : vector<8x384xf32> to vector<8x128xf32>
    %288 = vector.extract_strided_slice %286 {offsets = [0, 0], sizes = [8, 128], strides = [1, 1]} : vector<8x384xf32> to vector<8x128xf32>
    %289 = arith.addf %287, %288 : vector<8x128xf32>
    %290 = arith.negf %289 : vector<8x128xf32>
    %291 = math.exp %290 : vector<8x128xf32>
    %cst_64 = arith.constant 1.000000e+00 : f32
    %292 = vector.broadcast %cst_64 : f32 to vector<8x128xf32>
    %293 = arith.addf %292, %291 : vector<8x128xf32>
    %294 = arith.divf %292, %293 : vector<8x128xf32>
    %295 = vector.extract_strided_slice %282 {offsets = [0, 128], sizes = [8, 128], strides = [1, 1]} : vector<8x384xf32> to vector<8x128xf32>
    %296 = vector.extract_strided_slice %286 {offsets = [0, 128], sizes = [8, 128], strides = [1, 1]} : vector<8x384xf32> to vector<8x128xf32>
    %297 = arith.addf %295, %296 : vector<8x128xf32>
    %298 = arith.negf %297 : vector<8x128xf32>
    %299 = math.exp %298 : vector<8x128xf32>
    %cst_65 = arith.constant 1.000000e+00 : f32
    %300 = vector.broadcast %cst_65 : f32 to vector<8x128xf32>
    %301 = arith.addf %300, %299 : vector<8x128xf32>
    %302 = arith.divf %300, %301 : vector<8x128xf32>
    %303 = vector.extract_strided_slice %282 {offsets = [0, 256], sizes = [8, 128], strides = [1, 1]} : vector<8x384xf32> to vector<8x128xf32>
    %304 = vector.extract_strided_slice %286 {offsets = [0, 256], sizes = [8, 128], strides = [1, 1]} : vector<8x384xf32> to vector<8x128xf32>
    %305 = arith.addf %304, %11 : vector<8x128xf32>
    %306 = arith.mulf %294, %305 : vector<8x128xf32>
    %307 = arith.addf %303, %306 : vector<8x128xf32>
    %308 = math.tanh %307 : vector<8x128xf32>
    %cst_66 = arith.constant 1.000000e+00 : f32
    %309 = vector.broadcast %cst_66 : f32 to vector<8x128xf32>
    %310 = arith.subf %309, %302 : vector<8x128xf32>
    %311 = arith.mulf %310, %308 : vector<8x128xf32>
    %312 = arith.mulf %302, %241 : vector<8x128xf32>
    %313 = arith.addf %311, %312 : vector<8x128xf32>
    %314 = vector.shape_cast %285 : vector<8x1xi1> to vector<8x1xi1>
    %315 = vector.broadcast %314 : vector<8x1xi1> to vector<8x128xi1>
    %316 = arith.select %315, %313, %241 : vector<8x128xi1>, vector<8x128xf32>
    %c4_i32 = arith.constant 4 : i32
    %317 = arith.index_cast %c4_i32 : i32 to index
    %c0_67 = arith.constant 0 : index
    %c0_68 = arith.constant 0 : index
    %318 = vector.load %arg2[%317, %c0_67, %c0_68] : memref<8x8x384xf32, #tpu.memory_space<vmem>>, vector<1x8x384xf32>
    %319 = vector.shape_cast %318 : vector<1x8x384xf32> to vector<8x384xf32>
    %320 = arith.addi %12, %c4_i32 : i32
    %321 = vector.broadcast %320 : i32 to vector<8x1xi32>
    %322 = arith.cmpi sgt, %3, %321 : vector<8x1xi32>
    %cst_69 = arith.constant dense<0.000000e+00> : vector<8x384xf32>
    %323 = tpu.matmul %278, %4, %cst_69 {dimension_numbers = #tpu.dot_dimension_numbers<[1], [0], [0], [1], [0, 0, 1, 1], [], []>} : vector<8x128xf32>, vector<128x384xf32>, vector<8x384xf32> -> vector<8x384xf32>
    %324 = vector.extract_strided_slice %319 {offsets = [0, 0], sizes = [8, 128], strides = [1, 1]} : vector<8x384xf32> to vector<8x128xf32>
    %325 = vector.extract_strided_slice %323 {offsets = [0, 0], sizes = [8, 128], strides = [1, 1]} : vector<8x384xf32> to vector<8x128xf32>
    %326 = arith.addf %324, %325 : vector<8x128xf32>
    %327 = arith.negf %326 : vector<8x128xf32>
    %328 = math.exp %327 : vector<8x128xf32>
    %cst_70 = arith.constant 1.000000e+00 : f32
    %329 = vector.broadcast %cst_70 : f32 to vector<8x128xf32>
    %330 = arith.addf %329, %328 : vector<8x128xf32>
    %331 = arith.divf %329, %330 : vector<8x128xf32>
    %332 = vector.extract_strided_slice %319 {offsets = [0, 128], sizes = [8, 128], strides = [1, 1]} : vector<8x384xf32> to vector<8x128xf32>
    %333 = vector.extract_strided_slice %323 {offsets = [0, 128], sizes = [8, 128], strides = [1, 1]} : vector<8x384xf32> to vector<8x128xf32>
    %334 = arith.addf %332, %333 : vector<8x128xf32>
    %335 = arith.negf %334 : vector<8x128xf32>
    %336 = math.exp %335 : vector<8x128xf32>
    %cst_71 = arith.constant 1.000000e+00 : f32
    %337 = vector.broadcast %cst_71 : f32 to vector<8x128xf32>
    %338 = arith.addf %337, %336 : vector<8x128xf32>
    %339 = arith.divf %337, %338 : vector<8x128xf32>
    %340 = vector.extract_strided_slice %319 {offsets = [0, 256], sizes = [8, 128], strides = [1, 1]} : vector<8x384xf32> to vector<8x128xf32>
    %341 = vector.extract_strided_slice %323 {offsets = [0, 256], sizes = [8, 128], strides = [1, 1]} : vector<8x384xf32> to vector<8x128xf32>
    %342 = arith.addf %341, %8 : vector<8x128xf32>
    %343 = arith.mulf %331, %342 : vector<8x128xf32>
    %344 = arith.addf %340, %343 : vector<8x128xf32>
    %345 = math.tanh %344 : vector<8x128xf32>
    %cst_72 = arith.constant 1.000000e+00 : f32
    %346 = vector.broadcast %cst_72 : f32 to vector<8x128xf32>
    %347 = arith.subf %346, %339 : vector<8x128xf32>
    %348 = arith.mulf %347, %345 : vector<8x128xf32>
    %349 = arith.mulf %339, %278 : vector<8x128xf32>
    %350 = arith.addf %348, %349 : vector<8x128xf32>
    %351 = vector.shape_cast %322 : vector<8x1xi1> to vector<8x1xi1>
    %352 = vector.broadcast %351 : vector<8x1xi1> to vector<8x128xi1>
    %353 = arith.select %352, %350, %278 : vector<8x128xi1>, vector<8x128xf32>
    %c7_i32_73 = arith.constant 7 : i32
    %354 = arith.subi %c7_i32_73, %c4_i32 : i32
    %355 = arith.index_cast %354 : i32 to index
    %c0_74 = arith.constant 0 : index
    %c0_75 = arith.constant 0 : index
    %356 = vector.load %arg3[%355, %c0_74, %c0_75] : memref<8x8x384xf32, #tpu.memory_space<vmem>>, vector<1x8x384xf32>
    %357 = vector.shape_cast %356 : vector<1x8x384xf32> to vector<8x384xf32>
    %358 = arith.addi %14, %354 : i32
    %359 = vector.broadcast %358 : i32 to vector<8x1xi32>
    %360 = arith.cmpi sgt, %3, %359 : vector<8x1xi32>
    %cst_76 = arith.constant dense<0.000000e+00> : vector<8x384xf32>
    %361 = tpu.matmul %316, %5, %cst_76 {dimension_numbers = #tpu.dot_dimension_numbers<[1], [0], [0], [1], [0, 0, 1, 1], [], []>} : vector<8x128xf32>, vector<128x384xf32>, vector<8x384xf32> -> vector<8x384xf32>
    %362 = vector.extract_strided_slice %357 {offsets = [0, 0], sizes = [8, 128], strides = [1, 1]} : vector<8x384xf32> to vector<8x128xf32>
    %363 = vector.extract_strided_slice %361 {offsets = [0, 0], sizes = [8, 128], strides = [1, 1]} : vector<8x384xf32> to vector<8x128xf32>
    %364 = arith.addf %362, %363 : vector<8x128xf32>
    %365 = arith.negf %364 : vector<8x128xf32>
    %366 = math.exp %365 : vector<8x128xf32>
    %cst_77 = arith.constant 1.000000e+00 : f32
    %367 = vector.broadcast %cst_77 : f32 to vector<8x128xf32>
    %368 = arith.addf %367, %366 : vector<8x128xf32>
    %369 = arith.divf %367, %368 : vector<8x128xf32>
    %370 = vector.extract_strided_slice %357 {offsets = [0, 128], sizes = [8, 128], strides = [1, 1]} : vector<8x384xf32> to vector<8x128xf32>
    %371 = vector.extract_strided_slice %361 {offsets = [0, 128], sizes = [8, 128], strides = [1, 1]} : vector<8x384xf32> to vector<8x128xf32>
    %372 = arith.addf %370, %371 : vector<8x128xf32>
    %373 = arith.negf %372 : vector<8x128xf32>
    %374 = math.exp %373 : vector<8x128xf32>
    %cst_78 = arith.constant 1.000000e+00 : f32
    %375 = vector.broadcast %cst_78 : f32 to vector<8x128xf32>
    %376 = arith.addf %375, %374 : vector<8x128xf32>
    %377 = arith.divf %375, %376 : vector<8x128xf32>
    %378 = vector.extract_strided_slice %357 {offsets = [0, 256], sizes = [8, 128], strides = [1, 1]} : vector<8x384xf32> to vector<8x128xf32>
    %379 = vector.extract_strided_slice %361 {offsets = [0, 256], sizes = [8, 128], strides = [1, 1]} : vector<8x384xf32> to vector<8x128xf32>
    %380 = arith.addf %379, %11 : vector<8x128xf32>
    %381 = arith.mulf %369, %380 : vector<8x128xf32>
    %382 = arith.addf %378, %381 : vector<8x128xf32>
    %383 = math.tanh %382 : vector<8x128xf32>
    %cst_79 = arith.constant 1.000000e+00 : f32
    %384 = vector.broadcast %cst_79 : f32 to vector<8x128xf32>
    %385 = arith.subf %384, %377 : vector<8x128xf32>
    %386 = arith.mulf %385, %383 : vector<8x128xf32>
    %387 = arith.mulf %377, %316 : vector<8x128xf32>
    %388 = arith.addf %386, %387 : vector<8x128xf32>
    %389 = vector.shape_cast %360 : vector<8x1xi1> to vector<8x1xi1>
    %390 = vector.broadcast %389 : vector<8x1xi1> to vector<8x128xi1>
    %391 = arith.select %390, %388, %316 : vector<8x128xi1>, vector<8x128xf32>
    %c5_i32 = arith.constant 5 : i32
    %392 = arith.index_cast %c5_i32 : i32 to index
    %c0_80 = arith.constant 0 : index
    %c0_81 = arith.constant 0 : index
    %393 = vector.load %arg2[%392, %c0_80, %c0_81] : memref<8x8x384xf32, #tpu.memory_space<vmem>>, vector<1x8x384xf32>
    %394 = vector.shape_cast %393 : vector<1x8x384xf32> to vector<8x384xf32>
    %395 = arith.addi %12, %c5_i32 : i32
    %396 = vector.broadcast %395 : i32 to vector<8x1xi32>
    %397 = arith.cmpi sgt, %3, %396 : vector<8x1xi32>
    %cst_82 = arith.constant dense<0.000000e+00> : vector<8x384xf32>
    %398 = tpu.matmul %353, %4, %cst_82 {dimension_numbers = #tpu.dot_dimension_numbers<[1], [0], [0], [1], [0, 0, 1, 1], [], []>} : vector<8x128xf32>, vector<128x384xf32>, vector<8x384xf32> -> vector<8x384xf32>
    %399 = vector.extract_strided_slice %394 {offsets = [0, 0], sizes = [8, 128], strides = [1, 1]} : vector<8x384xf32> to vector<8x128xf32>
    %400 = vector.extract_strided_slice %398 {offsets = [0, 0], sizes = [8, 128], strides = [1, 1]} : vector<8x384xf32> to vector<8x128xf32>
    %401 = arith.addf %399, %400 : vector<8x128xf32>
    %402 = arith.negf %401 : vector<8x128xf32>
    %403 = math.exp %402 : vector<8x128xf32>
    %cst_83 = arith.constant 1.000000e+00 : f32
    %404 = vector.broadcast %cst_83 : f32 to vector<8x128xf32>
    %405 = arith.addf %404, %403 : vector<8x128xf32>
    %406 = arith.divf %404, %405 : vector<8x128xf32>
    %407 = vector.extract_strided_slice %394 {offsets = [0, 128], sizes = [8, 128], strides = [1, 1]} : vector<8x384xf32> to vector<8x128xf32>
    %408 = vector.extract_strided_slice %398 {offsets = [0, 128], sizes = [8, 128], strides = [1, 1]} : vector<8x384xf32> to vector<8x128xf32>
    %409 = arith.addf %407, %408 : vector<8x128xf32>
    %410 = arith.negf %409 : vector<8x128xf32>
    %411 = math.exp %410 : vector<8x128xf32>
    %cst_84 = arith.constant 1.000000e+00 : f32
    %412 = vector.broadcast %cst_84 : f32 to vector<8x128xf32>
    %413 = arith.addf %412, %411 : vector<8x128xf32>
    %414 = arith.divf %412, %413 : vector<8x128xf32>
    %415 = vector.extract_strided_slice %394 {offsets = [0, 256], sizes = [8, 128], strides = [1, 1]} : vector<8x384xf32> to vector<8x128xf32>
    %416 = vector.extract_strided_slice %398 {offsets = [0, 256], sizes = [8, 128], strides = [1, 1]} : vector<8x384xf32> to vector<8x128xf32>
    %417 = arith.addf %416, %8 : vector<8x128xf32>
    %418 = arith.mulf %406, %417 : vector<8x128xf32>
    %419 = arith.addf %415, %418 : vector<8x128xf32>
    %420 = math.tanh %419 : vector<8x128xf32>
    %cst_85 = arith.constant 1.000000e+00 : f32
    %421 = vector.broadcast %cst_85 : f32 to vector<8x128xf32>
    %422 = arith.subf %421, %414 : vector<8x128xf32>
    %423 = arith.mulf %422, %420 : vector<8x128xf32>
    %424 = arith.mulf %414, %353 : vector<8x128xf32>
    %425 = arith.addf %423, %424 : vector<8x128xf32>
    %426 = vector.shape_cast %397 : vector<8x1xi1> to vector<8x1xi1>
    %427 = vector.broadcast %426 : vector<8x1xi1> to vector<8x128xi1>
    %428 = arith.select %427, %425, %353 : vector<8x128xi1>, vector<8x128xf32>
    %c7_i32_86 = arith.constant 7 : i32
    %429 = arith.subi %c7_i32_86, %c5_i32 : i32
    %430 = arith.index_cast %429 : i32 to index
    %c0_87 = arith.constant 0 : index
    %c0_88 = arith.constant 0 : index
    %431 = vector.load %arg3[%430, %c0_87, %c0_88] : memref<8x8x384xf32, #tpu.memory_space<vmem>>, vector<1x8x384xf32>
    %432 = vector.shape_cast %431 : vector<1x8x384xf32> to vector<8x384xf32>
    %433 = arith.addi %14, %429 : i32
    %434 = vector.broadcast %433 : i32 to vector<8x1xi32>
    %435 = arith.cmpi sgt, %3, %434 : vector<8x1xi32>
    %cst_89 = arith.constant dense<0.000000e+00> : vector<8x384xf32>
    %436 = tpu.matmul %391, %5, %cst_89 {dimension_numbers = #tpu.dot_dimension_numbers<[1], [0], [0], [1], [0, 0, 1, 1], [], []>} : vector<8x128xf32>, vector<128x384xf32>, vector<8x384xf32> -> vector<8x384xf32>
    %437 = vector.extract_strided_slice %432 {offsets = [0, 0], sizes = [8, 128], strides = [1, 1]} : vector<8x384xf32> to vector<8x128xf32>
    %438 = vector.extract_strided_slice %436 {offsets = [0, 0], sizes = [8, 128], strides = [1, 1]} : vector<8x384xf32> to vector<8x128xf32>
    %439 = arith.addf %437, %438 : vector<8x128xf32>
    %440 = arith.negf %439 : vector<8x128xf32>
    %441 = math.exp %440 : vector<8x128xf32>
    %cst_90 = arith.constant 1.000000e+00 : f32
    %442 = vector.broadcast %cst_90 : f32 to vector<8x128xf32>
    %443 = arith.addf %442, %441 : vector<8x128xf32>
    %444 = arith.divf %442, %443 : vector<8x128xf32>
    %445 = vector.extract_strided_slice %432 {offsets = [0, 128], sizes = [8, 128], strides = [1, 1]} : vector<8x384xf32> to vector<8x128xf32>
    %446 = vector.extract_strided_slice %436 {offsets = [0, 128], sizes = [8, 128], strides = [1, 1]} : vector<8x384xf32> to vector<8x128xf32>
    %447 = arith.addf %445, %446 : vector<8x128xf32>
    %448 = arith.negf %447 : vector<8x128xf32>
    %449 = math.exp %448 : vector<8x128xf32>
    %cst_91 = arith.constant 1.000000e+00 : f32
    %450 = vector.broadcast %cst_91 : f32 to vector<8x128xf32>
    %451 = arith.addf %450, %449 : vector<8x128xf32>
    %452 = arith.divf %450, %451 : vector<8x128xf32>
    %453 = vector.extract_strided_slice %432 {offsets = [0, 256], sizes = [8, 128], strides = [1, 1]} : vector<8x384xf32> to vector<8x128xf32>
    %454 = vector.extract_strided_slice %436 {offsets = [0, 256], sizes = [8, 128], strides = [1, 1]} : vector<8x384xf32> to vector<8x128xf32>
    %455 = arith.addf %454, %11 : vector<8x128xf32>
    %456 = arith.mulf %444, %455 : vector<8x128xf32>
    %457 = arith.addf %453, %456 : vector<8x128xf32>
    %458 = math.tanh %457 : vector<8x128xf32>
    %cst_92 = arith.constant 1.000000e+00 : f32
    %459 = vector.broadcast %cst_92 : f32 to vector<8x128xf32>
    %460 = arith.subf %459, %452 : vector<8x128xf32>
    %461 = arith.mulf %460, %458 : vector<8x128xf32>
    %462 = arith.mulf %452, %391 : vector<8x128xf32>
    %463 = arith.addf %461, %462 : vector<8x128xf32>
    %464 = vector.shape_cast %435 : vector<8x1xi1> to vector<8x1xi1>
    %465 = vector.broadcast %464 : vector<8x1xi1> to vector<8x128xi1>
    %466 = arith.select %465, %463, %391 : vector<8x128xi1>, vector<8x128xf32>
    %c6_i32 = arith.constant 6 : i32
    %467 = arith.index_cast %c6_i32 : i32 to index
    %c0_93 = arith.constant 0 : index
    %c0_94 = arith.constant 0 : index
    %468 = vector.load %arg2[%467, %c0_93, %c0_94] : memref<8x8x384xf32, #tpu.memory_space<vmem>>, vector<1x8x384xf32>
    %469 = vector.shape_cast %468 : vector<1x8x384xf32> to vector<8x384xf32>
    %470 = arith.addi %12, %c6_i32 : i32
    %471 = vector.broadcast %470 : i32 to vector<8x1xi32>
    %472 = arith.cmpi sgt, %3, %471 : vector<8x1xi32>
    %cst_95 = arith.constant dense<0.000000e+00> : vector<8x384xf32>
    %473 = tpu.matmul %428, %4, %cst_95 {dimension_numbers = #tpu.dot_dimension_numbers<[1], [0], [0], [1], [0, 0, 1, 1], [], []>} : vector<8x128xf32>, vector<128x384xf32>, vector<8x384xf32> -> vector<8x384xf32>
    %474 = vector.extract_strided_slice %469 {offsets = [0, 0], sizes = [8, 128], strides = [1, 1]} : vector<8x384xf32> to vector<8x128xf32>
    %475 = vector.extract_strided_slice %473 {offsets = [0, 0], sizes = [8, 128], strides = [1, 1]} : vector<8x384xf32> to vector<8x128xf32>
    %476 = arith.addf %474, %475 : vector<8x128xf32>
    %477 = arith.negf %476 : vector<8x128xf32>
    %478 = math.exp %477 : vector<8x128xf32>
    %cst_96 = arith.constant 1.000000e+00 : f32
    %479 = vector.broadcast %cst_96 : f32 to vector<8x128xf32>
    %480 = arith.addf %479, %478 : vector<8x128xf32>
    %481 = arith.divf %479, %480 : vector<8x128xf32>
    %482 = vector.extract_strided_slice %469 {offsets = [0, 128], sizes = [8, 128], strides = [1, 1]} : vector<8x384xf32> to vector<8x128xf32>
    %483 = vector.extract_strided_slice %473 {offsets = [0, 128], sizes = [8, 128], strides = [1, 1]} : vector<8x384xf32> to vector<8x128xf32>
    %484 = arith.addf %482, %483 : vector<8x128xf32>
    %485 = arith.negf %484 : vector<8x128xf32>
    %486 = math.exp %485 : vector<8x128xf32>
    %cst_97 = arith.constant 1.000000e+00 : f32
    %487 = vector.broadcast %cst_97 : f32 to vector<8x128xf32>
    %488 = arith.addf %487, %486 : vector<8x128xf32>
    %489 = arith.divf %487, %488 : vector<8x128xf32>
    %490 = vector.extract_strided_slice %469 {offsets = [0, 256], sizes = [8, 128], strides = [1, 1]} : vector<8x384xf32> to vector<8x128xf32>
    %491 = vector.extract_strided_slice %473 {offsets = [0, 256], sizes = [8, 128], strides = [1, 1]} : vector<8x384xf32> to vector<8x128xf32>
    %492 = arith.addf %491, %8 : vector<8x128xf32>
    %493 = arith.mulf %481, %492 : vector<8x128xf32>
    %494 = arith.addf %490, %493 : vector<8x128xf32>
    %495 = math.tanh %494 : vector<8x128xf32>
    %cst_98 = arith.constant 1.000000e+00 : f32
    %496 = vector.broadcast %cst_98 : f32 to vector<8x128xf32>
    %497 = arith.subf %496, %489 : vector<8x128xf32>
    %498 = arith.mulf %497, %495 : vector<8x128xf32>
    %499 = arith.mulf %489, %428 : vector<8x128xf32>
    %500 = arith.addf %498, %499 : vector<8x128xf32>
    %501 = vector.shape_cast %472 : vector<8x1xi1> to vector<8x1xi1>
    %502 = vector.broadcast %501 : vector<8x1xi1> to vector<8x128xi1>
    %503 = arith.select %502, %500, %428 : vector<8x128xi1>, vector<8x128xf32>
    %c7_i32_99 = arith.constant 7 : i32
    %504 = arith.subi %c7_i32_99, %c6_i32 : i32
    %505 = arith.index_cast %504 : i32 to index
    %c0_100 = arith.constant 0 : index
    %c0_101 = arith.constant 0 : index
    %506 = vector.load %arg3[%505, %c0_100, %c0_101] : memref<8x8x384xf32, #tpu.memory_space<vmem>>, vector<1x8x384xf32>
    %507 = vector.shape_cast %506 : vector<1x8x384xf32> to vector<8x384xf32>
    %508 = arith.addi %14, %504 : i32
    %509 = vector.broadcast %508 : i32 to vector<8x1xi32>
    %510 = arith.cmpi sgt, %3, %509 : vector<8x1xi32>
    %cst_102 = arith.constant dense<0.000000e+00> : vector<8x384xf32>
    %511 = tpu.matmul %466, %5, %cst_102 {dimension_numbers = #tpu.dot_dimension_numbers<[1], [0], [0], [1], [0, 0, 1, 1], [], []>} : vector<8x128xf32>, vector<128x384xf32>, vector<8x384xf32> -> vector<8x384xf32>
    %512 = vector.extract_strided_slice %507 {offsets = [0, 0], sizes = [8, 128], strides = [1, 1]} : vector<8x384xf32> to vector<8x128xf32>
    %513 = vector.extract_strided_slice %511 {offsets = [0, 0], sizes = [8, 128], strides = [1, 1]} : vector<8x384xf32> to vector<8x128xf32>
    %514 = arith.addf %512, %513 : vector<8x128xf32>
    %515 = arith.negf %514 : vector<8x128xf32>
    %516 = math.exp %515 : vector<8x128xf32>
    %cst_103 = arith.constant 1.000000e+00 : f32
    %517 = vector.broadcast %cst_103 : f32 to vector<8x128xf32>
    %518 = arith.addf %517, %516 : vector<8x128xf32>
    %519 = arith.divf %517, %518 : vector<8x128xf32>
    %520 = vector.extract_strided_slice %507 {offsets = [0, 128], sizes = [8, 128], strides = [1, 1]} : vector<8x384xf32> to vector<8x128xf32>
    %521 = vector.extract_strided_slice %511 {offsets = [0, 128], sizes = [8, 128], strides = [1, 1]} : vector<8x384xf32> to vector<8x128xf32>
    %522 = arith.addf %520, %521 : vector<8x128xf32>
    %523 = arith.negf %522 : vector<8x128xf32>
    %524 = math.exp %523 : vector<8x128xf32>
    %cst_104 = arith.constant 1.000000e+00 : f32
    %525 = vector.broadcast %cst_104 : f32 to vector<8x128xf32>
    %526 = arith.addf %525, %524 : vector<8x128xf32>
    %527 = arith.divf %525, %526 : vector<8x128xf32>
    %528 = vector.extract_strided_slice %507 {offsets = [0, 256], sizes = [8, 128], strides = [1, 1]} : vector<8x384xf32> to vector<8x128xf32>
    %529 = vector.extract_strided_slice %511 {offsets = [0, 256], sizes = [8, 128], strides = [1, 1]} : vector<8x384xf32> to vector<8x128xf32>
    %530 = arith.addf %529, %11 : vector<8x128xf32>
    %531 = arith.mulf %519, %530 : vector<8x128xf32>
    %532 = arith.addf %528, %531 : vector<8x128xf32>
    %533 = math.tanh %532 : vector<8x128xf32>
    %cst_105 = arith.constant 1.000000e+00 : f32
    %534 = vector.broadcast %cst_105 : f32 to vector<8x128xf32>
    %535 = arith.subf %534, %527 : vector<8x128xf32>
    %536 = arith.mulf %535, %533 : vector<8x128xf32>
    %537 = arith.mulf %527, %466 : vector<8x128xf32>
    %538 = arith.addf %536, %537 : vector<8x128xf32>
    %539 = vector.shape_cast %510 : vector<8x1xi1> to vector<8x1xi1>
    %540 = vector.broadcast %539 : vector<8x1xi1> to vector<8x128xi1>
    %541 = arith.select %540, %538, %466 : vector<8x128xi1>, vector<8x128xf32>
    %c7_i32_106 = arith.constant 7 : i32
    %542 = arith.index_cast %c7_i32_106 : i32 to index
    %c0_107 = arith.constant 0 : index
    %c0_108 = arith.constant 0 : index
    %543 = vector.load %arg2[%542, %c0_107, %c0_108] : memref<8x8x384xf32, #tpu.memory_space<vmem>>, vector<1x8x384xf32>
    %544 = vector.shape_cast %543 : vector<1x8x384xf32> to vector<8x384xf32>
    %545 = arith.addi %12, %c7_i32_106 : i32
    %546 = vector.broadcast %545 : i32 to vector<8x1xi32>
    %547 = arith.cmpi sgt, %3, %546 : vector<8x1xi32>
    %cst_109 = arith.constant dense<0.000000e+00> : vector<8x384xf32>
    %548 = tpu.matmul %503, %4, %cst_109 {dimension_numbers = #tpu.dot_dimension_numbers<[1], [0], [0], [1], [0, 0, 1, 1], [], []>} : vector<8x128xf32>, vector<128x384xf32>, vector<8x384xf32> -> vector<8x384xf32>
    %549 = vector.extract_strided_slice %544 {offsets = [0, 0], sizes = [8, 128], strides = [1, 1]} : vector<8x384xf32> to vector<8x128xf32>
    %550 = vector.extract_strided_slice %548 {offsets = [0, 0], sizes = [8, 128], strides = [1, 1]} : vector<8x384xf32> to vector<8x128xf32>
    %551 = arith.addf %549, %550 : vector<8x128xf32>
    %552 = arith.negf %551 : vector<8x128xf32>
    %553 = math.exp %552 : vector<8x128xf32>
    %cst_110 = arith.constant 1.000000e+00 : f32
    %554 = vector.broadcast %cst_110 : f32 to vector<8x128xf32>
    %555 = arith.addf %554, %553 : vector<8x128xf32>
    %556 = arith.divf %554, %555 : vector<8x128xf32>
    %557 = vector.extract_strided_slice %544 {offsets = [0, 128], sizes = [8, 128], strides = [1, 1]} : vector<8x384xf32> to vector<8x128xf32>
    %558 = vector.extract_strided_slice %548 {offsets = [0, 128], sizes = [8, 128], strides = [1, 1]} : vector<8x384xf32> to vector<8x128xf32>
    %559 = arith.addf %557, %558 : vector<8x128xf32>
    %560 = arith.negf %559 : vector<8x128xf32>
    %561 = math.exp %560 : vector<8x128xf32>
    %cst_111 = arith.constant 1.000000e+00 : f32
    %562 = vector.broadcast %cst_111 : f32 to vector<8x128xf32>
    %563 = arith.addf %562, %561 : vector<8x128xf32>
    %564 = arith.divf %562, %563 : vector<8x128xf32>
    %565 = vector.extract_strided_slice %544 {offsets = [0, 256], sizes = [8, 128], strides = [1, 1]} : vector<8x384xf32> to vector<8x128xf32>
    %566 = vector.extract_strided_slice %548 {offsets = [0, 256], sizes = [8, 128], strides = [1, 1]} : vector<8x384xf32> to vector<8x128xf32>
    %567 = arith.addf %566, %8 : vector<8x128xf32>
    %568 = arith.mulf %556, %567 : vector<8x128xf32>
    %569 = arith.addf %565, %568 : vector<8x128xf32>
    %570 = math.tanh %569 : vector<8x128xf32>
    %cst_112 = arith.constant 1.000000e+00 : f32
    %571 = vector.broadcast %cst_112 : f32 to vector<8x128xf32>
    %572 = arith.subf %571, %564 : vector<8x128xf32>
    %573 = arith.mulf %572, %570 : vector<8x128xf32>
    %574 = arith.mulf %564, %503 : vector<8x128xf32>
    %575 = arith.addf %573, %574 : vector<8x128xf32>
    %576 = vector.shape_cast %547 : vector<8x1xi1> to vector<8x1xi1>
    %577 = vector.broadcast %576 : vector<8x1xi1> to vector<8x128xi1>
    %578 = arith.select %577, %575, %503 : vector<8x128xi1>, vector<8x128xf32>
    %c7_i32_113 = arith.constant 7 : i32
    %579 = arith.subi %c7_i32_113, %c7_i32_106 : i32
    %580 = arith.index_cast %579 : i32 to index
    %c0_114 = arith.constant 0 : index
    %c0_115 = arith.constant 0 : index
    %581 = vector.load %arg3[%580, %c0_114, %c0_115] : memref<8x8x384xf32, #tpu.memory_space<vmem>>, vector<1x8x384xf32>
    %582 = vector.shape_cast %581 : vector<1x8x384xf32> to vector<8x384xf32>
    %583 = arith.addi %14, %579 : i32
    %584 = vector.broadcast %583 : i32 to vector<8x1xi32>
    %585 = arith.cmpi sgt, %3, %584 : vector<8x1xi32>
    %cst_116 = arith.constant dense<0.000000e+00> : vector<8x384xf32>
    %586 = tpu.matmul %541, %5, %cst_116 {dimension_numbers = #tpu.dot_dimension_numbers<[1], [0], [0], [1], [0, 0, 1, 1], [], []>} : vector<8x128xf32>, vector<128x384xf32>, vector<8x384xf32> -> vector<8x384xf32>
    %587 = vector.extract_strided_slice %582 {offsets = [0, 0], sizes = [8, 128], strides = [1, 1]} : vector<8x384xf32> to vector<8x128xf32>
    %588 = vector.extract_strided_slice %586 {offsets = [0, 0], sizes = [8, 128], strides = [1, 1]} : vector<8x384xf32> to vector<8x128xf32>
    %589 = arith.addf %587, %588 : vector<8x128xf32>
    %590 = arith.negf %589 : vector<8x128xf32>
    %591 = math.exp %590 : vector<8x128xf32>
    %cst_117 = arith.constant 1.000000e+00 : f32
    %592 = vector.broadcast %cst_117 : f32 to vector<8x128xf32>
    %593 = arith.addf %592, %591 : vector<8x128xf32>
    %594 = arith.divf %592, %593 : vector<8x128xf32>
    %595 = vector.extract_strided_slice %582 {offsets = [0, 128], sizes = [8, 128], strides = [1, 1]} : vector<8x384xf32> to vector<8x128xf32>
    %596 = vector.extract_strided_slice %586 {offsets = [0, 128], sizes = [8, 128], strides = [1, 1]} : vector<8x384xf32> to vector<8x128xf32>
    %597 = arith.addf %595, %596 : vector<8x128xf32>
    %598 = arith.negf %597 : vector<8x128xf32>
    %599 = math.exp %598 : vector<8x128xf32>
    %cst_118 = arith.constant 1.000000e+00 : f32
    %600 = vector.broadcast %cst_118 : f32 to vector<8x128xf32>
    %601 = arith.addf %600, %599 : vector<8x128xf32>
    %602 = arith.divf %600, %601 : vector<8x128xf32>
    %603 = vector.extract_strided_slice %582 {offsets = [0, 256], sizes = [8, 128], strides = [1, 1]} : vector<8x384xf32> to vector<8x128xf32>
    %604 = vector.extract_strided_slice %586 {offsets = [0, 256], sizes = [8, 128], strides = [1, 1]} : vector<8x384xf32> to vector<8x128xf32>
    %605 = arith.addf %604, %11 : vector<8x128xf32>
    %606 = arith.mulf %594, %605 : vector<8x128xf32>
    %607 = arith.addf %603, %606 : vector<8x128xf32>
    %608 = math.tanh %607 : vector<8x128xf32>
    %cst_119 = arith.constant 1.000000e+00 : f32
    %609 = vector.broadcast %cst_119 : f32 to vector<8x128xf32>
    %610 = arith.subf %609, %602 : vector<8x128xf32>
    %611 = arith.mulf %610, %608 : vector<8x128xf32>
    %612 = arith.mulf %602, %541 : vector<8x128xf32>
    %613 = arith.addf %611, %612 : vector<8x128xf32>
    %614 = vector.shape_cast %585 : vector<8x1xi1> to vector<8x1xi1>
    %615 = vector.broadcast %614 : vector<8x1xi1> to vector<8x128xi1>
    %616 = arith.select %615, %613, %541 : vector<8x128xi1>, vector<8x128xf32>
    %c8_i32_120 = arith.constant 8 : i32
    %c0_121 = arith.constant 0 : index
    %c0_122 = arith.constant 0 : index
    %617 = vector.load %arg14[%c0_121, %c0_122] : memref<8x128xf32, #tpu.memory_space<vmem>>, vector<8x128xf32>
    tpu.vector_store %arg14[%c0_121, %c0_122], %578 {strides = array<i32>} : memref<8x128xf32, #tpu.memory_space<vmem>>, vector<8x128xf32>,
    %c0_123 = arith.constant 0 : index
    %c0_124 = arith.constant 0 : index
    %618 = vector.load %arg15[%c0_123, %c0_124] : memref<8x128xf32, #tpu.memory_space<vmem>>, vector<8x128xf32>
    tpu.vector_store %arg15[%c0_123, %c0_124], %616 {strides = array<i32>} : memref<8x128xf32, #tpu.memory_space<vmem>>, vector<8x128xf32>,
    %c0_i32_125 = arith.constant 0 : i32
    %619 = arith.cmpi eq, %arg1, %c0_i32_125 : i32
    %620 = arith.extui %619 : i1 to i32
    %c0_i32_126 = arith.constant 0 : i32
    %621 = arith.cmpi ne, %620, %c0_i32_126 : i32
    scf.if %621 {
      %c0_127 = arith.constant 0 : index
      %c0_128 = arith.constant 0 : index
      %622 = vector.load %arg9[%c0_127, %c0_128] : memref<128x256xf32, #tpu.memory_space<vmem>>, vector<128x256xf32>
      %cst_129 = arith.constant dense<0.000000e+00> : vector<8x256xf32>
      %623 = tpu.matmul %578, %622, %cst_129 {dimension_numbers = #tpu.dot_dimension_numbers<[1], [0], [0], [1], [0, 0, 1, 1], [], []>} : vector<8x128xf32>, vector<128x256xf32>, vector<8x256xf32> -> vector<8x256xf32>
      %c0_130 = arith.constant 0 : index
      %c0_131 = arith.constant 0 : index
      %624 = vector.load %arg10[%c0_130, %c0_131] : memref<128x256xf32, #tpu.memory_space<vmem>>, vector<128x256xf32>
      %cst_132 = arith.constant dense<0.000000e+00> : vector<8x256xf32>
      %625 = tpu.matmul %616, %624, %cst_132 {dimension_numbers = #tpu.dot_dimension_numbers<[1], [0], [0], [1], [0, 0, 1, 1], [], []>} : vector<8x128xf32>, vector<128x256xf32>, vector<8x256xf32> -> vector<8x256xf32>
      %626 = arith.addf %623, %625 : vector<8x256xf32>
      %c0_133 = arith.constant 0 : index
      %c0_134 = arith.constant 0 : index
      %627 = vector.load %arg11[%c0_133, %c0_134] : memref<1x256xf32, #tpu.memory_space<vmem>>, vector<1x256xf32>
      %628 = vector.broadcast %627 : vector<1x256xf32> to vector<8x256xf32>
      %629 = arith.addf %626, %628 : vector<8x256xf32>
      %630 = vector.extract_strided_slice %629 {offsets = [0, 0], sizes = [8, 128], strides = [1, 1]} : vector<8x256xf32> to vector<8x128xf32>
      %c0_135 = arith.constant 0 : index
      %c0_136 = arith.constant 0 : index
      %631 = vector.load %arg12[%c0_135, %c0_136] : memref<8x128xf32, #tpu.memory_space<vmem>>, vector<8x128xf32>
      tpu.vector_store %arg12[%c0_135, %c0_136], %630 {strides = array<i32>} : memref<8x128xf32, #tpu.memory_space<vmem>>, vector<8x128xf32>,
      %632 = vector.extract_strided_slice %629 {offsets = [0, 128], sizes = [8, 128], strides = [1, 1]} : vector<8x256xf32> to vector<8x128xf32>
      %cst_137 = arith.constant 0.000000e+00 : f32
      %633 = vector.broadcast %cst_137 : f32 to vector<8x128xf32>
      %634 = arith.maximumf %632, %633 : vector<8x128xf32>
      %635 = vector.broadcast %cst_137 : f32 to vector<8x128xf32>
      %636 = arith.subf %632, %635 : vector<8x128xf32>
      %637 = arith.cmpf one, %636, %636 : vector<8x128xf32>
      %638 = vector.broadcast %cst_137 : f32 to vector<8x128xf32>
      %639 = arith.addf %632, %638 : vector<8x128xf32>
      %640 = math.absf %636 : vector<8x128xf32>
      %cst_138 = arith.constant 0.000000e+00 : f32
      %641 = vector.broadcast %cst_138 : f32 to vector<8x128xf32>
      %642 = arith.subf %641, %640 : vector<8x128xf32>
      %643 = math.exp %642 : vector<8x128xf32>
      %644 = math.log1p %643 : vector<8x128xf32>
      %645 = arith.addf %634, %644 : vector<8x128xf32>
      %646 = arith.select %637, %639, %645 : vector<8x128xi1>, vector<8x128xf32>
      %c0_139 = arith.constant 0 : index
      %c0_140 = arith.constant 0 : index
      %647 = vector.load %arg13[%c0_139, %c0_140] : memref<8x128xf32, #tpu.memory_space<vmem>>, vector<8x128xf32>
      tpu.vector_store %arg13[%c0_139, %c0_140], %646 {strides = array<i32>} : memref<8x128xf32, #tpu.memory_space<vmem>>, vector<8x128xf32>,
    } else {
    }
    return
  }
  func.func @transform_0(%arg0: i32, %arg1: i32) -> (i32, i32, i32) {
    %c0_i32 = arith.constant 0 : i32
    %c0_i32_0 = arith.constant 0 : i32
    return %arg1, %arg0, %c0_i32 : i32, i32, i32
  }
  func.func @transform_1(%arg0: i32, %arg1: i32) -> (i32, i32, i32) {
    %c0_i32 = arith.constant 0 : i32
    %0 = arith.subi %c0_i32, %arg1 : i32
    %c0_i32_0 = arith.constant 0 : i32
    %c0_i32_1 = arith.constant 0 : i32
    return %0, %arg0, %c0_i32_0 : i32, i32, i32
  }
  func.func @transform_2(%arg0: i32, %arg1: i32) -> (i32, i32) {
    %c0_i32 = arith.constant 0 : i32
    %c0_i32_0 = arith.constant 0 : i32
    return %arg0, %c0_i32 : i32, i32
  }
  func.func @transform_3(%arg0: i32, %arg1: i32) -> (i32, i32) {
    %c0_i32 = arith.constant 0 : i32
    %c0_i32_0 = arith.constant 0 : i32
    %c0_i32_1 = arith.constant 0 : i32
    return %c0_i32, %c0_i32_0 : i32, i32
  }
  func.func @transform_4(%arg0: i32, %arg1: i32) -> (i32, i32) {
    %c0_i32 = arith.constant 0 : i32
    %c0_i32_0 = arith.constant 0 : i32
    %c0_i32_1 = arith.constant 0 : i32
    return %c0_i32, %c0_i32_0 : i32, i32
  }
  func.func @transform_5(%arg0: i32, %arg1: i32) -> (i32, i32) {
    %c0_i32 = arith.constant 0 : i32
    %c0_i32_0 = arith.constant 0 : i32
    %c0_i32_1 = arith.constant 0 : i32
    return %c0_i32, %c0_i32_0 : i32, i32
  }
  func.func @transform_6(%arg0: i32, %arg1: i32) -> (i32, i32) {
    %c0_i32 = arith.constant 0 : i32
    %c0_i32_0 = arith.constant 0 : i32
    %c0_i32_1 = arith.constant 0 : i32
    return %c0_i32, %c0_i32_0 : i32, i32
  }
  func.func @transform_7(%arg0: i32, %arg1: i32) -> (i32, i32) {
    %c0_i32 = arith.constant 0 : i32
    %c0_i32_0 = arith.constant 0 : i32
    %c0_i32_1 = arith.constant 0 : i32
    return %c0_i32, %c0_i32_0 : i32, i32
  }
  func.func @transform_8(%arg0: i32, %arg1: i32) -> (i32, i32) {
    %c0_i32 = arith.constant 0 : i32
    %c0_i32_0 = arith.constant 0 : i32
    %c0_i32_1 = arith.constant 0 : i32
    return %c0_i32, %c0_i32_0 : i32, i32
  }
  func.func @transform_9(%arg0: i32, %arg1: i32) -> (i32, i32) {
    %c0_i32 = arith.constant 0 : i32
    %c0_i32_0 = arith.constant 0 : i32
    %c0_i32_1 = arith.constant 0 : i32
    return %c0_i32, %c0_i32_0 : i32, i32
  }
  func.func @transform_10(%arg0: i32, %arg1: i32) -> (i32, i32) {
    %c0_i32 = arith.constant 0 : i32
    %c0_i32_0 = arith.constant 0 : i32
    return %arg0, %c0_i32 : i32, i32
  }
  func.func @transform_11(%arg0: i32, %arg1: i32) -> (i32, i32) {
    %c0_i32 = arith.constant 0 : i32
    %c0_i32_0 = arith.constant 0 : i32
    return %arg0, %c0_i32 : i32, i32
  }
}

</mosaic_0001>

<bundles_post_ra>
// kernel: sentence_vae_encoder.1
= control target key start
LH: loop header
LB: loop body
LE: loop exit
PB: predicated region body
PF: predicated region fallthrough
CT: control target
= control target key end

     0   :  { %17 = vsyncpa [#allocation5], 0  ;;  %s6762_s0 = inlined_call_operand.hbm [shape: f32[8,8,384], index: 0, kind: input, shape index: {}]   ;;  %s6763_s1 = inlined_call_operand.hbm [shape: f32[8,8,384], index: 1, kind: input, shape index: {}]   ;;  %s6764_s2 = inlined_call_operand.hbm [shape: s32[8,1], index: 2, kind: input, shape index: {}]   ;;  %s6765_s3 = inlined_call_operand.hbm [shape: f32[128,384], index: 3, kind: input, shape index: {}]   ;;  %s6766_s4 = inlined_call_operand.hbm [shape: f32[1,128], index: 4, kind: input, shape index: {}]   ;;  %s6767_s5 = inlined_call_operand.hbm [shape: f32[128,384], index: 5, kind: input, shape index: {}]   ;;  %s6768_s6 = inlined_call_operand.hbm [shape: f32[1,128], index: 6, kind: input, shape index: {}]   ;;  %s6769_s7 = inlined_call_operand.hbm [shape: f32[128,256], index: 7, kind: input, shape index: {}]   ;;  %s6770_s8 = inlined_call_operand.hbm [shape: f32[128,256], index: 8, kind: input, shape index: {}]   ;;  %s6771_s9 = inlined_call_operand.hbm [shape: f32[1,256], index: 9, kind: input, shape index: {}]   ;;  %s6772_s10 = inlined_call_operand.hbm [shape: f32[8,128], index: 10, kind: output, shape index: {0}]   ;;  %s6773_s11 = inlined_call_operand.hbm [shape: f32[8,128], index: 11, kind: output, shape index: {1}]  }
   0x1   :  { %18 = vsyncpa [#allocation8], 0 }
   0x2   :  { %19 = vsyncpa [#allocation11], 0 }
   0x3   :  { %20 = vsyncpa [#allocation14], 0 }
   0x4   :  { %21 = vsyncpa [#allocation17], 0 }
   0x5   :  { %22 = vsyncpa [#allocation20], 0 }
   0x6   :  { %23 = vsyncpa [#allocation6], 0 }
   0x7   :  { %24 = vsyncpa [#allocation23], 0  ;;  %s5689_s17 = smov [#allocation7]   ;;  %s5690_s19 = smov [#allocation10]  }
   0x8   :  { %s47_s18 = sshll.u32 %s5689_s17, 4  ;;  %s69_s20 = sshll.u32 %s5690_s19, 4  ;;  %s48_s18 = int_to_ptr.vmem [resolvable:$true] %s47_s18  ;;  %s5769_s20 = int_to_ptr.vmem [resolvable:$true] %s69_s20 }
   0x9   :  { %s5409_s23 = scalar_lea.hbm %s6763_s1, 3072 }
   0xa   :  { %p5410_p0 = scmp.ne.s32.totalorder %s6763_s1, %s5409_s23  ;;  %p5413_p1 = scmp.lt.u32.totalorder %s5409_s23, %s6763_s1 }
   0xc   :  { %p5415_p2 = pnand %p5413_p1, %p5410_p0 }
   0xe   :  { %5418 = shalt.err (!%p5415_p2)
}
   0xf   :  { %s5419_s28 = scalar_lea.vmem %s48_s18, 3072  ;;  %p5424_p4 = scmp.lt.s32.totalorder %s48_s18, %s48_s18 }
  0x10   :  { %p5420_p3 = scmp.ne.s32.totalorder %s48_s18, %s5419_s28  ;;  %p5425_p5 = scmp.lt.s32.totalorder %s5419_s28, %s5419_s28 }
  0x12   :  { %p5426_p6 = por %p5425_p5, %p5424_p4 }
  0x14   :  { %p5427_p7 = pnand %p5426_p6, %p5420_p3 }
  0x16   :  { %5430 = shalt.err (!%p5427_p7)
}
  0x17   :  { %s5691_s29 = smov 384   ;;  %s5692_s30 = smov 24  }
  0x18   :  { %53 = dma.hbm_to_vmem [thread:$0]  %s6763_s1, 3072, %s48_s18, [#allocation8], %s5691_s29, %s5691_s29, %s5692_s30  }
  0x19   :  { %s5431_s16 = scalar_lea.hbm %s6765_s3, 6144 }
  0x1a   :  { %p5432_p8 = scmp.ne.s32.totalorder %s6765_s3, %s5431_s16  ;;  %p5435_p9 = scmp.lt.u32.totalorder %s5431_s16, %s6765_s3 }
  0x1c   :  { %p5437_p10 = pnand %p5435_p9, %p5432_p8 }
  0x1e   :  { %5440 = shalt.err (!%p5437_p10)
}
  0x1f   :  { %s5441_s23 = scalar_lea.vmem %s5769_s20, 6144  ;;  %p5446_p12 = scmp.lt.s32.totalorder %s5769_s20, %s5769_s20 }
  0x20   :  { %p5442_p11 = scmp.ne.s32.totalorder %s5769_s20, %s5441_s23  ;;  %p5447_p13 = scmp.lt.s32.totalorder %s5441_s23, %s5441_s23 }
  0x22   :  { %p5448_p0 = por %p5447_p13, %p5446_p12 }
  0x24   :  { %p5449_p1 = pnand %p5448_p0, %p5442_p11 }
  0x26   :  { %5452 = shalt.err (!%p5449_p1)
}
  0x27   :  { %75 = dma.hbm_to_vmem [thread:$0]  %s6765_s3, 6144, %s5769_s20, [#allocation11], %s5691_s29, %s5691_s29, %s5692_s30  }
  0x28   :  { %s5693_s24 = smov [#allocation13]   ;;  %s5694_s26 = smov [#allocation16]  }
  0x29   :  { %s91_s25 = sshll.u32 %s5693_s24, 4  ;;  %s113_s27 = sshll.u32 %s5694_s26, 4  ;;  %s92_s25 = int_to_ptr.vmem [resolvable:$true] %s91_s25  ;;  %s5806_s27 = int_to_ptr.vmem [resolvable:$true] %s113_s27 }
  0x2a   :  { %s5453_s13 = scalar_lea.hbm %s6767_s5, 6144 }
  0x2b   :  { %p5454_p2 = scmp.ne.s32.totalorder %s6767_s5, %s5453_s13  ;;  %p5457_p3 = scmp.lt.u32.totalorder %s5453_s13, %s6767_s5 }
  0x2d   :  { %p5459_p4 = pnand %p5457_p3, %p5454_p2 }
  0x2f   :  { %5462 = shalt.err (!%p5459_p4)
}
  0x30   :  { %s5463_s3 = scalar_lea.vmem %s92_s25, 6144  ;;  %p5468_p6 = scmp.lt.s32.totalorder %s92_s25, %s92_s25 }
  0x31   :  { %p5464_p5 = scmp.ne.s32.totalorder %s92_s25, %s5463_s3  ;;  %p5469_p7 = scmp.lt.s32.totalorder %s5463_s3, %s5463_s3 }
  0x33   :  { %p5470_p8 = por %p5469_p7, %p5468_p6 }
  0x35   :  { %p5471_p9 = pnand %p5470_p8, %p5464_p5 }
  0x37   :  { %5474 = shalt.err (!%p5471_p9)
}
  0x38   :  { %97 = dma.hbm_to_vmem [thread:$0]  %s6767_s5, 6144, %s92_s25, [#allocation14], %s5691_s29, %s5691_s29, %s5692_s30  }
  0x39   :  { %s5475_s23 = scalar_lea.hbm %s6769_s7, 4096 }
  0x3a   :  { %p5476_p10 = scmp.ne.s32.totalorder %s6769_s7, %s5475_s23  ;;  %p5479_p11 = scmp.lt.u32.totalorder %s5475_s23, %s6769_s7 }
  0x3c   :  { %p5481_p12 = pnand %p5479_p11, %p5476_p10 }
  0x3e   :  { %5484 = shalt.err (!%p5481_p12)
}
  0x3f   :  { %s5485_s28 = scalar_lea.vmem %s5806_s27, 4096  ;;  %p5490_p0 = scmp.lt.s32.totalorder %s5806_s27, %s5806_s27 }
  0x40   :  { %p5486_p13 = scmp.ne.s32.totalorder %s5806_s27, %s5485_s28  ;;  %p5491_p1 = scmp.lt.s32.totalorder %s5485_s28, %s5485_s28 }
  0x42   :  { %p5492_p2 = por %p5491_p1, %p5490_p0 }
  0x44   :  { %p5493_p3 = pnand %p5492_p2, %p5486_p13 }
  0x46   :  { %5496 = shalt.err (!%p5493_p3)
}
  0x47   :  { %s5695_s5 = smov 256   ;;  %s5696_s25 = smov 16  }
  0x48   :  { %119 = dma.hbm_to_vmem [thread:$0]  %s6769_s7, 4096, %s5806_s27, [#allocation17], %s5695_s5, %s5695_s5, %s5696_s25  }
  0x49   :  { %s5697_s14 = smov [#allocation4]   ;;  %s5698_s16 = smov [#allocation9]  }
  0x4a   :  { %s30_s15 = sshll.u32 %s5697_s14, 4  ;;  %s60_s17 = sshll.u32 %s5698_s16, 4  ;;  %s31_s15 = int_to_ptr.vmem [resolvable:$true] %s30_s15  ;;  %s61_s17 = int_to_ptr.vmem [resolvable:$true] %s60_s17 }
  0x4b   :  { %s5497_s19 = scalar_lea.hbm %s6762_s0, 3072 }
  0x4c   :  { %p5498_p4 = scmp.ne.s32.totalorder %s6762_s0, %s5497_s19  ;;  %p5501_p5 = scmp.lt.u32.totalorder %s5497_s19, %s6762_s0 }
  0x4e   :  { %p5503_p6 = pnand %p5501_p5, %p5498_p4 }
  0x50   :  { %5506 = shalt.err (!%p5503_p6)
}
  0x51   :  { %s5507_s7 = scalar_lea.vmem %s31_s15, 3072  ;;  %p5512_p8 = scmp.lt.s32.totalorder %s31_s15, %s31_s15 }
  0x52   :  { %p5508_p7 = scmp.ne.s32.totalorder %s31_s15, %s5507_s7  ;;  %p5513_p9 = scmp.lt.s32.totalorder %s5507_s7, %s5507_s7 }
  0x54   :  { %p5514_p10 = por %p5513_p9, %p5512_p8 }
  0x56   :  { %p5515_p11 = pnand %p5514_p10, %p5508_p7 }
  0x58   :  { %5518 = shalt.err (!%p5515_p11)
}
  0x59   :  { %36 = dma.hbm_to_vmem [thread:$0]  %s6762_s0, 3072, %s31_s15, [#allocation5], %s5691_s29, %s5691_s29, %s5692_s30  }
  0x5a   :  { %s5519_s28 = scalar_lea.hbm %s6764_s2, 128 }
  0x5b   :  { %p5520_p12 = scmp.ne.s32.totalorder %s6764_s2, %s5519_s28  ;;  %p5523_p13 = scmp.lt.u32.totalorder %s5519_s28, %s6764_s2 }
  0x5d   :  { %p5525_p0 = pnand %p5523_p13, %p5520_p12 }
  0x5f   :  { %5528 = shalt.err (!%p5525_p0)
}
  0x60   :  { %s5529_s3 = scalar_lea.vmem %s61_s17, 128  ;;  %p5534_p2 = scmp.lt.s32.totalorder %s61_s17, %s61_s17 }
  0x61   :  { %p5530_p1 = scmp.ne.s32.totalorder %s61_s17, %s5529_s3  ;;  %p5535_p3 = scmp.lt.s32.totalorder %s5529_s3, %s5529_s3 }
  0x63   :  { %p5536_p4 = por %p5535_p3, %p5534_p2 }
  0x65   :  { %p5537_p5 = pnand %p5536_p4, %p5530_p1 }
  0x67   :  { %5540 = shalt.err (!%p5537_p5)
}
  0x68   :  { %63 = dma.hbm_to_vmem [thread:$0]  %s6764_s2, 128, %s61_s17, [#allocation8]  }
  0x69   :  { %s5699_s30 = smov [#allocation12]   ;;  %s5700_s20 = smov [#allocation15]  }
  0x6a   :  { %s82_s15 = sshll.u32 %s5699_s30, 4  ;;  %s104_s19 = sshll.u32 %s5700_s20, 4  ;;  %s83_s15 = int_to_ptr.vmem [resolvable:$true] %s82_s15  ;;  %s105_s19 = int_to_ptr.vmem [resolvable:$true] %s104_s19 }
  0x6b   :  { %s5541_s23 = scalar_lea.hbm %s6766_s4, 16 }
  0x6c   :  { %p5542_p6 = scmp.ne.s32.totalorder %s6766_s4, %s5541_s23  ;;  %p5545_p7 = scmp.lt.u32.totalorder %s5541_s23, %s6766_s4 }
  0x6e   :  { %p5547_p8 = pnand %p5545_p7, %p5542_p6 }
  0x70   :  { %5550 = shalt.err (!%p5547_p8)
}
  0x71   :  { %s5551_s2 = scalar_lea.vmem %s83_s15, 16  ;;  %s5555_s17 = scalar_lea.vmem %s83_s15, 32 }
  0x72   :  { %p5552_p9 = scmp.ne.s32.totalorder %s83_s15, %s5551_s2  ;;  %p5556_p10 = scmp.lt.s32.totalorder %s83_s15, %s83_s15 }
  0x73   :  { %p5557_p11 = scmp.lt.s32.totalorder %s5555_s17, %s5551_s2 }
  0x75   :  { %p5558_p12 = por %p5557_p11, %p5556_p10 }
  0x77   :  { %p5559_p13 = pnand %p5558_p12, %p5552_p9 }
  0x79   :  { %5562 = shalt.err (!%p5559_p13)
}
  0x7a   :  { %85 = dma.hbm_to_vmem [thread:$0]  %s6766_s4, 16, %s83_s15, [#allocation11]  }
  0x7b   :  { %s5563_s13 = scalar_lea.hbm %s6768_s6, 16 }
  0x7c   :  { %p5564_p0 = scmp.ne.s32.totalorder %s6768_s6, %s5563_s13  ;;  %p5567_p1 = scmp.lt.u32.totalorder %s5563_s13, %s6768_s6 }
  0x7e   :  { %p5569_p2 = pnand %p5567_p1, %p5564_p0 }
  0x80   :  { %5572 = shalt.err (!%p5569_p2)
}
  0x81   :  { %s5573_s29 = scalar_lea.vmem %s105_s19, 16  ;;  %s5577_s30 = scalar_lea.vmem %s105_s19, 32 }
  0x82   :  { %p5574_p3 = scmp.ne.s32.totalorder %s105_s19, %s5573_s29  ;;  %p5578_p4 = scmp.lt.s32.totalorder %s105_s19, %s105_s19 }
  0x83   :  { %p5579_p5 = scmp.lt.s32.totalorder %s5577_s30, %s5573_s29 }
  0x85   :  { %p5580_p6 = por %p5579_p5, %p5578_p4 }
  0x87   :  { %p5581_p7 = pnand %p5580_p6, %p5574_p3 }
  0x89   :  { %5584 = shalt.err (!%p5581_p7)
}
  0x8a   :  { %107 = dma.hbm_to_vmem [thread:$0]  %s6768_s6, 16, %s105_s19, [#allocation14]  }
  0x8b   :  { %s5701_s20 = smov [#allocation18]   ;;  %s5702_s22 = smov [#allocation19]  }
  0x8c   :  { %s125_s21 = sshll.u32 %s5701_s20, 4  ;;  %s138_s23 = sshll.u32 %s5702_s22, 4  ;;  %s126_s21 = int_to_ptr.vmem [resolvable:$true] %s125_s21  ;;  %s139_s23 = int_to_ptr.vmem [resolvable:$true] %s138_s23 }
  0x8d   :  { %s5585_s27 = scalar_lea.hbm %s6770_s8, 4096 }
  0x8e   :  { %p5586_p8 = scmp.ne.s32.totalorder %s6770_s8, %s5585_s27  ;;  %p5589_p9 = scmp.lt.u32.totalorder %s5585_s27, %s6770_s8 }
  0x90   :  { %p5591_p10 = pnand %p5589_p9, %p5586_p8 }
  0x92   :  { %5594 = shalt.err (!%p5591_p10)
}
  0x93   :  { %s5595_s6 = scalar_lea.vmem %s126_s21, 4096  ;;  %p5600_p12 = scmp.lt.s32.totalorder %s126_s21, %s126_s21 }
  0x94   :  { %p5596_p11 = scmp.ne.s32.totalorder %s126_s21, %s5595_s6  ;;  %p5601_p13 = scmp.lt.s32.totalorder %s5595_s6, %s5595_s6 }
  0x96   :  { %p5602_p0 = por %p5601_p13, %p5600_p12 }
  0x98   :  { %p5603_p1 = pnand %p5602_p0, %p5596_p11 }
  0x9a   :  { %5606 = shalt.err (!%p5603_p1)
}
  0x9b   :  { %131 = dma.hbm_to_vmem [thread:$0]  %s6770_s8, 4096, %s126_s21, [#allocation17], %s5695_s5, %s5695_s5, %s5696_s25  }
  0x9c   :  { %s5607_s13 = scalar_lea.hbm %s6771_s9, 32 }
  0x9d   :  { %p5608_p2 = scmp.ne.s32.totalorder %s6771_s9, %s5607_s13  ;;  %p5611_p3 = scmp.lt.u32.totalorder %s5607_s13, %s6771_s9 }
  0x9f   :  { %p5613_p4 = pnand %p5611_p3, %p5608_p2 }
  0xa1   :  { %5616 = shalt.err (!%p5613_p4)
}
  0xa2   :  { %s5617_s29 = scalar_lea.vmem %s139_s23, 32  ;;  %p5622_p6 = scmp.lt.s32.totalorder %s139_s23, %s139_s23 }
  0xa3   :  { %p5618_p5 = scmp.ne.s32.totalorder %s139_s23, %s5617_s29  ;;  %p5623_p7 = scmp.lt.s32.totalorder %s5617_s29, %s5617_s29 }
  0xa5   :  { %p5624_p8 = por %p5623_p7, %p5622_p6 }
  0xa7   :  { %p5625_p9 = pnand %p5624_p8, %p5618_p5 }
  0xa9   :  { %5628 = shalt.err (!%p5625_p9)
}
  0xaa   :  { %141 = dma.hbm_to_vmem [thread:$0]  %s6771_s9, 32, %s139_s23, [#allocation20]  }
  0xab   :  { %5673 = dma.done.wait [#allocation5], 3072  }
  0xac   :  { %5674 = vsyncadd [#allocation5], 4294964224 }
  0xad   :  { %5675 = dma.done.wait [#allocation8], 3200  }
  0xae   :  { %5676 = vsyncadd [#allocation8], 4294964096 }
  0xaf   :  { %5677 = dma.done.wait [#allocation11], 6160  }
  0xb0   :  { %5678 = vsyncadd [#allocation11], 4294961136 }
  0xb1   :  { %5679 = dma.done.wait [#allocation14], 6160  }
  0xb2   :  { %5680 = vsyncadd [#allocation14], 4294961136 }
  0xb3   :  { %5681 = dma.done.wait [#allocation17], 8192  }
  0xb4   :  { %5682 = vsyncadd [#allocation17], 4294959104 }
  0xb5   :  { %5683 = dma.done.wait [#allocation20], 32  }
  0xb6   :  { %5684 = vsyncadd [#allocation20], 4294967264  ;;  %v6774_v0 = vmov 0.0   ;;  %v5704_v1 = vmov 0   ;;  %v182_v2 = vld [vmem:[#allocation10 + $0x8] sm:$0xff]  ;;  %v185_v3 = vld [vmem:[#allocation10 + $0x20] sm:$0xff] }
  0xb7   :  { %365 = vmatprep.mubr.f32.mxu1 %v6774_v0  ;;  %541 = vmatprep.mubr.f32.mxu0 %v6774_v0  ;;  %v181_v4 = vld [vmem:[#allocation10] sm:$0xff]  ;;  %v5925_v5 = vpack.c.bf16 %v185_v3, %v182_v2  ;;  %v184_v6 = vld [vmem:[#allocation10 + $0x18] sm:$0xff]  ;;  %v191_v8 = vld [vmem:[#allocation10 + $0x50] sm:$0xff]  ;;  %vm5706_vm3 = vmmov 0   ;;  %s5707_s9 = smov [#allocation21]  }
  0xb8   :  { %5241 = vset.pattern.permute.xlu0 %v5704_v1  ;;  %5242 = vset.pattern.permute.xlu1 %v5704_v1  ;;  %v188_v7 = vld [vmem:[#allocation10 + $0x38] sm:$0xff]  ;;  %v5927_v9 = vpack.c.bf16 %v184_v6, %v181_v4  ;;  %v187_v11 = vld [vmem:[#allocation10 + $0x30] sm:$0xff]  ;;  %v190_v12 = vld [vmem:[#allocation10 + $0x48] sm:$0xff]  ;;  %s3359_s25 = sshll.u32 %s5707_s9, 4  ;;  %s3360_s25 = int_to_ptr.vmem [resolvable:$true] %s3359_s25 }
  0xb9   :  { %v5929_v10 = vpack.c.bf16 %v191_v8, %v188_v7  ;;  %v194_v13 = vld [vmem:[#allocation10 + $0x68] sm:$0xff]  ;;  %4260 = vmatprep.subr.bf16.mxu1 %v5925_v5  ;;  %v197_v14 = vld [vmem:[#allocation10 + $0x80] sm:$0xff]  ;;  %v5933_v15 = vpack.c.bf16 %v190_v12, %v187_v11  ;;  %v196_v18 = vld [vmem:[#allocation10 + $0x78] sm:$0xff]  ;;  %s5629_s30 = scalar_lea.vmem %s3360_s25, 128  ;;  %p5634_p11 = scmp.lt.s32.totalorder %s3360_s25, %s3360_s25 }
  0xba   :  { %4262 = vmatpush1.bf16.msra.mxu1 %v5927_v9  ;;  %v5936_v16 = vpack.c.bf16 %v197_v14, %v194_v13  ;;  %v193_v17 = vld [vmem:[#allocation10 + $0x60] sm:$0xff]  ;;  %v200_v19 = vld [vmem:[#allocation10 + $0x98] sm:$0xff]  ;;  %v203_v20 = vld [vmem:[#allocation10 + $0xb0] sm:$0xff]  ;;  %p5630_p10 = scmp.ne.s32.totalorder %s3360_s25, %s5629_s30  ;;  %p5635_p12 = scmp.lt.s32.totalorder %s5629_s30, %s5629_s30 }
  0xbb   :  { %4264 = vmatprep.subr.bf16.mxu1 %v5929_v10  ;;  %v5939_v21 = vpack.c.bf16 %v196_v18, %v193_v17  ;;  %v5942_v22 = vpack.c.bf16 %v203_v20, %v200_v19  ;;  %v199_v23 = vld [vmem:[#allocation10 + $0x90] sm:$0xff]  ;;  %v202_v24 = vld [vmem:[#allocation10 + $0xa8] sm:$0xff]  ;;  %v209_v26 = vld [vmem:[#allocation10 + $0xe0] sm:$0xff] }
  0xbc   :  { %v206_v25 = vld [vmem:[#allocation10 + $0xc8] sm:$0xff]  ;;  %v205_v27 = vld [vmem:[#allocation10 + $0xc0] sm:$0xff]  ;;  %v208_v28 = vld [vmem:[#allocation10 + $0xd8] sm:$0xff]  ;;  %v5945_v29 = vpack.c.bf16 %v202_v24, %v199_v23  ;;  %p5636_p13 = por %p5635_p12, %p5634_p11 }
  0xbd   :  { %v230_v30 = vld [vmem:[#allocation13 + $0x8] sm:$0xff]  ;;  %v233_v31 = vld [vmem:[#allocation13 + $0x20] sm:$0xff]  ;;  %v5948_v33 = vpack.c.bf16 %v209_v26, %v206_v25  ;;  %v212_v34 = vld [vmem:[#allocation10 + $0xf8] sm:$0xff]  ;;  %v5958_v45 = vpack.c.bf16 %v208_v28, %v205_v27 }
  0xbe   :  { %4266 = vmatpush1.bf16.msra.mxu1 %v5933_v15  ;;  %v229_v32 = vld [vmem:[#allocation13] sm:$0xff]  ;;  %v215_v35 = vld [vmem:[#allocation10 + $0x110] sm:$0xff]  ;;  %v5950_v36 = vpack.c.bf16 %v233_v31, %v230_v30  ;;  %v232_v37 = vld [vmem:[#allocation13 + $0x18] sm:$0xff]  ;;  %p5637_p0 = pnand %p5636_p13, %p5630_p10 }
  0xbf   :  { %4268 = vmatprep.subr.bf16.mxu1 %v5936_v16  ;;  %v5952_v38 = vpack.c.bf16 %v232_v37, %v229_v32  ;;  %v236_v39 = vld [vmem:[#allocation13 + $0x38] sm:$0xff]  ;;  %v239_v40 = vld [vmem:[#allocation13 + $0x50] sm:$0xff]  ;;  %v238_v44 = vld [vmem:[#allocation13 + $0x48] sm:$0xff]  ;;  %v5964_v50 = vpack.c.bf16 %v215_v35, %v212_v34 }
  0xc0   :  { %6803 = vst [vmem:[#allocation32_spill] sm:$0xff] %v5950_v36  ;;  %v235_v41 = vld [vmem:[#allocation13 + $0x30] sm:$0xff]  ;;  %4316 = vmatprep.subr.bf16.mxu0 %v5950_v36  ;;  %v5955_v43 = vpack.c.bf16 %v239_v40, %v236_v39  ;;  %v214_v46 = vld [vmem:[#allocation10 + $0x108] sm:$0xff]  ;;  %v244_v54 = vld [vmem:[#allocation13 + $0x78] sm:$0xff] }
  0xc1   :  { %v211_v42 = vld [vmem:[#allocation10 + $0xf0] sm:$0xff]  ;;  %4318 = vmatpush1.bf16.msra.mxu0 %v5952_v38  ;;  %v5961_v47 = vpack.c.bf16 %v238_v44, %v235_v41  ;;  %v245_v49 = vld [vmem:[#allocation13 + $0x80] sm:$0xff]  ;;  %6804 = vst [vmem:[#allocation33_spill] sm:$0xff] %v5964_v50  ;;  %v248_v56 = vld [vmem:[#allocation13 + $0x98] sm:$0xff] }
  0xc2   :  { %4270 = vmatpush1.bf16.msra.mxu1 %v5939_v21  ;;  %v242_v48 = vld [vmem:[#allocation13 + $0x68] sm:$0xff]  ;;  %4320 = vmatprep.subr.bf16.mxu0 %v5955_v43  ;;  %v241_v53 = vld [vmem:[#allocation13 + $0x60] sm:$0xff]  ;;  %v251_v57 = vld [vmem:[#allocation13 + $0xb0] sm:$0xff]  ;;  %v5970_v58 = vpack.c.bf16 %v214_v46, %v211_v42  ;;  %v6776_v42 = vmov 0.0|0.0  }
  0xc3   :  { %4272 = vmatprep.subr.bf16.mxu1 %v5942_v22  ;;  %v218_v51 = vld [vmem:[#allocation10 + $0x128] sm:$0xff]  ;;  %v5967_v52 = vpack.c.bf16 %v245_v49, %v242_v48  ;;  %v221_v55 = vld [vmem:[#allocation10 + $0x140] sm:$0xff]  ;;  %v220_v60 = vld [vmem:[#allocation10 + $0x138] sm:$0xff]  ;;  %v5973_v61 = vpack.c.bf16 %v244_v54, %v241_v53  ;;  %v5979_v2 = vpack.c.bf16 %v251_v57, %v248_v56 }
  0xc4   :  { %6805 = vst [vmem:[#allocation34_spill] sm:$0xff] %v5970_v58  ;;  %v217_v59 = vld [vmem:[#allocation10 + $0x120] sm:$0xff]  ;;  %v5976_v62 = vpack.c.bf16 %v221_v55, %v218_v51  ;;  %v224_v63 = vld [vmem:[#allocation10 + $0x158] sm:$0xff]  ;;  %v250_v4 = vld [vmem:[#allocation13 + $0xa8] sm:$0xff] }
  0xc5   :  { %4322 = vmatpush1.bf16.msra.mxu0 %v5961_v47  ;;  %v247_v3 = vld [vmem:[#allocation13 + $0x90] sm:$0xff]  ;;  %v254_v7 = vld [vmem:[#allocation13 + $0xc8] sm:$0xff]  ;;  %v257_v8 = vld [vmem:[#allocation13 + $0xe0] sm:$0xff]  ;;  %v5982_v11 = vpack.c.bf16 %v220_v60, %v217_v59 }
  0xc6   :  { %4274 = vmatpush1.bf16.msra.mxu1 %v5945_v29  ;;  %6806 = vst [vmem:[#allocation35_spill] sm:$0xff] %v5976_v62  ;;  %4324 = vmatprep.subr.bf16.mxu0 %v5967_v52  ;;  %v227_v6 = vld [vmem:[#allocation10 + $0x170] sm:$0xff]  ;;  %v5985_v13 = vpack.c.bf16 %v250_v4, %v247_v3  ;;  %v226_v17 = vld [vmem:[#allocation10 + $0x168] sm:$0xff]  ;;  %v5991_v18 = vpack.c.bf16 %v257_v8, %v254_v7  ;;  %v256_v20 = vld [vmem:[#allocation13 + $0xd8] sm:$0xff] }
  0xc7   :  { %4276 = vmatprep.subr.bf16.mxu1 %v5948_v33  ;;  %6807 = vst [vmem:[#allocation36_spill] sm:$0xff] %v5982_v11  ;;  %v223_v12 = vld [vmem:[#allocation10 + $0x150] sm:$0xff]  ;;  %v5988_v14 = vpack.c.bf16 %v227_v6, %v224_v63  ;;  %v253_v19 = vld [vmem:[#allocation13 + $0xc0] sm:$0xff]  ;;  %v260_v23 = vld [vmem:[#allocation13 + $0xf8] sm:$0xff] }
  0xc8   :  { %v263_v24 = vld [vmem:[#allocation13 + $0x110] sm:$0xff]  ;;  %v5994_v25 = vpack.c.bf16 %v226_v17, %v223_v12  ;;  %v5997_v27 = vpack.c.bf16 %v256_v20, %v253_v19  ;;  %v186_v28 = vld [vmem:[#allocation10 + $0x28] sm:$0xff]  ;;  %v189_v39 = vld [vmem:[#allocation10 + $0x40] sm:$0xff] }
  0xc9   :  { %4326 = vmatpush1.bf16.msra.mxu0 %v5973_v61  ;;  %6808 = vst [vmem:[#allocation37_spill] sm:$0xff] %v5988_v14  ;;  %v183_v26 = vld [vmem:[#allocation10 + $0x10] sm:$0xff]  ;;  %v6001_v30 = vpack.c.bf16 %v263_v24, %v260_v23  ;;  %v269_v35 = vld [vmem:[#allocation13 + $0x140] sm:$0xff]  ;;  %v6009_v41 = vld [vmem:[#allocation9] sm:$0xff] }
  0xca   :  { %4278 = vmatpush1.bf16.msra.mxu1 %v5958_v45  ;;  %4328 = vmatprep.subr.bf16.mxu0 %v5979_v2  ;;  %6809 = vst [vmem:[#allocation38_spill] sm:$0xff] %v5994_v25  ;;  %v259_v31 = vld [vmem:[#allocation13 + $0xf0] sm:$0xff]  ;;  %v262_v32 = vld [vmem:[#allocation13 + $0x108] sm:$0xff]  ;;  %v6004_v37 = vpack.c.bf16 %v186_v28, %v183_v26  ;;  %v265_v48 = vld [vmem:[#allocation13 + $0x120] sm:$0xff]  ;;  %vm300_vm0 = vcmp.gt.s32.totalorder %v6009_v41, 0  ;;  %vm476_vm1 = vcmp.gt.s32.totalorder %v6009_v41, 7 }
  0xcb   :  { %4280 = vmatprep.subr.bf16.mxu1 %v5964_v50  ;;  %v266_v34 = vld [vmem:[#allocation13 + $0x128] sm:$0xff]  ;;  %v6007_v40 = vpack.c.bf16 %v262_v32, %v259_v31  ;;  %v192_v44 = vld [vmem:[#allocation10 + $0x58] sm:$0xff]  ;;  %v6018_v54 = vsel %vm300_vm0, 1, %v5704_v1  ;;  %v6029_v59 = vsel %vm476_vm1, 1, %v5704_v1  ;;  %vm1004_vm2 = vcmp.gt.s32.totalorder %v6009_v41, 2  ;;  %v201_v12 = vld [vmem:[#allocation10 + $0xa0] sm:$0xff] }
  0xcc   :  { %v6013_v46 = vpack.c.bf16 %v269_v35, %v266_v34  ;;  %v268_v49 = vld [vmem:[#allocation13 + $0x138] sm:$0xff]  ;;  %v275_v53 = vld [vmem:[#allocation13 + $0x170] sm:$0xff]  ;;  %466 = vperm.xlu0 %5241, %v6018_v54   ;;  %v6023_v55 = vpack.c.bf16 %v192_v44, %v189_v39  ;;  %v198_v60 = vld [vmem:[#allocation10 + $0x88] sm:$0xff]  ;;  %v6046_v8 = vsel %vm1004_vm2, 1, %v5704_v1  ;;  %vm1356_vm4 = vcmp.gt.s32.totalorder %v6009_v41, 3 }
  0xcd   :  { %4330 = vmatpush1.bf16.msra.mxu0 %v5985_v13  ;;  %v272_v51 = vld [vmem:[#allocation13 + $0x158] sm:$0xff]  ;;  %v195_v56 = vld [vmem:[#allocation10 + $0x70] sm:$0xff]  ;;  %v6026_v57 = vpack.c.bf16 %v268_v49, %v265_v48  ;;  %v6057_v20 = vsel %vm1356_vm4, 1, %v5704_v1  ;;  %v210_v24 = vld [vmem:[#allocation10 + $0xe8] sm:$0xff]  ;;  %vm1532_vm5 = vcmp.gt.s32.totalorder %v6009_v41, 4  ;;  %vm1180_vm6 = vcmp.gt.s32.totalorder %v6009_v41, 5 }
  0xce   :  { %4282 = vmatpush1.bf16.msra.mxu1 %v5970_v58  ;;  %4332 = vmatprep.subr.bf16.mxu0 %v5991_v18  ;;  %v6033_v63 = vpack.c.bf16 %v275_v53, %v272_v51  ;;  %v271_v3 = vld [vmem:[#allocation13 + $0x150] sm:$0xff]  ;;  %v274_v4 = vld [vmem:[#allocation13 + $0x168] sm:$0xff]  ;;  %v6040_v6 = vpack.c.bf16 %v198_v60, %v195_v56  ;;  %v6068_v28 = vsel %vm1532_vm5, 1, %v5704_v1  ;;  %v213_v31 = vld [vmem:[#allocation10 + $0x100] sm:$0xff]  ;;  %v6080_v35 = vsel %vm1180_vm6, 1, %v5704_v1 }
  0xcf   :  { %4284 = vmatprep.subr.bf16.mxu1 %v5976_v62  ;;  %v6043_v7 = vpack.c.bf16 %v274_v4, %v271_v3  ;;  %v204_v17 = vld [vmem:[#allocation10 + $0xb8] sm:$0xff]  ;;  %v207_v23 = vld [vmem:[#allocation10 + $0xd0] sm:$0xff]  ;;  %v222_v44 = vld [vmem:[#allocation10 + $0x148] sm:$0xff]  ;;  %vm828_vm7 = vcmp.gt.s32.totalorder %v6009_v41, 6  ;;  %vm652_vm8 = vcmp.gt.s32.totalorder %v6009_v41, 1 }
  0xd0   :  { %642 = vperm.xlu0 %5241, %v6029_v59   ;;  %v6053_v19 = vpack.c.bf16 %v204_v17, %v201_v12  ;;  %v6065_v26 = vpack.c.bf16 %v210_v24, %v207_v23  ;;  %v216_v32 = vld [vmem:[#allocation10 + $0x118] sm:$0xff]  ;;  %v219_v39 = vld [vmem:[#allocation10 + $0x130] sm:$0xff]  ;;  %v6091_v49 = vsel %vm828_vm7, 1, %v5704_v1  ;;  %v225_v51 = vld [vmem:[#allocation10 + $0x160] sm:$0xff] }
  0xd1   :  { %4334 = vmatpush1.bf16.msra.mxu0 %v5997_v27  ;;  %v6077_v34 = vpack.c.bf16 %v216_v32, %v213_v31  ;;  %v6088_v48 = vpack.c.bf16 %v222_v44, %v219_v39  ;;  %v228_v53 = vld [vmem:[#allocation10 + $0x178] sm:$0xff]  ;;  %v234_v3 = vld [vmem:[#allocation13 + $0x28] sm:$0xff]  ;;  %v237_v12 = vld [vmem:[#allocation13 + $0x40] sm:$0xff] }
  0xd2   :  { %4286 = vmatpush1.bf16.msra.mxu1 %v5982_v11  ;;  %4336 = vmatprep.subr.bf16.mxu0 %v6001_v30  ;;  %v6098_v56 = vpack.c.bf16 %v228_v53, %v225_v51  ;;  %v231_v60 = vld [vmem:[#allocation13 + $0x10] sm:$0xff]  ;;  %v240_v17 = vld [vmem:[#allocation13 + $0x58] sm:$0xff]  ;;  %v246_v24 = vld [vmem:[#allocation13 + $0x88] sm:$0xff] }
  0xd3   :  { %4288 = vmatprep.subr.bf16.mxu1 %v5988_v14  ;;  %6810 = vst [vmem:[#allocation39_spill] sm:$0xff] %v6077_v34  ;;  %6811 = vst [vmem:[#allocation40_spill] sm:$0xff] %v6088_v48  ;;  %v6105_v4 = vpack.c.bf16 %v234_v3, %v231_v60  ;;  %v6112_v23 = vpack.c.bf16 %v240_v17, %v237_v12  ;;  %v249_v32 = vld [vmem:[#allocation13 + $0xa0] sm:$0xff]  ;;  %v252_v39 = vld [vmem:[#allocation13 + $0xb8] sm:$0xff] }
  0xd4   :  { %1170 = vperm.xlu0 %5241, %v6046_v8   ;;  %6812 = vst [vmem:[#allocation41_spill] sm:$0xff] %v6098_v56  ;;  %v6126_v44 = vpack.c.bf16 %v252_v39, %v249_v32  ;;  %v255_v51 = vld [vmem:[#allocation13 + $0xd0] sm:$0xff]  ;;  %v258_v53 = vld [vmem:[#allocation13 + $0xe8] sm:$0xff]  ;;  %v261_v3 = vld [vmem:[#allocation13 + $0x100] sm:$0xff] }
  0xd5   :  { %4338 = vmatpush1.bf16.msra.mxu0 %v6007_v40  ;;  %v6132_v60 = vpack.c.bf16 %v258_v53, %v255_v51  ;;  %v264_v12 = vld [vmem:[#allocation13 + $0x118] sm:$0xff]  ;;  %v273_v39 = vld [vmem:[#allocation13 + $0x160] sm:$0xff] }
  0xd6   :  { %4290 = vmatpush1.bf16.msra.mxu1 %v5994_v25  ;;  %4340 = vmatprep.subr.bf16.mxu0 %v6013_v46  ;;  %v6136_v17 = vpack.c.bf16 %v264_v12, %v261_v3  ;;  %v276_v51 = vld [vmem:[#allocation13 + $0x178] sm:$0xff]  ;;  %v816_v3 = vsel %vm652_vm8, 1, %v5704_v1 }
  0xd7   :  { %4291 = vmatprep.subr.bf16.mxu1 %v6776_v42  ;;  %v6144_v53 = vpack.c.bf16 %v276_v51, %v273_v39  ;;  %818 = vperm.xlu1 %5242, %v816_v3   ;;  %v296_v12 = vld [vmem:[#allocation4] sm:$0xff]  ;;  %v297_v1 = vld [vmem:[#allocation4 + $0x8] sm:$0xff] }
  0xd8   :  { %1522 = vperm.xlu0 %5241, %v6057_v20  }
  0xd9   :  { %366 = vmatmul.mubr.f32.vlgmr.msra.gmra.mrb[0].mxu1 %v6774_v0  ;;  %4342 = vmatpush1.bf16.msra.mxu0 %v6026_v57 }
  0xda   :  { %4293 = vmatpush3.bf16.msra.mxu1 %v6004_v37  ;;  %3731 = vmatprep.mubr.msk.f32.mxu1 %vm5706_vm3, %v6774_v0 }
  0xdb   :  { %4294 = vmatprep.subr.bf16.mxu1 %v6776_v42  ;;  %4344 = vmatprep.subr.bf16.mxu0 %v6033_v63 }
  0xdc   :  { %1874 = vperm.xlu0 %5241, %v6068_v28   ;;  %994 = vperm.xlu1 %5242, %v6091_v49  }
  0xdd   :  { %4346 = vmatpush1.bf16.msra.mxu0 %v6043_v7 }
  0xde   :  { %4296 = vmatpush3.bf16.msra.mxu1 %v6023_v55  ;;  %4372 = vmatprep.subr.bf16.mxu0 %v5925_v5 }
  0xdf   :  { %4297 = vmatprep.subr.bf16.mxu1 %v6776_v42 }
  0xe0   :  { %542 = vmatmul.mubr.f32.vlgmr.msra.gmra.mrb[0].mxu0 %v6774_v0  ;;  %2226 = vperm.xlu0 %5241, %v6080_v35  }
  0xe1   :  { %4374 = vmatpush1.bf16.msra.mxu0 %v5927_v9  ;;  %717 = vmatprep.mubr.f32.mxu0 %v6774_v0 }
  0xe2   :  { %4299 = vmatpush3.bf16.msra.mxu1 %v6040_v6  ;;  %4376 = vmatprep.subr.bf16.mxu0 %v5929_v10 }
  0xe3   :  { %4300 = vmatprep.subr.bf16.mxu1 %v6776_v42  ;;  %1346 = vperm.xlu1 %5242, %v6080_v35  }
  0xe4   :  { %2578 = vperm.xlu0 %5241, %v6091_v49  }
  0xe5   :  { %4378 = vmatpush1.bf16.msra.mxu0 %v5933_v15 }
  0xe6   :  { %4302 = vmatpush3.bf16.msra.mxu1 %v6053_v19  ;;  %4380 = vmatprep.subr.bf16.mxu0 %v5936_v16 }
  0xe7   :  { %4303 = vmatprep.subr.bf16.mxu1 %v6776_v42  ;;  %1698 = vperm.xlu1 %5242, %v6068_v28  }
  0xe8   :  { %3104 = vperm.xlu0 %5241, %v6018_v54   ;;  %v243_v54 = vld [vmem:[#allocation13 + $0x70] sm:$0xff] }
  0xe9   :  { %4382 = vmatpush1.bf16.msra.mxu0 %v5939_v21  ;;  %v6120_v31 = vpack.c.bf16 %v246_v24, %v243_v54  ;;  %v267_v54 = vld [vmem:[#allocation13 + $0x130] sm:$0xff]  ;;  %v270_v24 = vld [vmem:[#allocation13 + $0x148] sm:$0xff] }
  0xea   :  { %4305 = vmatpush3.bf16.msra.mxu1 %v6065_v26  ;;  %4384 = vmatprep.subr.bf16.mxu0 %v5942_v22  ;;  %v6140_v32 = vpack.c.bf16 %v270_v24, %v267_v54 }
  0xeb   :  { %4306 = vmatprep.subr.bf16.mxu1 %v6776_v42  ;;  %2050 = vperm.xlu1 %5242, %v6057_v20   ;;  %v471_v20 = vld [vmem:[#allocation7 + $0xa8] sm:$0xff] }
  0xed   :  { %4386 = vmatpush1.bf16.msra.mxu0 %v5945_v29 }
  0xee   :  { %4308 = vmatpush3.bf16.msra.mxu1 %v6077_v34  ;;  %4388 = vmatprep.subr.bf16.mxu0 %v5948_v33 }
  0xef   :  { %4309 = vmatprep.subr.bf16.mxu1 %v6776_v42  ;;  %2402 = vperm.xlu1 %5242, %v6046_v8  }
  0xf1   :  { %4390 = vmatpush1.bf16.msra.mxu0 %v5958_v45 }
  0xf2   :  { %4311 = vmatpush3.bf16.msra.mxu1 %v6088_v48  ;;  %4392 = vmatprep.subr.bf16.mxu0 %v5964_v50 }
  0xf3   :  { %4312 = vmatprep.subr.bf16.mxu1 %v6776_v42  ;;  %2754 = vperm.xlu1 %5242, %v816_v3  }
  0xf5   :  { %4394 = vmatpush1.bf16.msra.mxu0 %v5970_v58 }
  0xf6   :  { %4314 = vmatpush3.bf16.msra.mxu1 %v6098_v56  ;;  %4396 = vmatprep.subr.bf16.mxu0 %v5976_v62 }
  0xf7   :  { %4347 = vmatprep.subr.bf16.mxu1 %v6776_v42  ;;  %2930 = vperm.xlu1 %5242, %v6029_v59  }
  0xf9   :  { %3732 = vmatmul.mubr.f32.vlgmr.msra.gmra.mrb[2].mxu1 %v6774_v0  ;;  %4398 = vmatpush1.bf16.msra.mxu0 %v5982_v11 }
  0xfa   :  { %4349 = vmatpush3.bf16.msra.mxu1 %v6105_v4  ;;  %3766 = vmatprep.mubr.msk.f32.mxu1 %vm5706_vm3, %v6774_v0 }
  0xfb   :  { %4350 = vmatprep.subr.bf16.mxu1 %v6776_v42  ;;  %4400 = vmatprep.subr.bf16.mxu0 %v5988_v14 }
  0xfd   :  { %4402 = vmatpush1.bf16.msra.mxu0 %v5994_v25 }
  0xfe   :  { %4352 = vmatpush3.bf16.msra.mxu1 %v6112_v23  ;;  %4428 = vmatprep.subr.bf16.mxu0 %v5950_v36  ;;  %v6176_v36 = vld [vmem:[#allocation12] ss:$0 sm:$0xff] }
  0xff   :  { %4353 = vmatprep.subr.bf16.mxu1 %v6776_v42  ;;  %6813 = vst [vmem:[#allocation42_spill] sm:$0xff] %v6176_v36 }
 0x102   :  { %4355 = vmatpush3.bf16.msra.mxu1 %v6120_v31 }
 0x103   :  { %4356 = vmatprep.subr.bf16.mxu1 %v6776_v42 }
 0x106   :  { %4358 = vmatpush3.bf16.msra.mxu1 %v6126_v44 }
 0x107   :  { %4359 = vmatprep.subr.bf16.mxu1 %v6776_v42 }
 0x10a   :  { %4361 = vmatpush3.bf16.msra.mxu1 %v6132_v60 }
 0x10b   :  { %4362 = vmatprep.subr.bf16.mxu1 %v6776_v42 }
 0x10e   :  { %4364 = vmatpush3.bf16.msra.mxu1 %v6136_v17 }
 0x10f   :  { %4365 = vmatprep.subr.bf16.mxu1 %v6776_v42 }
 0x112   :  { %4367 = vmatpush3.bf16.msra.mxu1 %v6140_v32 }
 0x113   :  { %4368 = vmatprep.subr.bf16.mxu1 %v6776_v42 }
 0x116   :  { %4370 = vmatpush3.bf16.msra.mxu1 %v6144_v53 }
 0x117   :  { %4403 = vmatprep.subr.bf16.mxu1 %v6776_v42 }
 0x119   :  { %3767 = vmatmul.mubr.f32.vlgmr.msra.gmra.mrb[4].mxu1 %v6774_v0 }
 0x11a   :  { %4405 = vmatpush3.bf16.msra.mxu1 %v6004_v37  ;;  %3801 = vmatprep.mubr.msk.f32.mxu1 %vm5706_vm3, %v6774_v0 }
 0x11b   :  { %4406 = vmatprep.subr.bf16.mxu1 %v6776_v42 }
 0x11e   :  { %4408 = vmatpush3.bf16.msra.mxu1 %v6023_v55 }
 0x11f   :  { %4409 = vmatprep.subr.bf16.mxu1 %v6776_v42 }
 0x122   :  { %4411 = vmatpush3.bf16.msra.mxu1 %v6040_v6 }
 0x123   :  { %4412 = vmatprep.subr.bf16.mxu1 %v6776_v42 }
 0x126   :  { %4414 = vmatpush3.bf16.msra.mxu1 %v6053_v19 }
 0x127   :  { %4415 = vmatprep.subr.bf16.mxu1 %v6776_v42 }
 0x12a   :  { %4417 = vmatpush3.bf16.msra.mxu1 %v6065_v26 }
 0x12b   :  { %4418 = vmatprep.subr.bf16.mxu1 %v6776_v42 }
 0x12e   :  { %4420 = vmatpush3.bf16.msra.mxu1 %v6077_v34 }
 0x12f   :  { %4421 = vmatprep.subr.bf16.mxu1 %v6776_v42 }
 0x132   :  { %4423 = vmatpush3.bf16.msra.mxu1 %v6088_v48 }
 0x133   :  { %4424 = vmatprep.subr.bf16.mxu1 %v6776_v42 }
 0x136   :  { %4426 = vmatpush3.bf16.msra.mxu1 %v6098_v56 }
 0x137   :  { %4459 = vmatprep.subr.bf16.mxu1 %v6776_v42 }
 0x1ac   :  { %v367_v54 = vpop.f32.mrb[0].mxu1 }
 0x1ad   :  { %v442_v24 = vadd.f32 %v367_v54, %v296_v12  ;;  %v369_v41 = vpop.f32.mrb[1].mxu1 }
 0x1ae   :  { %v449_v51 = vadd.f32 %v369_v41, %v297_v1  ;;  %v298_v41 = vld [vmem:[#allocation4 + $0x10] sm:$0xff] }
 0x1af   :  { %v3391_v39 = vmul.f32 -1.442695, %v442_v24 }
 0x1b0   :  { %v3392_v35 = vmul.f32 -1.442695, %v449_v51 }
 0x1b1   :  { %5243 = vpow2.f32 %v3391_v39 }
 0x1b2   :  { %5245 = vpow2.f32 %v3392_v35 }
 0x1b3   :  { %v543_v49 = vpop.f32.mrb[0].mxu0 }
 0x1b4   :  { %v545_v0 = vpop.f32.mrb[1].mxu0  ;;  %v618_v3 = vadd.f32 %v543_v49, %v471_v20 }
 0x1b6   :  { %v3393_v24 = vmul.f32 -1.442695, %v618_v3 }
 0x1bb   :  { %v5244_v42 = vpop.eup %5243 }
 0x1bc   :  { %v446_v28 = vadd.f32 1.0, %v5244_v42  ;;  %v5246_v8 = vpop.eup %5245  ;;  %v472_v42 = vld [vmem:[#allocation7 + $0xb0] sm:$0xff] }
 0x1bd   :  { %v453_v59 = vadd.f32 1.0, %v5246_v8  ;;  %v625_v35 = vadd.f32 %v545_v0, %v472_v42  ;;  %v467_v8 = vpop.permute.xlu0 %466  ;;  %v6814_v0 = vmov 0.0|0.0  }
 0x1be   :  { %5247 = vrcp.f32 %v446_v28  ;;  %vm468_vm9 = vcmp.eq.s32.totalorder %v467_v8, 1 }
 0x1bf   :  { %5249 = vrcp.f32 %v453_v59  ;;  %v3394_v25 = vmul.f32 -1.442695, %v625_v35 }
 0x1c0   :  { %5251 = vpow2.f32 %v3393_v24 }
 0x1c8   :  { %v5248_v39 = vpop.eup %5247 }
 0x1c9   :  { %v5250_v28 = vpop.eup %5249 }
 0x1ca   :  { %v5252_v49 = vpop.eup %5251  ;;  %v460_v20 = vsub.f32 1.0, %v5250_v28 }
 0x1cb   :  { %v622_v48 = vadd.f32 1.0, %v5252_v49 }
 0x1cc   :  { %v438_v56 = vpop.f32.mrb[2].mxu1 }
 0x1cd   :  { %v456_v12 = vadd.f32 %v6176_v36, %v438_v56  ;;  %v3733_v54 = vpop.f32.mrb[3].mxu1 }
 0x1ce   :  { %v462_v54 = vmul.f32 0.0, %v5250_v28 }
 0x1cf   :  { %v457_v1 = vmul.f32 %v5248_v39, %v456_v12  ;;  %v6815_v12 = vmov 0.0  }
 0x1d1   :  { %v458_v51 = vadd.f32 %v457_v1, %v298_v41 }
 0x1d3   :  { %5253 = vtanh.f32 %v458_v51  ;;  %v473_v51 = vld [vmem:[#allocation7 + $0xb8] sm:$0xff] }
 0x1d4   :  { %5255 = vpow2.f32 %v3394_v25  ;;  %v6192_v25 = vld [vmem:[#allocation15] ss:$0 sm:$0xff] }
 0x1d5   :  { %5257 = vrcp.f32 %v622_v48 }
 0x1dd   :  { %v5254_v14 = vpop.eup %5253 }
 0x1de   :  { %v461_v56 = vmul.f32 %v5254_v14, %v460_v20  ;;  %v5256_v14 = vpop.eup %5255 }
 0x1df   :  { %v629_v48 = vadd.f32 1.0, %v5256_v14  ;;  %v5258_v24 = vpop.eup %5257 }
 0x1e0   :  { %v463_v3 = vadd.f32 %v462_v54, %v461_v56  ;;  %v643_v54 = vpop.permute.xlu0 %642 }
 0x1e1   :  { %5259 = vrcp.f32 %v629_v48  ;;  %vm644_vm10 = vcmp.eq.s32.totalorder %v643_v54, 1  ;;  %v6816_v48 = vld [vmem:[#allocation40_spill] sm:$0xff] }
 0x1e2   :  { %3423 = vmatmul.mubr.msk.f32.vlgmr.msra.gmra.mrb[2].mxu0 %vm468_vm9, %v463_v3  ;;  %3802 = vmatmul.mubr.msk.f32.vlgmr.msra.gmra.mrb[6].mxu1 %vm468_vm9, %v463_v3  ;;  %v6179_v59 = vsel %vm468_vm9, %v463_v3, 0.0 }
 0x1e3   :  { %4430 = vmatpush1.bf16.msra.mxu0 %v5952_v38  ;;  %4461 = vmatpush3.bf16.msra.mxu1 %v6105_v4 }
 0x1e4   :  { %4432 = vmatprep.subr.bf16.mxu0 %v5955_v43  ;;  %4462 = vmatprep.subr.bf16.mxu1 %v6814_v0 }
 0x1e5   :  { %893 = vmatprep.mubr.f32.mxu0 %v6815_v12  ;;  %3836 = vmatprep.mubr.msk.f32.mxu1 %vm5706_vm3, %v6815_v12 }
 0x1e7   :  { %4434 = vmatpush1.bf16.msra.mxu0 %v5961_v47  ;;  %4464 = vmatpush3.bf16.msra.mxu1 %v6112_v23 }
 0x1e8   :  { %4436 = vmatprep.subr.bf16.mxu0 %v5967_v52  ;;  %4465 = vmatprep.subr.bf16.mxu1 %v6814_v0 }
 0x1eb   :  { %4438 = vmatpush1.bf16.msra.mxu0 %v5973_v61  ;;  %4467 = vmatpush3.bf16.msra.mxu1 %v6120_v31  ;;  %v5260_v28 = vpop.eup %5259 }
 0x1ec   :  { %v614_v39 = vpop.f32.mrb[4].mxu1  ;;  %4440 = vmatprep.subr.bf16.mxu0 %v5979_v2  ;;  %4468 = vmatprep.subr.bf16.mxu1 %v6814_v0  ;;  %v636_v49 = vsub.f32 1.0, %v5260_v28  ;;  %v638_v56 = vmul.f32 0.0, %v5260_v28 }
 0x1ed   :  { %v632_v41 = vadd.f32 %v6192_v25, %v614_v39  ;;  %v3768_v1 = vpop.f32.mrb[5].mxu1  ;;  %v6818_v39 = vld [vmem:[#allocation38_spill] sm:$0xff] }
 0x1ee   :  { %v6820_v1 = vld [vmem:[#allocation32_spill] sm:$0xff] }
 0x1ef   :  { %v633_v42 = vmul.f32 %v5258_v24, %v632_v41  ;;  %4442 = vmatpush1.bf16.msra.mxu0 %v5985_v13  ;;  %4470 = vmatpush3.bf16.msra.mxu1 %v6126_v44  ;;  %v6817_v24 = vld [vmem:[#allocation37_spill] sm:$0xff] }
 0x1f0   :  { %4444 = vmatprep.subr.bf16.mxu0 %v5991_v18  ;;  %4471 = vmatprep.subr.bf16.mxu1 %v6814_v0  ;;  %v6819_v41 = vld [vmem:[#allocation41_spill] sm:$0xff] }
 0x1f1   :  { %v634_v35 = vadd.f32 %v633_v42, %v473_v51  ;;  %v647_v51 = vld [vmem:[#allocation4 + $0x18] sm:$0xff]  ;;  %v648_v42 = vld [vmem:[#allocation4 + $0x20] sm:$0xff] }
 0x1f3   :  { %5261 = vtanh.f32 %v634_v35  ;;  %4446 = vmatpush1.bf16.msra.mxu0 %v5997_v27  ;;  %4473 = vmatpush3.bf16.msra.mxu1 %v6132_v60 }
 0x1f4   :  { %4448 = vmatprep.subr.bf16.mxu0 %v6001_v30  ;;  %4474 = vmatprep.subr.bf16.mxu1 %v6814_v0 }
 0x1f7   :  { %4450 = vmatpush1.bf16.msra.mxu0 %v6007_v40  ;;  %4476 = vmatpush3.bf16.msra.mxu1 %v6136_v17 }
 0x1f8   :  { %4452 = vmatprep.subr.bf16.mxu0 %v6013_v46  ;;  %4477 = vmatprep.subr.bf16.mxu1 %v6814_v0 }
 0x1fb   :  { %4454 = vmatpush1.bf16.msra.mxu0 %v6026_v57  ;;  %4479 = vmatpush3.bf16.msra.mxu1 %v6140_v32 }
 0x1fc   :  { %4456 = vmatprep.subr.bf16.mxu0 %v6033_v63  ;;  %4480 = vmatprep.subr.bf16.mxu1 %v6814_v0 }
 0x1fd   :  { %v5262_v20 = vpop.eup %5261 }
 0x1fe   :  { %v637_v8 = vmul.f32 %v5262_v20, %v636_v49 }
 0x1ff   :  { %4458 = vmatpush1.bf16.msra.mxu0 %v6043_v7  ;;  %4482 = vmatpush3.bf16.msra.mxu1 %v6144_v53 }
 0x200   :  { %v639_v3 = vadd.f32 %v638_v56, %v637_v8  ;;  %4484 = vmatprep.subr.bf16.mxu0 %v5925_v5  ;;  %4515 = vmatprep.subr.bf16.mxu1 %v6814_v0 }
 0x202   :  { %3425 = vmatmul.mubr.msk.f32.vlgmr.msra.gmra.mrb[4].mxu0 %vm644_vm10, %v639_v3  ;;  %3837 = vmatmul.mubr.msk.f32.vlgmr.msra.gmra.mrb[8].mxu1 %vm644_vm10, %v639_v3  ;;  %v6219_v14 = vsel %vm644_vm10, %v639_v3, 0.0 }
 0x203   :  { %4486 = vmatpush1.bf16.msra.mxu0 %v5927_v9  ;;  %4517 = vmatpush3.bf16.msra.mxu1 %v6004_v37 }
 0x204   :  { %4488 = vmatprep.subr.bf16.mxu0 %v5929_v10  ;;  %4518 = vmatprep.subr.bf16.mxu1 %v6814_v0 }
 0x205   :  { %1069 = vmatprep.mubr.f32.mxu0 %v6815_v12  ;;  %3871 = vmatprep.mubr.msk.f32.mxu1 %vm5706_vm3, %v6815_v12 }
 0x207   :  { %4490 = vmatpush1.bf16.msra.mxu0 %v5933_v15  ;;  %4520 = vmatpush3.bf16.msra.mxu1 %v6023_v55 }
 0x208   :  { %4492 = vmatprep.subr.bf16.mxu0 %v5936_v16  ;;  %4521 = vmatprep.subr.bf16.mxu1 %v6814_v0 }
 0x20b   :  { %4494 = vmatpush1.bf16.msra.mxu0 %v5939_v21  ;;  %4523 = vmatpush3.bf16.msra.mxu1 %v6040_v6 }
 0x20c   :  { %4496 = vmatprep.subr.bf16.mxu0 %v5942_v22  ;;  %4524 = vmatprep.subr.bf16.mxu1 %v6814_v0 }
 0x20f   :  { %4498 = vmatpush1.bf16.msra.mxu0 %v5945_v29  ;;  %4526 = vmatpush3.bf16.msra.mxu1 %v6053_v19 }
 0x210   :  { %4500 = vmatprep.subr.bf16.mxu0 %v5948_v33  ;;  %4527 = vmatprep.subr.bf16.mxu1 %v6814_v0 }
 0x213   :  { %4502 = vmatpush1.bf16.msra.mxu0 %v5958_v45  ;;  %4529 = vmatpush3.bf16.msra.mxu1 %v6065_v26 }
 0x214   :  { %4504 = vmatprep.subr.bf16.mxu0 %v5964_v50  ;;  %4530 = vmatprep.subr.bf16.mxu1 %v6814_v0 }
 0x217   :  { %4506 = vmatpush1.bf16.msra.mxu0 %v5970_v58  ;;  %4532 = vmatpush3.bf16.msra.mxu1 %v6077_v34 }
 0x218   :  { %4508 = vmatprep.subr.bf16.mxu0 %v5976_v62  ;;  %4533 = vmatprep.subr.bf16.mxu1 %v6814_v0  ;;  %v649_v62 = vld [vmem:[#allocation4 + $0x28] sm:$0xff] }
 0x21b   :  { %4510 = vmatpush1.bf16.msra.mxu0 %v5982_v11  ;;  %4535 = vmatpush3.bf16.msra.mxu1 %v6816_v48 }
 0x21c   :  { %4512 = vmatprep.subr.bf16.mxu0 %v6817_v24  ;;  %4536 = vmatprep.subr.bf16.mxu1 %v6814_v0 }
 0x21f   :  { %4514 = vmatpush1.bf16.msra.mxu0 %v6818_v39  ;;  %4538 = vmatpush3.bf16.msra.mxu1 %v6819_v41 }
 0x220   :  { %4540 = vmatprep.subr.bf16.mxu0 %v6820_v1  ;;  %4571 = vmatprep.subr.bf16.mxu1 %v6814_v0 }
 0x2b5   :  { %v719_v35 = vpop.f32.mrb[2].mxu0  ;;  %v790_v28 = vpop.f32.mrb[6].mxu1 }
 0x2b6   :  { %v794_v49 = vadd.f32 %v719_v35, %v647_v51  ;;  %v721_v20 = vpop.f32.mrb[3].mxu0  ;;  %v3803_v8 = vpop.f32.mrb[7].mxu1  ;;  %v808_v1 = vadd.f32 %v6176_v36, %v790_v28  ;;  %v823_v35 = vld [vmem:[#allocation7 + $0x90] sm:$0xff] }
 0x2b7   :  { %v801_v56 = vadd.f32 %v721_v20, %v648_v42  ;;  %v819_v36 = vpop.permute.xlu1 %818 }
 0x2b8   :  { %v3395_v54 = vmul.f32 -1.442695, %v794_v49  ;;  %v824_v49 = vld [vmem:[#allocation7 + $0x98] sm:$0xff]  ;;  %vm820_vm11 = vcmp.eq.s32.totalorder %v819_v36, 1 }
 0x2b9   :  { %v3396_v3 = vmul.f32 -1.442695, %v801_v56 }
 0x2ba   :  { %5263 = vpow2.f32 %v3395_v54 }
 0x2bb   :  { %5265 = vpow2.f32 %v3396_v3 }
 0x2c4   :  { %v5264_v24 = vpop.eup %5263 }
 0x2c5   :  { %v5266_v39 = vpop.eup %5265  ;;  %v798_v48 = vadd.f32 1.0, %v5264_v24 }
 0x2c6   :  { %v805_v41 = vadd.f32 1.0, %v5266_v39 }
 0x2c7   :  { %5267 = vrcp.f32 %v798_v48 }
 0x2c8   :  { %5269 = vrcp.f32 %v805_v41 }
 0x2d1   :  { %v5268_v11 = vpop.eup %5267 }
 0x2d2   :  { %v5270_v34 = vpop.eup %5269  ;;  %v809_v58 = vmul.f32 %v5268_v11, %v808_v1 }
 0x2d3   :  { %v814_v51 = vmul.f32 %v5270_v34, %v6179_v59  ;;  %v812_v28 = vsub.f32 1.0, %v5270_v34  ;;  %v825_v34 = vld [vmem:[#allocation7 + $0xa0] sm:$0xff] }
 0x2d4   :  { %v810_v42 = vadd.f32 %v809_v58, %v649_v62 }
 0x2d5   :  { %v895_v20 = vpop.f32.mrb[4].mxu0  ;;  %v966_v8 = vpop.f32.mrb[8].mxu1 }
 0x2d6   :  { %5271 = vtanh.f32 %v810_v42  ;;  %v970_v56 = vadd.f32 %v895_v20, %v823_v35  ;;  %v897_v54 = vpop.f32.mrb[5].mxu0  ;;  %v3838_v24 = vpop.f32.mrb[9].mxu1  ;;  %v984_v36 = vadd.f32 %v6192_v25, %v966_v8 }
 0x2d7   :  { %v977_v39 = vadd.f32 %v897_v54, %v824_v49  ;;  %v995_v24 = vpop.permute.xlu1 %994 }
 0x2d8   :  { %v3397_v48 = vmul.f32 -1.442695, %v970_v56  ;;  %vm996_vm12 = vcmp.eq.s32.totalorder %v995_v24, 1 }
 0x2d9   :  { %v3398_v41 = vmul.f32 -1.442695, %v977_v39 }
 0x2da   :  { %5273 = vpow2.f32 %v3397_v48 }
 0x2db   :  { %5275 = vpow2.f32 %v3398_v41  ;;  %v6822_v41 = vld [vmem:[#allocation34_spill] sm:$0xff] }
 0x2e0   :  { %v5272_v3 = vpop.eup %5271 }
 0x2e1   :  { %v813_v11 = vmul.f32 %v5272_v3, %v812_v28  ;;  %v6823_v28 = vld [vmem:[#allocation39_spill] sm:$0xff] }
 0x2e2   :  { %v6824_v3 = vld [vmem:[#allocation35_spill] sm:$0xff] }
 0x2e3   :  { %v815_v1 = vadd.f32 %v814_v51, %v813_v11  ;;  %v6825_v11 = vld [vmem:[#allocation36_spill] sm:$0xff] }
 0x2e4   :  { %v5274_v50 = vpop.eup %5273 }
 0x2e5   :  { %v5276_v58 = vpop.eup %5275  ;;  %v6259_v62 = vsel %vm820_vm11, %v815_v1, %v6179_v59  ;;  %v974_v42 = vadd.f32 1.0, %v5274_v50  ;;  %v6826_v1 = vld [vmem:[#allocation40_spill] sm:$0xff] }
 0x2e6   :  { %v981_v35 = vadd.f32 1.0, %v5276_v58  ;;  %1070 = vmatmul.mubr.f32.vlgmr.msra.gmra.mrb[6].mxu0 %v6259_v62  ;;  %3872 = vmatmul.mubr.f32.vlgmr.msra.gmra.mrb[10].mxu1 %v6259_v62  ;;  %v6827_v58 = vld [vmem:[#allocation37_spill] sm:$0xff] }
 0x2e7   :  { %5277 = vrcp.f32 %v974_v42  ;;  %4542 = vmatpush1.bf16.msra.mxu0 %v5952_v38  ;;  %4573 = vmatpush3.bf16.msra.mxu1 %v6105_v4  ;;  %v6828_v42 = vld [vmem:[#allocation38_spill] sm:$0xff] }
 0x2e8   :  { %5279 = vrcp.f32 %v981_v35  ;;  %4544 = vmatprep.subr.bf16.mxu0 %v5955_v43  ;;  %4574 = vmatprep.subr.bf16.mxu1 %v6814_v0  ;;  %v6829_v35 = vld [vmem:[#allocation41_spill] sm:$0xff] }
 0x2e9   :  { %1245 = vmatprep.mubr.f32.mxu0 %v6815_v12  ;;  %3906 = vmatprep.mubr.msk.f32.mxu1 %vm5706_vm3, %v6815_v12 }
 0x2eb   :  { %4546 = vmatpush1.bf16.msra.mxu0 %v5961_v47  ;;  %4576 = vmatpush3.bf16.msra.mxu1 %v6112_v23 }
 0x2ec   :  { %4548 = vmatprep.subr.bf16.mxu0 %v5967_v52  ;;  %4577 = vmatprep.subr.bf16.mxu1 %v6814_v0 }
 0x2ef   :  { %4550 = vmatpush1.bf16.msra.mxu0 %v5973_v61  ;;  %4579 = vmatpush3.bf16.msra.mxu1 %v6120_v31 }
 0x2f0   :  { %4552 = vmatprep.subr.bf16.mxu0 %v5979_v2  ;;  %4580 = vmatprep.subr.bf16.mxu1 %v6814_v0 }
 0x2f1   :  { %v5278_v50 = vpop.eup %5277 }
 0x2f2   :  { %v5280_v59 = vpop.eup %5279  ;;  %v985_v51 = vmul.f32 %v5278_v50, %v984_v36  ;;  %v6830_v36 = vld [vmem:[#allocation32_spill] sm:$0xff]  ;;  %v999_v50 = vld [vmem:[#allocation4 + $0x30] sm:$0xff] }
 0x2f3   :  { %4554 = vmatpush1.bf16.msra.mxu0 %v5985_v13  ;;  %4582 = vmatpush3.bf16.msra.mxu1 %v6126_v44  ;;  %v990_v49 = vmul.f32 %v5280_v59, %v6219_v14  ;;  %v988_v8 = vsub.f32 1.0, %v5280_v59 }
 0x2f4   :  { %v986_v20 = vadd.f32 %v985_v51, %v825_v34  ;;  %4556 = vmatprep.subr.bf16.mxu0 %v5991_v18  ;;  %4583 = vmatprep.subr.bf16.mxu1 %v6814_v0 }
 0x2f6   :  { %5281 = vtanh.f32 %v986_v20 }
 0x2f7   :  { %4558 = vmatpush1.bf16.msra.mxu0 %v5997_v27  ;;  %4585 = vmatpush3.bf16.msra.mxu1 %v6132_v60 }
 0x2f8   :  { %4560 = vmatprep.subr.bf16.mxu0 %v6001_v30  ;;  %4586 = vmatprep.subr.bf16.mxu1 %v6814_v0 }
 0x2fb   :  { %4562 = vmatpush1.bf16.msra.mxu0 %v6007_v40  ;;  %4588 = vmatpush3.bf16.msra.mxu1 %v6136_v17 }
 0x2fc   :  { %4564 = vmatprep.subr.bf16.mxu0 %v6013_v46  ;;  %4589 = vmatprep.subr.bf16.mxu1 %v6814_v0 }
 0x2ff   :  { %4566 = vmatpush1.bf16.msra.mxu0 %v6026_v57  ;;  %4591 = vmatpush3.bf16.msra.mxu1 %v6140_v32 }
 0x300   :  { %v5282_v56 = vpop.eup %5281  ;;  %4568 = vmatprep.subr.bf16.mxu0 %v6033_v63  ;;  %4592 = vmatprep.subr.bf16.mxu1 %v6814_v0 }
 0x301   :  { %v989_v54 = vmul.f32 %v5282_v56, %v988_v8 }
 0x303   :  { %4570 = vmatpush1.bf16.msra.mxu0 %v6043_v7  ;;  %4594 = vmatpush3.bf16.msra.mxu1 %v6144_v53  ;;  %v991_v39 = vadd.f32 %v990_v49, %v989_v54  ;;  %v1000_v49 = vld [vmem:[#allocation4 + $0x38] sm:$0xff] }
 0x304   :  { %4596 = vmatprep.subr.bf16.mxu0 %v5925_v5  ;;  %4627 = vmatprep.subr.bf16.mxu1 %v6814_v0 }
 0x305   :  { %v6301_v48 = vsel %vm996_vm12, %v991_v39, %v6219_v14  ;;  %v6821_v14 = vld [vmem:[#allocation33_spill] sm:$0xff] }
 0x306   :  { %1246 = vmatmul.mubr.f32.vlgmr.msra.gmra.mrb[8].mxu0 %v6301_v48  ;;  %3907 = vmatmul.mubr.f32.vlgmr.msra.gmra.mrb[12].mxu1 %v6301_v48 }
 0x307   :  { %4598 = vmatpush1.bf16.msra.mxu0 %v5927_v9  ;;  %4629 = vmatpush3.bf16.msra.mxu1 %v6004_v37 }
 0x308   :  { %4600 = vmatprep.subr.bf16.mxu0 %v5929_v10  ;;  %4630 = vmatprep.subr.bf16.mxu1 %v6814_v0 }
 0x309   :  { %1421 = vmatprep.mubr.f32.mxu0 %v6815_v12  ;;  %3941 = vmatprep.mubr.msk.f32.mxu1 %vm5706_vm3, %v6815_v12 }
 0x30b   :  { %4602 = vmatpush1.bf16.msra.mxu0 %v5933_v15  ;;  %4632 = vmatpush3.bf16.msra.mxu1 %v6023_v55 }
 0x30c   :  { %4604 = vmatprep.subr.bf16.mxu0 %v5936_v16  ;;  %4633 = vmatprep.subr.bf16.mxu1 %v6814_v0 }
 0x30f   :  { %4606 = vmatpush1.bf16.msra.mxu0 %v5939_v21  ;;  %4635 = vmatpush3.bf16.msra.mxu1 %v6040_v6 }
 0x310   :  { %4608 = vmatprep.subr.bf16.mxu0 %v5942_v22  ;;  %4636 = vmatprep.subr.bf16.mxu1 %v6814_v0 }
 0x313   :  { %4610 = vmatpush1.bf16.msra.mxu0 %v5945_v29  ;;  %4638 = vmatpush3.bf16.msra.mxu1 %v6053_v19 }
 0x314   :  { %4612 = vmatprep.subr.bf16.mxu0 %v5948_v33  ;;  %4639 = vmatprep.subr.bf16.mxu1 %v6814_v0 }
 0x317   :  { %4614 = vmatpush1.bf16.msra.mxu0 %v5958_v45  ;;  %4641 = vmatpush3.bf16.msra.mxu1 %v6065_v26 }
 0x318   :  { %4616 = vmatprep.subr.bf16.mxu0 %v6821_v14  ;;  %4642 = vmatprep.subr.bf16.mxu1 %v6814_v0 }
 0x31b   :  { %4618 = vmatpush1.bf16.msra.mxu0 %v6822_v41  ;;  %4644 = vmatpush3.bf16.msra.mxu1 %v6823_v28 }
 0x31c   :  { %4620 = vmatprep.subr.bf16.mxu0 %v6824_v3  ;;  %4645 = vmatprep.subr.bf16.mxu1 %v6814_v0  ;;  %v1001_v3 = vld [vmem:[#allocation4 + $0x40] sm:$0xff] }
 0x31f   :  { %4622 = vmatpush1.bf16.msra.mxu0 %v6825_v11  ;;  %4647 = vmatpush3.bf16.msra.mxu1 %v6826_v1 }
 0x320   :  { %4624 = vmatprep.subr.bf16.mxu0 %v6827_v58  ;;  %4648 = vmatprep.subr.bf16.mxu1 %v6814_v0 }
 0x323   :  { %4626 = vmatpush1.bf16.msra.mxu0 %v6828_v42  ;;  %4650 = vmatpush3.bf16.msra.mxu1 %v6829_v35 }
 0x324   :  { %4652 = vmatprep.subr.bf16.mxu0 %v6830_v36  ;;  %4683 = vmatprep.subr.bf16.mxu1 %v6814_v0  ;;  %v6831_v36 = vld [vmem:[#allocation42_spill] sm:$0xff] }
 0x3b9   :  { %v1071_v34 = vpop.f32.mrb[6].mxu0  ;;  %v1142_v59 = vpop.f32.mrb[10].mxu1 }
 0x3ba   :  { %v1146_v51 = vadd.f32 %v1071_v34, %v999_v50  ;;  %v1073_v20 = vpop.f32.mrb[7].mxu0  ;;  %v3873_v8 = vpop.f32.mrb[11].mxu1  ;;  %v1160_v1 = vadd.f32 %v6831_v36, %v1142_v59  ;;  %v1175_v50 = vld [vmem:[#allocation7 + $0x78] sm:$0xff] }
 0x3bb   :  { %v1153_v54 = vadd.f32 %v1073_v20, %v1000_v49  ;;  %v1176_v49 = vld [vmem:[#allocation7 + $0x80] sm:$0xff] }
 0x3bc   :  { %v3399_v56 = vmul.f32 -1.442695, %v1146_v51 }
 0x3bd   :  { %v3400_v24 = vmul.f32 -1.442695, %v1153_v54 }
 0x3be   :  { %5283 = vpow2.f32 %v3399_v56 }
 0x3bf   :  { %5285 = vpow2.f32 %v3400_v24 }
 0x3c8   :  { %v5284_v39 = vpop.eup %5283 }
 0x3c9   :  { %v1150_v42 = vadd.f32 1.0, %v5284_v39  ;;  %v5286_v35 = vpop.eup %5285 }
 0x3ca   :  { %v1157_v58 = vadd.f32 1.0, %v5286_v35 }
 0x3cb   :  { %5287 = vrcp.f32 %v1150_v42 }
 0x3cc   :  { %5289 = vrcp.f32 %v1157_v58 }
 0x3d5   :  { %v5288_v11 = vpop.eup %5287 }
 0x3d6   :  { %v1161_v28 = vmul.f32 %v5288_v11, %v1160_v1  ;;  %v5290_v42 = vpop.eup %5289  ;;  %v1171_v1 = vpop.permute.xlu0 %1170 }
 0x3d7   :  { %v1164_v39 = vsub.f32 1.0, %v5290_v42  ;;  %v1166_v11 = vmul.f32 %v5290_v42, %v6259_v62  ;;  %vm1172_vm13 = vcmp.eq.s32.totalorder %v1171_v1, 1  ;;  %v6834_v1 = vld [vmem:[#allocation35_spill] sm:$0xff] }
 0x3d8   :  { %v1162_v34 = vadd.f32 %v1161_v28, %v1001_v3 }
 0x3d9   :  { %v1247_v41 = vpop.f32.mrb[8].mxu0  ;;  %v1318_v8 = vpop.f32.mrb[12].mxu1 }
 0x3da   :  { %5291 = vtanh.f32 %v1162_v34  ;;  %v1322_v51 = vadd.f32 %v1247_v41, %v1175_v50  ;;  %v1249_v20 = vpop.f32.mrb[9].mxu0  ;;  %v3908_v56 = vpop.f32.mrb[13].mxu1  ;;  %v1336_v50 = vadd.f32 %v6192_v25, %v1318_v8 }
 0x3db   :  { %v1329_v24 = vadd.f32 %v1249_v20, %v1176_v49 }
 0x3dc   :  { %v3401_v54 = vmul.f32 -1.442695, %v1322_v51  ;;  %v1177_v51 = vld [vmem:[#allocation7 + $0x88] sm:$0xff] }
 0x3dd   :  { %v3402_v35 = vmul.f32 -1.442695, %v1329_v24 }
 0x3de   :  { %5293 = vpow2.f32 %v3401_v54 }
 0x3df   :  { %5295 = vpow2.f32 %v3402_v35  ;;  %v1347_v35 = vpop.permute.xlu1 %1346 }
 0x3e0   :  { %vm1348_vm14 = vcmp.eq.s32.totalorder %v1347_v35, 1 }
 0x3e4   :  { %v5292_v59 = vpop.eup %5291 }
 0x3e5   :  { %v1165_v36 = vmul.f32 %v5292_v59, %v1164_v39 }
 0x3e7   :  { %v1167_v28 = vadd.f32 %v1166_v11, %v1165_v36  ;;  %v6833_v11 = vld [vmem:[#allocation39_spill] sm:$0xff] }
 0x3e8   :  { %v5294_v3 = vpop.eup %5293 }
 0x3e9   :  { %v1326_v58 = vadd.f32 1.0, %v5294_v3  ;;  %v6343_v41 = vsel %vm1172_vm13, %v1167_v28, %v6259_v62  ;;  %v5296_v62 = vpop.eup %5295  ;;  %v6835_v28 = vld [vmem:[#allocation36_spill] sm:$0xff] }
 0x3ea   :  { %1422 = vmatmul.mubr.f32.vlgmr.msra.gmra.mrb[10].mxu0 %v6343_v41  ;;  %3942 = vmatmul.mubr.f32.vlgmr.msra.gmra.mrb[14].mxu1 %v6343_v41  ;;  %v1333_v36 = vadd.f32 1.0, %v5296_v62  ;;  %v6836_v3 = vld [vmem:[#allocation40_spill] sm:$0xff]  ;;  %v6838_v62 = vld [vmem:[#allocation38_spill] sm:$0xff] }
 0x3eb   :  { %5297 = vrcp.f32 %v1326_v58  ;;  %4654 = vmatpush1.bf16.msra.mxu0 %v5952_v38  ;;  %4685 = vmatpush3.bf16.msra.mxu1 %v6105_v4  ;;  %v6837_v58 = vld [vmem:[#allocation37_spill] sm:$0xff] }
 0x3ec   :  { %4656 = vmatprep.subr.bf16.mxu0 %v5955_v43  ;;  %4686 = vmatprep.subr.bf16.mxu1 %v6814_v0  ;;  %5299 = vrcp.f32 %v1333_v36  ;;  %v6839_v36 = vld [vmem:[#allocation41_spill] sm:$0xff] }
 0x3ed   :  { %1597 = vmatprep.mubr.f32.mxu0 %v6815_v12  ;;  %3976 = vmatprep.mubr.msk.f32.mxu1 %vm5706_vm3, %v6815_v12 }
 0x3ef   :  { %4658 = vmatpush1.bf16.msra.mxu0 %v5961_v47  ;;  %4688 = vmatpush3.bf16.msra.mxu1 %v6112_v23 }
 0x3f0   :  { %4660 = vmatprep.subr.bf16.mxu0 %v5967_v52  ;;  %4689 = vmatprep.subr.bf16.mxu1 %v6814_v0 }
 0x3f3   :  { %4662 = vmatpush1.bf16.msra.mxu0 %v5973_v61  ;;  %4691 = vmatpush3.bf16.msra.mxu1 %v6120_v31 }
 0x3f4   :  { %4664 = vmatprep.subr.bf16.mxu0 %v5979_v2  ;;  %4692 = vmatprep.subr.bf16.mxu1 %v6814_v0 }
 0x3f5   :  { %v5298_v34 = vpop.eup %5297 }
 0x3f6   :  { %v1337_v49 = vmul.f32 %v5298_v34, %v1336_v50  ;;  %v5300_v8 = vpop.eup %5299  ;;  %v6840_v50 = vld [vmem:[#allocation32_spill] sm:$0xff]  ;;  %v1351_v34 = vld [vmem:[#allocation4 + $0x48] sm:$0xff] }
 0x3f7   :  { %4666 = vmatpush1.bf16.msra.mxu0 %v5985_v13  ;;  %4694 = vmatpush3.bf16.msra.mxu1 %v6126_v44  ;;  %v1340_v56 = vsub.f32 1.0, %v5300_v8  ;;  %v1342_v42 = vmul.f32 %v5300_v8, %v6301_v48  ;;  %v1352_v8 = vld [vmem:[#allocation4 + $0x50] sm:$0xff] }
 0x3f8   :  { %v1338_v20 = vadd.f32 %v1337_v49, %v1177_v51  ;;  %4668 = vmatprep.subr.bf16.mxu0 %v5991_v18  ;;  %4695 = vmatprep.subr.bf16.mxu1 %v6814_v0 }
 0x3fa   :  { %5301 = vtanh.f32 %v1338_v20 }
 0x3fb   :  { %4670 = vmatpush1.bf16.msra.mxu0 %v5997_v27  ;;  %4697 = vmatpush3.bf16.msra.mxu1 %v6132_v60 }
 0x3fc   :  { %4672 = vmatprep.subr.bf16.mxu0 %v6001_v30  ;;  %4698 = vmatprep.subr.bf16.mxu1 %v6814_v0 }
 0x3ff   :  { %4674 = vmatpush1.bf16.msra.mxu0 %v6007_v40  ;;  %4700 = vmatpush3.bf16.msra.mxu1 %v6136_v17 }
 0x400   :  { %4676 = vmatprep.subr.bf16.mxu0 %v6013_v46  ;;  %4701 = vmatprep.subr.bf16.mxu1 %v6814_v0 }
 0x403   :  { %4678 = vmatpush1.bf16.msra.mxu0 %v6026_v57  ;;  %4703 = vmatpush3.bf16.msra.mxu1 %v6140_v32 }
 0x404   :  { %v5302_v54 = vpop.eup %5301  ;;  %4680 = vmatprep.subr.bf16.mxu0 %v6033_v63  ;;  %4704 = vmatprep.subr.bf16.mxu1 %v6814_v0 }
 0x405   :  { %v1341_v24 = vmul.f32 %v5302_v54, %v1340_v56 }
 0x407   :  { %4682 = vmatpush1.bf16.msra.mxu0 %v6043_v7  ;;  %4706 = vmatpush3.bf16.msra.mxu1 %v6144_v53  ;;  %v1343_v39 = vadd.f32 %v1342_v42, %v1341_v24 }
 0x408   :  { %4708 = vmatprep.subr.bf16.mxu0 %v5925_v5  ;;  %4739 = vmatprep.subr.bf16.mxu1 %v6814_v0 }
 0x409   :  { %v6385_v59 = vsel %vm1348_vm14, %v1343_v39, %v6301_v48  ;;  %v6832_v48 = vld [vmem:[#allocation34_spill] sm:$0xff] }
 0x40a   :  { %1598 = vmatmul.mubr.f32.vlgmr.msra.gmra.mrb[12].mxu0 %v6385_v59  ;;  %3977 = vmatmul.mubr.f32.vlgmr.msra.gmra.mrb[16].mxu1 %v6385_v59 }
 0x40b   :  { %4710 = vmatpush1.bf16.msra.mxu0 %v5927_v9  ;;  %4741 = vmatpush3.bf16.msra.mxu1 %v6004_v37 }
 0x40c   :  { %4712 = vmatprep.subr.bf16.mxu0 %v5929_v10  ;;  %4742 = vmatprep.subr.bf16.mxu1 %v6814_v0 }
 0x40d   :  { %1773 = vmatprep.mubr.f32.mxu0 %v6815_v12  ;;  %4011 = vmatprep.mubr.msk.f32.mxu1 %vm5706_vm3, %v6815_v12 }
 0x40f   :  { %4714 = vmatpush1.bf16.msra.mxu0 %v5933_v15  ;;  %4744 = vmatpush3.bf16.msra.mxu1 %v6023_v55 }
 0x410   :  { %4716 = vmatprep.subr.bf16.mxu0 %v5936_v16  ;;  %4745 = vmatprep.subr.bf16.mxu1 %v6814_v0 }
 0x413   :  { %4718 = vmatpush1.bf16.msra.mxu0 %v5939_v21  ;;  %4747 = vmatpush3.bf16.msra.mxu1 %v6040_v6 }
 0x414   :  { %4720 = vmatprep.subr.bf16.mxu0 %v5942_v22  ;;  %4748 = vmatprep.subr.bf16.mxu1 %v6814_v0 }
 0x417   :  { %4722 = vmatpush1.bf16.msra.mxu0 %v5945_v29  ;;  %4750 = vmatpush3.bf16.msra.mxu1 %v6053_v19 }
 0x418   :  { %4724 = vmatprep.subr.bf16.mxu0 %v5948_v33  ;;  %4751 = vmatprep.subr.bf16.mxu1 %v6814_v0 }
 0x41b   :  { %4726 = vmatpush1.bf16.msra.mxu0 %v5958_v45  ;;  %4753 = vmatpush3.bf16.msra.mxu1 %v6065_v26 }
 0x41c   :  { %4728 = vmatprep.subr.bf16.mxu0 %v6821_v14  ;;  %4754 = vmatprep.subr.bf16.mxu1 %v6814_v0 }
 0x41f   :  { %4730 = vmatpush1.bf16.msra.mxu0 %v6832_v48  ;;  %4756 = vmatpush3.bf16.msra.mxu1 %v6833_v11 }
 0x420   :  { %4732 = vmatprep.subr.bf16.mxu0 %v6834_v1  ;;  %4757 = vmatprep.subr.bf16.mxu1 %v6814_v0  ;;  %v1353_v1 = vld [vmem:[#allocation4 + $0x58] sm:$0xff] }
 0x423   :  { %4734 = vmatpush1.bf16.msra.mxu0 %v6835_v28  ;;  %4759 = vmatpush3.bf16.msra.mxu1 %v6836_v3 }
 0x424   :  { %4736 = vmatprep.subr.bf16.mxu0 %v6837_v58  ;;  %4760 = vmatprep.subr.bf16.mxu1 %v6814_v0 }
 0x427   :  { %4738 = vmatpush1.bf16.msra.mxu0 %v6838_v62  ;;  %4762 = vmatpush3.bf16.msra.mxu1 %v6839_v36 }
 0x428   :  { %4764 = vmatprep.subr.bf16.mxu0 %v6840_v50  ;;  %4795 = vmatprep.subr.bf16.mxu1 %v6814_v0  ;;  %v6841_v50 = vld [vmem:[#allocation42_spill] sm:$0xff] }
 0x4bd   :  { %v1423_v51 = vpop.f32.mrb[10].mxu0  ;;  %v1494_v49 = vpop.f32.mrb[14].mxu1 }
 0x4be   :  { %v1498_v20 = vadd.f32 %v1423_v51, %v1351_v34  ;;  %v1425_v56 = vpop.f32.mrb[11].mxu0  ;;  %v3943_v54 = vpop.f32.mrb[15].mxu1  ;;  %v1512_v3 = vadd.f32 %v6841_v50, %v1494_v49  ;;  %v1527_v34 = vld [vmem:[#allocation7 + $0x60] sm:$0xff] }
 0x4bf   :  { %v1505_v42 = vadd.f32 %v1425_v56, %v1352_v8  ;;  %v1528_v8 = vld [vmem:[#allocation7 + $0x68] sm:$0xff] }
 0x4c0   :  { %v3403_v24 = vmul.f32 -1.442695, %v1498_v20 }
 0x4c1   :  { %v3404_v35 = vmul.f32 -1.442695, %v1505_v42 }
 0x4c2   :  { %5303 = vpow2.f32 %v3403_v24 }
 0x4c3   :  { %5305 = vpow2.f32 %v3404_v35 }
 0x4cc   :  { %v5304_v39 = vpop.eup %5303 }
 0x4cd   :  { %v1502_v62 = vadd.f32 1.0, %v5304_v39  ;;  %v5306_v36 = vpop.eup %5305 }
 0x4ce   :  { %v1509_v58 = vadd.f32 1.0, %v5306_v36 }
 0x4cf   :  { %5307 = vrcp.f32 %v1502_v62 }
 0x4d0   :  { %5309 = vrcp.f32 %v1509_v58 }
 0x4d9   :  { %v5308_v28 = vpop.eup %5307 }
 0x4da   :  { %v1513_v11 = vmul.f32 %v5308_v28, %v1512_v3  ;;  %v5310_v62 = vpop.eup %5309  ;;  %v1523_v3 = vpop.permute.xlu0 %1522 }
 0x4db   :  { %v1516_v39 = vsub.f32 1.0, %v5310_v62  ;;  %v1518_v28 = vmul.f32 %v5310_v62, %v6343_v41  ;;  %vm1524_vm15 = vcmp.eq.s32.totalorder %v1523_v3, 1  ;;  %v6845_v3 = vld [vmem:[#allocation36_spill] sm:$0xff] }
 0x4dc   :  { %v1514_v51 = vadd.f32 %v1513_v11, %v1353_v1 }
 0x4dd   :  { %v1599_v48 = vpop.f32.mrb[12].mxu0  ;;  %v1670_v54 = vpop.f32.mrb[16].mxu1 }
 0x4de   :  { %5311 = vtanh.f32 %v1514_v51  ;;  %v1674_v20 = vadd.f32 %v1599_v48, %v1527_v34  ;;  %v1601_v56 = vpop.f32.mrb[13].mxu0  ;;  %v3978_v24 = vpop.f32.mrb[17].mxu1  ;;  %v1688_v51 = vadd.f32 %v6192_v25, %v1670_v54 }
 0x4df   :  { %v1681_v35 = vadd.f32 %v1601_v56, %v1528_v8  ;;  %v1529_v8 = vld [vmem:[#allocation7 + $0x70] sm:$0xff] }
 0x4e0   :  { %v3405_v42 = vmul.f32 -1.442695, %v1674_v20 }
 0x4e1   :  { %v3406_v36 = vmul.f32 -1.442695, %v1681_v35 }
 0x4e2   :  { %5313 = vpow2.f32 %v3405_v42 }
 0x4e3   :  { %5315 = vpow2.f32 %v3406_v36  ;;  %v1699_v36 = vpop.permute.xlu1 %1698 }
 0x4e4   :  { %vm1700_vm0 = vcmp.eq.s32.totalorder %v1699_v36, 1 }
 0x4e8   :  { %v5312_v50 = vpop.eup %5311 }
 0x4e9   :  { %v1517_v49 = vmul.f32 %v5312_v50, %v1516_v39 }
 0x4eb   :  { %v1519_v11 = vadd.f32 %v1518_v28, %v1517_v49  ;;  %v6843_v49 = vld [vmem:[#allocation39_spill] sm:$0xff] }
 0x4ec   :  { %v5314_v1 = vpop.eup %5313  ;;  %v6844_v28 = vld [vmem:[#allocation35_spill] sm:$0xff] }
 0x4ed   :  { %v1678_v58 = vadd.f32 1.0, %v5314_v1  ;;  %v6427_v48 = vsel %vm1524_vm15, %v1519_v11, %v6343_v41  ;;  %v5316_v41 = vpop.eup %5315  ;;  %v6846_v11 = vld [vmem:[#allocation40_spill] sm:$0xff]  ;;  %v6847_v1 = vld [vmem:[#allocation37_spill] sm:$0xff] }
 0x4ee   :  { %1774 = vmatmul.mubr.f32.vlgmr.msra.gmra.mrb[14].mxu0 %v6427_v48  ;;  %4012 = vmatmul.mubr.f32.vlgmr.msra.gmra.mrb[18].mxu1 %v6427_v48  ;;  %v1685_v34 = vadd.f32 1.0, %v5316_v41  ;;  %v6849_v41 = vld [vmem:[#allocation41_spill] sm:$0xff] }
 0x4ef   :  { %5317 = vrcp.f32 %v1678_v58  ;;  %4766 = vmatpush1.bf16.msra.mxu0 %v5952_v38  ;;  %4797 = vmatpush3.bf16.msra.mxu1 %v6105_v4  ;;  %v6848_v58 = vld [vmem:[#allocation38_spill] sm:$0xff] }
 0x4f0   :  { %4768 = vmatprep.subr.bf16.mxu0 %v5955_v43  ;;  %4798 = vmatprep.subr.bf16.mxu1 %v6814_v0  ;;  %5319 = vrcp.f32 %v1685_v34  ;;  %v6850_v34 = vld [vmem:[#allocation32_spill] sm:$0xff] }
 0x4f1   :  { %1949 = vmatprep.mubr.f32.mxu0 %v6815_v12  ;;  %4046 = vmatprep.mubr.msk.f32.mxu1 %vm5706_vm3, %v6815_v12 }
 0x4f3   :  { %4770 = vmatpush1.bf16.msra.mxu0 %v5961_v47  ;;  %4800 = vmatpush3.bf16.msra.mxu1 %v6112_v23 }
 0x4f4   :  { %4772 = vmatprep.subr.bf16.mxu0 %v5967_v52  ;;  %4801 = vmatprep.subr.bf16.mxu1 %v6814_v0 }
 0x4f7   :  { %4774 = vmatpush1.bf16.msra.mxu0 %v5973_v61  ;;  %4803 = vmatpush3.bf16.msra.mxu1 %v6120_v31 }
 0x4f8   :  { %4776 = vmatprep.subr.bf16.mxu0 %v5979_v2  ;;  %4804 = vmatprep.subr.bf16.mxu1 %v6814_v0 }
 0x4f9   :  { %v5318_v20 = vpop.eup %5317 }
 0x4fa   :  { %v1689_v56 = vmul.f32 %v5318_v20, %v1688_v51  ;;  %v5320_v25 = vpop.eup %5319  ;;  %v1703_v51 = vld [vmem:[#allocation4 + $0x60] sm:$0xff] }
 0x4fb   :  { %4778 = vmatpush1.bf16.msra.mxu0 %v5985_v13  ;;  %4806 = vmatpush3.bf16.msra.mxu1 %v6126_v44  ;;  %v1692_v54 = vsub.f32 1.0, %v5320_v25  ;;  %v1694_v62 = vmul.f32 %v5320_v25, %v6385_v59 }
 0x4fc   :  { %v1690_v24 = vadd.f32 %v1689_v56, %v1529_v8  ;;  %4780 = vmatprep.subr.bf16.mxu0 %v5991_v18  ;;  %4807 = vmatprep.subr.bf16.mxu1 %v6814_v0 }
 0x4fe   :  { %5321 = vtanh.f32 %v1690_v24  ;;  %v1704_v24 = vld [vmem:[#allocation4 + $0x68] sm:$0xff] }
 0x4ff   :  { %4782 = vmatpush1.bf16.msra.mxu0 %v5997_v27  ;;  %4809 = vmatpush3.bf16.msra.mxu1 %v6132_v60 }
 0x500   :  { %4784 = vmatprep.subr.bf16.mxu0 %v6001_v30  ;;  %4810 = vmatprep.subr.bf16.mxu1 %v6814_v0 }
 0x503   :  { %4786 = vmatpush1.bf16.msra.mxu0 %v6007_v40  ;;  %4812 = vmatpush3.bf16.msra.mxu1 %v6136_v17 }
 0x504   :  { %4788 = vmatprep.subr.bf16.mxu0 %v6013_v46  ;;  %4813 = vmatprep.subr.bf16.mxu1 %v6814_v0 }
 0x507   :  { %4790 = vmatpush1.bf16.msra.mxu0 %v6026_v57  ;;  %4815 = vmatpush3.bf16.msra.mxu1 %v6140_v32 }
 0x508   :  { %v5322_v42 = vpop.eup %5321  ;;  %4792 = vmatprep.subr.bf16.mxu0 %v6033_v63  ;;  %4816 = vmatprep.subr.bf16.mxu1 %v6814_v0 }
 0x509   :  { %v1693_v35 = vmul.f32 %v5322_v42, %v1692_v54 }
 0x50b   :  { %4794 = vmatpush1.bf16.msra.mxu0 %v6043_v7  ;;  %4818 = vmatpush3.bf16.msra.mxu1 %v6144_v53  ;;  %v1695_v39 = vadd.f32 %v1694_v62, %v1693_v35 }
 0x50c   :  { %4820 = vmatprep.subr.bf16.mxu0 %v5925_v5  ;;  %4851 = vmatprep.subr.bf16.mxu1 %v6814_v0 }
 0x50d   :  { %v6469_v50 = vsel %vm1700_vm0, %v1695_v39, %v6385_v59  ;;  %v6842_v59 = vld [vmem:[#allocation34_spill] sm:$0xff] }
 0x50e   :  { %1950 = vmatmul.mubr.f32.vlgmr.msra.gmra.mrb[16].mxu0 %v6469_v50  ;;  %4047 = vmatmul.mubr.f32.vlgmr.msra.gmra.mrb[20].mxu1 %v6469_v50 }
 0x50f   :  { %4822 = vmatpush1.bf16.msra.mxu0 %v5927_v9  ;;  %4853 = vmatpush3.bf16.msra.mxu1 %v6004_v37 }
 0x510   :  { %4824 = vmatprep.subr.bf16.mxu0 %v5929_v10  ;;  %4854 = vmatprep.subr.bf16.mxu1 %v6814_v0 }
 0x511   :  { %2125 = vmatprep.mubr.f32.mxu0 %v6815_v12  ;;  %4081 = vmatprep.mubr.msk.f32.mxu1 %vm5706_vm3, %v6815_v12 }
 0x513   :  { %4826 = vmatpush1.bf16.msra.mxu0 %v5933_v15  ;;  %4856 = vmatpush3.bf16.msra.mxu1 %v6023_v55 }
 0x514   :  { %4828 = vmatprep.subr.bf16.mxu0 %v5936_v16  ;;  %4857 = vmatprep.subr.bf16.mxu1 %v6814_v0 }
 0x517   :  { %4830 = vmatpush1.bf16.msra.mxu0 %v5939_v21  ;;  %4859 = vmatpush3.bf16.msra.mxu1 %v6040_v6 }
 0x518   :  { %4832 = vmatprep.subr.bf16.mxu0 %v5942_v22  ;;  %4860 = vmatprep.subr.bf16.mxu1 %v6814_v0 }
 0x51b   :  { %4834 = vmatpush1.bf16.msra.mxu0 %v5945_v29  ;;  %4862 = vmatpush3.bf16.msra.mxu1 %v6053_v19 }
 0x51c   :  { %4836 = vmatprep.subr.bf16.mxu0 %v5948_v33  ;;  %4863 = vmatprep.subr.bf16.mxu1 %v6814_v0 }
 0x51f   :  { %4838 = vmatpush1.bf16.msra.mxu0 %v5958_v45  ;;  %4865 = vmatpush3.bf16.msra.mxu1 %v6065_v26 }
 0x520   :  { %4840 = vmatprep.subr.bf16.mxu0 %v6821_v14  ;;  %4866 = vmatprep.subr.bf16.mxu1 %v6814_v0 }
 0x523   :  { %4842 = vmatpush1.bf16.msra.mxu0 %v6842_v59  ;;  %4868 = vmatpush3.bf16.msra.mxu1 %v6843_v49 }
 0x524   :  { %4844 = vmatprep.subr.bf16.mxu0 %v6844_v28  ;;  %4869 = vmatprep.subr.bf16.mxu1 %v6814_v0 }
 0x527   :  { %4846 = vmatpush1.bf16.msra.mxu0 %v6845_v3  ;;  %4871 = vmatpush3.bf16.msra.mxu1 %v6846_v11  ;;  %v1705_v3 = vld [vmem:[#allocation4 + $0x70] sm:$0xff] }
 0x528   :  { %4848 = vmatprep.subr.bf16.mxu0 %v6847_v1  ;;  %4872 = vmatprep.subr.bf16.mxu1 %v6814_v0 }
 0x52b   :  { %4850 = vmatpush1.bf16.msra.mxu0 %v6848_v58  ;;  %4874 = vmatpush3.bf16.msra.mxu1 %v6849_v41 }
 0x52c   :  { %4876 = vmatprep.subr.bf16.mxu0 %v6850_v34  ;;  %4907 = vmatprep.subr.bf16.mxu1 %v6814_v0  ;;  %v6508_v34 = vld [vmem:[#allocation12] ss:$0 sm:$0xff] }
 0x52d   :  { %6851 = vst [vmem:[#allocation33_spill] sm:$0xff] %v6508_v34 }
 0x5c1   :  { %v1775_v20 = vpop.f32.mrb[14].mxu0  ;;  %v1846_v8 = vpop.f32.mrb[18].mxu1 }
 0x5c2   :  { %v1850_v56 = vadd.f32 %v1775_v20, %v1703_v51  ;;  %v1777_v25 = vpop.f32.mrb[15].mxu0  ;;  %v4013_v54 = vpop.f32.mrb[19].mxu1  ;;  %v1864_v1 = vadd.f32 %v6508_v34, %v1846_v8  ;;  %v1879_v20 = vld [vmem:[#allocation7 + $0x48] sm:$0xff] }
 0x5c3   :  { %v1857_v35 = vadd.f32 %v1777_v25, %v1704_v24 }
 0x5c4   :  { %v3407_v42 = vmul.f32 -1.442695, %v1850_v56 }
 0x5c5   :  { %v3408_v62 = vmul.f32 -1.442695, %v1857_v35 }
 0x5c6   :  { %5323 = vpow2.f32 %v3407_v42  ;;  %v1880_v42 = vld [vmem:[#allocation7 + $0x50] sm:$0xff] }
 0x5c7   :  { %5325 = vpow2.f32 %v3408_v62 }
 0x5d0   :  { %v5324_v36 = vpop.eup %5323 }
 0x5d1   :  { %v1854_v39 = vadd.f32 1.0, %v5324_v36  ;;  %v5326_v41 = vpop.eup %5325 }
 0x5d2   :  { %v1861_v58 = vadd.f32 1.0, %v5326_v41 }
 0x5d3   :  { %5327 = vrcp.f32 %v1854_v39 }
 0x5d4   :  { %5329 = vrcp.f32 %v1861_v58 }
 0x5dd   :  { %v5328_v11 = vpop.eup %5327 }
 0x5de   :  { %v1865_v51 = vmul.f32 %v5328_v11, %v1864_v1  ;;  %v5330_v41 = vpop.eup %5329  ;;  %v1875_v1 = vpop.permute.xlu0 %1874 }
 0x5df   :  { %v1868_v49 = vsub.f32 1.0, %v5330_v41  ;;  %v1870_v11 = vmul.f32 %v5330_v41, %v6427_v48  ;;  %vm1876_vm1 = vcmp.eq.s32.totalorder %v1875_v1, 1  ;;  %v2051_v41 = vpop.permute.xlu1 %2050  ;;  %v6853_v1 = vld [vmem:[#allocation35_spill] sm:$0xff] }
 0x5e0   :  { %v1866_v54 = vadd.f32 %v1865_v51, %v1705_v3  ;;  %vm2052_vm2 = vcmp.eq.s32.totalorder %v2051_v41, 1 }
 0x5e1   :  { %v1951_v56 = vpop.f32.mrb[16].mxu0  ;;  %v2022_v24 = vpop.f32.mrb[20].mxu1 }
 0x5e2   :  { %5331 = vtanh.f32 %v1866_v54  ;;  %v2026_v25 = vadd.f32 %v1951_v56, %v1879_v20  ;;  %v1953_v35 = vpop.f32.mrb[17].mxu0  ;;  %v4048_v62 = vpop.f32.mrb[21].mxu1  ;;  %v1881_v56 = vld [vmem:[#allocation7 + $0x58] sm:$0xff] }
 0x5e3   :  { %v2033_v39 = vadd.f32 %v1953_v35, %v1880_v42 }
 0x5e4   :  { %v3409_v36 = vmul.f32 -1.442695, %v2026_v25 }
 0x5e5   :  { %v3410_v28 = vmul.f32 -1.442695, %v2033_v39 }
 0x5e6   :  { %5333 = vpow2.f32 %v3409_v36 }
 0x5e7   :  { %5335 = vpow2.f32 %v3410_v28  ;;  %v6530_v28 = vld [vmem:[#allocation15] ss:$0 sm:$0xff] }
 0x5ec   :  { %v5332_v8 = vpop.eup %5331 }
 0x5ed   :  { %v1869_v34 = vmul.f32 %v5332_v8, %v1868_v49 }
 0x5ef   :  { %v1871_v3 = vadd.f32 %v1870_v11, %v1869_v34  ;;  %v2040_v34 = vadd.f32 %v6530_v28, %v2022_v24 }
 0x5f0   :  { %v5334_v58 = vpop.eup %5333 }
 0x5f1   :  { %v2030_v51 = vadd.f32 1.0, %v5334_v58  ;;  %v6513_v20 = vsel %vm1876_vm1, %v1871_v3, %v6427_v48  ;;  %v5336_v48 = vpop.eup %5335  ;;  %v6854_v3 = vld [vmem:[#allocation36_spill] sm:$0xff] }
 0x5f2   :  { %2126 = vmatmul.mubr.f32.vlgmr.msra.gmra.mrb[18].mxu0 %v6513_v20  ;;  %4082 = vmatmul.mubr.f32.vlgmr.msra.gmra.mrb[22].mxu1 %v6513_v20  ;;  %v2037_v49 = vadd.f32 1.0, %v5336_v48  ;;  %v6855_v58 = vld [vmem:[#allocation40_spill] sm:$0xff]  ;;  %v6857_v48 = vld [vmem:[#allocation38_spill] sm:$0xff] }
 0x5f3   :  { %5337 = vrcp.f32 %v2030_v51  ;;  %4878 = vmatpush1.bf16.msra.mxu0 %v5952_v38  ;;  %4909 = vmatpush3.bf16.msra.mxu1 %v6105_v4  ;;  %v6856_v51 = vld [vmem:[#allocation37_spill] sm:$0xff] }
 0x5f4   :  { %4880 = vmatprep.subr.bf16.mxu0 %v5955_v43  ;;  %4910 = vmatprep.subr.bf16.mxu1 %v6814_v0  ;;  %5339 = vrcp.f32 %v2037_v49  ;;  %v6858_v49 = vld [vmem:[#allocation41_spill] sm:$0xff] }
 0x5f5   :  { %2301 = vmatprep.mubr.f32.mxu0 %v6815_v12  ;;  %4116 = vmatprep.mubr.msk.f32.mxu1 %vm5706_vm3, %v6815_v12 }
 0x5f7   :  { %4882 = vmatpush1.bf16.msra.mxu0 %v5961_v47  ;;  %4912 = vmatpush3.bf16.msra.mxu1 %v6112_v23 }
 0x5f8   :  { %4884 = vmatprep.subr.bf16.mxu0 %v5967_v52  ;;  %4913 = vmatprep.subr.bf16.mxu1 %v6814_v0 }
 0x5fb   :  { %4886 = vmatpush1.bf16.msra.mxu0 %v5973_v61  ;;  %4915 = vmatpush3.bf16.msra.mxu1 %v6120_v31 }
 0x5fc   :  { %4888 = vmatprep.subr.bf16.mxu0 %v5979_v2  ;;  %4916 = vmatprep.subr.bf16.mxu1 %v6814_v0 }
 0x5fd   :  { %v5338_v54 = vpop.eup %5337 }
 0x5fe   :  { %v2041_v25 = vmul.f32 %v5338_v54, %v2040_v34  ;;  %v5340_v24 = vpop.eup %5339  ;;  %v6859_v34 = vld [vmem:[#allocation32_spill] sm:$0xff] }
 0x5ff   :  { %4890 = vmatpush1.bf16.msra.mxu0 %v5985_v13  ;;  %4918 = vmatpush3.bf16.msra.mxu1 %v6126_v44  ;;  %v2044_v35 = vsub.f32 1.0, %v5340_v24  ;;  %v2046_v39 = vmul.f32 %v5340_v24, %v6469_v50  ;;  %v2055_v54 = vld [vmem:[#allocation4 + $0x78] sm:$0xff]  ;;  %v2056_v24 = vld [vmem:[#allocation4 + $0x80] sm:$0xff] }
 0x600   :  { %v2042_v42 = vadd.f32 %v2041_v25, %v1881_v56  ;;  %4892 = vmatprep.subr.bf16.mxu0 %v5991_v18  ;;  %4919 = vmatprep.subr.bf16.mxu1 %v6814_v0 }
 0x602   :  { %5341 = vtanh.f32 %v2042_v42 }
 0x603   :  { %4894 = vmatpush1.bf16.msra.mxu0 %v5997_v27  ;;  %4921 = vmatpush3.bf16.msra.mxu1 %v6132_v60 }
 0x604   :  { %4896 = vmatprep.subr.bf16.mxu0 %v6001_v30  ;;  %4922 = vmatprep.subr.bf16.mxu1 %v6814_v0 }
 0x607   :  { %4898 = vmatpush1.bf16.msra.mxu0 %v6007_v40  ;;  %4924 = vmatpush3.bf16.msra.mxu1 %v6136_v17 }
 0x608   :  { %4900 = vmatprep.subr.bf16.mxu0 %v6013_v46  ;;  %4925 = vmatprep.subr.bf16.mxu1 %v6814_v0 }
 0x60b   :  { %4902 = vmatpush1.bf16.msra.mxu0 %v6026_v57  ;;  %4927 = vmatpush3.bf16.msra.mxu1 %v6140_v32 }
 0x60c   :  { %v5342_v62 = vpop.eup %5341  ;;  %4904 = vmatprep.subr.bf16.mxu0 %v6033_v63  ;;  %4928 = vmatprep.subr.bf16.mxu1 %v6814_v0 }
 0x60d   :  { %v2045_v36 = vmul.f32 %v5342_v62, %v2044_v35 }
 0x60f   :  { %4906 = vmatpush1.bf16.msra.mxu0 %v6043_v7  ;;  %4930 = vmatpush3.bf16.msra.mxu1 %v6144_v53  ;;  %v2047_v8 = vadd.f32 %v2046_v39, %v2045_v36 }
 0x610   :  { %4932 = vmatprep.subr.bf16.mxu0 %v5925_v5  ;;  %4963 = vmatprep.subr.bf16.mxu1 %v6814_v0 }
 0x611   :  { %v6557_v11 = vsel %vm2052_vm2, %v2047_v8, %v6469_v50  ;;  %v6852_v50 = vld [vmem:[#allocation39_spill] sm:$0xff] }
 0x612   :  { %2302 = vmatmul.mubr.f32.vlgmr.msra.gmra.mrb[20].mxu0 %v6557_v11  ;;  %4117 = vmatmul.mubr.f32.vlgmr.msra.gmra.mrb[24].mxu1 %v6557_v11 }
 0x613   :  { %4934 = vmatpush1.bf16.msra.mxu0 %v5927_v9  ;;  %4965 = vmatpush3.bf16.msra.mxu1 %v6004_v37 }
 0x614   :  { %4936 = vmatprep.subr.bf16.mxu0 %v5929_v10  ;;  %4966 = vmatprep.subr.bf16.mxu1 %v6814_v0 }
 0x615   :  { %2477 = vmatprep.mubr.f32.mxu0 %v6815_v12  ;;  %4151 = vmatprep.mubr.msk.f32.mxu1 %vm5706_vm3, %v6815_v12 }
 0x617   :  { %4938 = vmatpush1.bf16.msra.mxu0 %v5933_v15  ;;  %4968 = vmatpush3.bf16.msra.mxu1 %v6023_v55 }
 0x618   :  { %4940 = vmatprep.subr.bf16.mxu0 %v5936_v16  ;;  %4969 = vmatprep.subr.bf16.mxu1 %v6814_v0 }
 0x61b   :  { %4942 = vmatpush1.bf16.msra.mxu0 %v5939_v21  ;;  %4971 = vmatpush3.bf16.msra.mxu1 %v6040_v6 }
 0x61c   :  { %4944 = vmatprep.subr.bf16.mxu0 %v5942_v22  ;;  %4972 = vmatprep.subr.bf16.mxu1 %v6814_v0 }
 0x61f   :  { %4946 = vmatpush1.bf16.msra.mxu0 %v5945_v29  ;;  %4974 = vmatpush3.bf16.msra.mxu1 %v6053_v19 }
 0x620   :  { %4948 = vmatprep.subr.bf16.mxu0 %v5948_v33  ;;  %4975 = vmatprep.subr.bf16.mxu1 %v6814_v0 }
 0x623   :  { %4950 = vmatpush1.bf16.msra.mxu0 %v5958_v45  ;;  %4977 = vmatpush3.bf16.msra.mxu1 %v6065_v26 }
 0x624   :  { %4952 = vmatprep.subr.bf16.mxu0 %v6821_v14  ;;  %4978 = vmatprep.subr.bf16.mxu1 %v6814_v0 }
 0x627   :  { %4954 = vmatpush1.bf16.msra.mxu0 %v6842_v59  ;;  %4980 = vmatpush3.bf16.msra.mxu1 %v6852_v50 }
 0x628   :  { %4956 = vmatprep.subr.bf16.mxu0 %v6853_v1  ;;  %4981 = vmatprep.subr.bf16.mxu1 %v6814_v0  ;;  %v2057_v1 = vld [vmem:[#allocation4 + $0x88] sm:$0xff] }
 0x62b   :  { %4958 = vmatpush1.bf16.msra.mxu0 %v6854_v3  ;;  %4983 = vmatpush3.bf16.msra.mxu1 %v6855_v58 }
 0x62c   :  { %4960 = vmatprep.subr.bf16.mxu0 %v6856_v51  ;;  %4984 = vmatprep.subr.bf16.mxu1 %v6814_v0 }
 0x62f   :  { %4962 = vmatpush1.bf16.msra.mxu0 %v6857_v48  ;;  %4986 = vmatpush3.bf16.msra.mxu1 %v6858_v49 }
 0x630   :  { %4988 = vmatprep.subr.bf16.mxu0 %v6859_v34  ;;  %5019 = vmatprep.subr.bf16.mxu1 %v6814_v0  ;;  %v6860_v34 = vld [vmem:[#allocation33_spill] sm:$0xff] }
 0x6c5   :  { %v2127_v56 = vpop.f32.mrb[18].mxu0  ;;  %v2198_v25 = vpop.f32.mrb[22].mxu1 }
 0x6c6   :  { %v2202_v42 = vadd.f32 %v2127_v56, %v2055_v54  ;;  %v2129_v35 = vpop.f32.mrb[19].mxu0  ;;  %v4083_v62 = vpop.f32.mrb[23].mxu1  ;;  %v2216_v58 = vadd.f32 %v6860_v34, %v2198_v25  ;;  %v2231_v54 = vld [vmem:[#allocation7 + $0x30] sm:$0xff] }
 0x6c7   :  { %v2209_v39 = vadd.f32 %v2129_v35, %v2056_v24  ;;  %v2232_v24 = vld [vmem:[#allocation7 + $0x38] sm:$0xff] }
 0x6c8   :  { %v3411_v36 = vmul.f32 -1.442695, %v2202_v42 }
 0x6c9   :  { %v3412_v41 = vmul.f32 -1.442695, %v2209_v39 }
 0x6ca   :  { %5343 = vpow2.f32 %v3411_v36 }
 0x6cb   :  { %5345 = vpow2.f32 %v3412_v41 }
 0x6d4   :  { %v5344_v8 = vpop.eup %5343 }
 0x6d5   :  { %v2206_v48 = vadd.f32 1.0, %v5344_v8  ;;  %v5346_v49 = vpop.eup %5345 }
 0x6d6   :  { %v2213_v51 = vadd.f32 1.0, %v5346_v49 }
 0x6d7   :  { %5347 = vrcp.f32 %v2206_v48 }
 0x6d8   :  { %5349 = vrcp.f32 %v2213_v51 }
 0x6e1   :  { %v5348_v3 = vpop.eup %5347 }
 0x6e2   :  { %v2217_v50 = vmul.f32 %v5348_v3, %v2216_v58  ;;  %v5350_v48 = vpop.eup %5349  ;;  %v2227_v58 = vpop.permute.xlu0 %2226 }
 0x6e3   :  { %v2220_v8 = vsub.f32 1.0, %v5350_v48  ;;  %v2222_v3 = vmul.f32 %v5350_v48, %v6513_v20  ;;  %vm2228_vm4 = vcmp.eq.s32.totalorder %v2227_v58, 1 }
 0x6e4   :  { %v2218_v56 = vadd.f32 %v2217_v50, %v2057_v1 }
 0x6e5   :  { %v2303_v59 = vpop.f32.mrb[20].mxu0  ;;  %v2374_v62 = vpop.f32.mrb[24].mxu1 }
 0x6e6   :  { %5351 = vtanh.f32 %v2218_v56  ;;  %v2378_v42 = vadd.f32 %v2303_v59, %v2231_v54  ;;  %v2305_v35 = vpop.f32.mrb[21].mxu0  ;;  %v4118_v36 = vpop.f32.mrb[25].mxu1  ;;  %v2392_v54 = vadd.f32 %v6530_v28, %v2374_v62 }
 0x6e7   :  { %v2385_v41 = vadd.f32 %v2305_v35, %v2232_v24 }
 0x6e8   :  { %v3413_v39 = vmul.f32 -1.442695, %v2378_v42  ;;  %v2233_v42 = vld [vmem:[#allocation7 + $0x40] sm:$0xff] }
 0x6e9   :  { %v3414_v49 = vmul.f32 -1.442695, %v2385_v41 }
 0x6ea   :  { %5353 = vpow2.f32 %v3413_v39 }
 0x6eb   :  { %5355 = vpow2.f32 %v3414_v49  ;;  %v2403_v49 = vpop.permute.xlu1 %2402 }
 0x6ec   :  { %vm2404_vm5 = vcmp.eq.s32.totalorder %v2403_v49, 1 }
 0x6f0   :  { %v5352_v25 = vpop.eup %5351 }
 0x6f1   :  { %v2221_v34 = vmul.f32 %v5352_v25, %v2220_v8 }
 0x6f3   :  { %v2223_v50 = vadd.f32 %v2222_v3, %v2221_v34 }
 0x6f4   :  { %v5354_v1 = vpop.eup %5353 }
 0x6f5   :  { %v2382_v51 = vadd.f32 1.0, %v5354_v1  ;;  %v6599_v59 = vsel %vm2228_vm4, %v2223_v50, %v6513_v20  ;;  %v5356_v20 = vpop.eup %5355 }
 0x6f6   :  { %2478 = vmatmul.mubr.f32.vlgmr.msra.gmra.mrb[22].mxu0 %v6599_v59  ;;  %4152 = vmatmul.mubr.f32.vlgmr.msra.gmra.mrb[26].mxu1 %v6599_v59  ;;  %v2389_v34 = vadd.f32 1.0, %v5356_v20 }
 0x6f7   :  { %5357 = vrcp.f32 %v2382_v51  ;;  %4990 = vmatpush1.bf16.msra.mxu0 %v5952_v38  ;;  %5021 = vmatpush3.bf16.msra.mxu1 %v6105_v4 }
 0x6f8   :  { %4992 = vmatprep.subr.bf16.mxu0 %v5955_v43  ;;  %5022 = vmatprep.subr.bf16.mxu1 %v6814_v0  ;;  %5359 = vrcp.f32 %v2389_v34  ;;  %v6870_v34 = vld [vmem:[#allocation33_spill] sm:$0xff] }
 0x6f9   :  { %2653 = vmatprep.mubr.f32.mxu0 %v6815_v12  ;;  %4186 = vmatprep.mubr.msk.f32.mxu1 %vm5706_vm3, %v6815_v12 }
 0x6fb   :  { %4994 = vmatpush1.bf16.msra.mxu0 %v5961_v47  ;;  %5024 = vmatpush3.bf16.msra.mxu1 %v6112_v23 }
 0x6fc   :  { %4996 = vmatprep.subr.bf16.mxu0 %v5967_v52  ;;  %5025 = vmatprep.subr.bf16.mxu1 %v6814_v0 }
 0x6ff   :  { %4998 = vmatpush1.bf16.msra.mxu0 %v5973_v61  ;;  %5027 = vmatpush3.bf16.msra.mxu1 %v6120_v31 }
 0x700   :  { %5000 = vmatprep.subr.bf16.mxu0 %v5979_v2  ;;  %5028 = vmatprep.subr.bf16.mxu1 %v6814_v0 }
 0x701   :  { %v5358_v56 = vpop.eup %5357 }
 0x702   :  { %v2393_v24 = vmul.f32 %v5358_v56, %v2392_v54  ;;  %v5360_v62 = vpop.eup %5359 }
 0x703   :  { %5002 = vmatpush1.bf16.msra.mxu0 %v5985_v13  ;;  %5030 = vmatpush3.bf16.msra.mxu1 %v6126_v44  ;;  %v2396_v36 = vsub.f32 1.0, %v5360_v62  ;;  %v2398_v48 = vmul.f32 %v5360_v62, %v6557_v11 }
 0x704   :  { %v2394_v35 = vadd.f32 %v2393_v24, %v2233_v42  ;;  %5004 = vmatprep.subr.bf16.mxu0 %v5991_v18  ;;  %5031 = vmatprep.subr.bf16.mxu1 %v6814_v0  ;;  %v2409_v42 = vld [vmem:[#allocation4 + $0xa0] sm:$0xff] }
 0x706   :  { %5361 = vtanh.f32 %v2394_v35  ;;  %v2583_v35 = vld [vmem:[#allocation7 + $0x18] sm:$0xff] }
 0x707   :  { %5006 = vmatpush1.bf16.msra.mxu0 %v5997_v27  ;;  %5033 = vmatpush3.bf16.msra.mxu1 %v6132_v60 }
 0x708   :  { %5008 = vmatprep.subr.bf16.mxu0 %v6001_v30  ;;  %5034 = vmatprep.subr.bf16.mxu1 %v6814_v0 }
 0x70b   :  { %5010 = vmatpush1.bf16.msra.mxu0 %v6007_v40  ;;  %5036 = vmatpush3.bf16.msra.mxu1 %v6136_v17 }
 0x70c   :  { %5012 = vmatprep.subr.bf16.mxu0 %v6013_v46  ;;  %5037 = vmatprep.subr.bf16.mxu1 %v6814_v0 }
 0x70f   :  { %5014 = vmatpush1.bf16.msra.mxu0 %v6026_v57  ;;  %5039 = vmatpush3.bf16.msra.mxu1 %v6140_v32 }
 0x710   :  { %v5362_v39 = vpop.eup %5361  ;;  %5016 = vmatprep.subr.bf16.mxu0 %v6033_v63  ;;  %5040 = vmatprep.subr.bf16.mxu1 %v6814_v0 }
 0x711   :  { %v2397_v41 = vmul.f32 %v5362_v39, %v2396_v36 }
 0x713   :  { %5018 = vmatpush1.bf16.msra.mxu0 %v6043_v7  ;;  %5042 = vmatpush3.bf16.msra.mxu1 %v6144_v53  ;;  %v2399_v8 = vadd.f32 %v2398_v48, %v2397_v41  ;;  %v2584_v48 = vld [vmem:[#allocation7 + $0x20] sm:$0xff] }
 0x714   :  { %5044 = vmatprep.subr.bf16.mxu0 %v5925_v5  ;;  %5075 = vmatprep.subr.bf16.mxu1 %v6814_v0  ;;  %v6861_v5 = vld [vmem:[#allocation34_spill] sm:$0xff] }
 0x715   :  { %v6641_v25 = vsel %vm2404_vm5, %v2399_v8, %v6557_v11 }
 0x716   :  { %2654 = vmatmul.mubr.f32.vlgmr.msra.gmra.mrb[24].mxu0 %v6641_v25  ;;  %4187 = vmatmul.mubr.f32.vlgmr.msra.gmra.mrb[28].mxu1 %v6641_v25 }
 0x717   :  { %5046 = vmatpush1.bf16.msra.mxu0 %v5927_v9  ;;  %5077 = vmatpush3.bf16.msra.mxu1 %v6004_v37  ;;  %v6862_v9 = vld [vmem:[#allocation39_spill] sm:$0xff] }
 0x718   :  { %5048 = vmatprep.subr.bf16.mxu0 %v5929_v10  ;;  %5078 = vmatprep.subr.bf16.mxu1 %v6814_v0  ;;  %v6863_v10 = vld [vmem:[#allocation35_spill] sm:$0xff] }
 0x719   :  { %2829 = vmatprep.mubr.f32.mxu0 %v6815_v12  ;;  %4221 = vmatprep.mubr.msk.f32.mxu1 %vm5706_vm3, %v6815_v12 }
 0x71b   :  { %5050 = vmatpush1.bf16.msra.mxu0 %v5933_v15  ;;  %5080 = vmatpush3.bf16.msra.mxu1 %v6023_v55  ;;  %v6864_v15 = vld [vmem:[#allocation36_spill] sm:$0xff] }
 0x71c   :  { %5052 = vmatprep.subr.bf16.mxu0 %v5936_v16  ;;  %5081 = vmatprep.subr.bf16.mxu1 %v6814_v0  ;;  %v6865_v16 = vld [vmem:[#allocation40_spill] sm:$0xff] }
 0x71f   :  { %5054 = vmatpush1.bf16.msra.mxu0 %v5939_v21  ;;  %5083 = vmatpush3.bf16.msra.mxu1 %v6040_v6  ;;  %v6866_v21 = vld [vmem:[#allocation37_spill] sm:$0xff] }
 0x720   :  { %5056 = vmatprep.subr.bf16.mxu0 %v5942_v22  ;;  %5084 = vmatprep.subr.bf16.mxu1 %v6814_v0  ;;  %v6867_v22 = vld [vmem:[#allocation38_spill] sm:$0xff] }
 0x723   :  { %5058 = vmatpush1.bf16.msra.mxu0 %v5945_v29  ;;  %5086 = vmatpush3.bf16.msra.mxu1 %v6053_v19  ;;  %v6868_v29 = vld [vmem:[#allocation41_spill] sm:$0xff]  ;;  %v2408_v19 = vld [vmem:[#allocation4 + $0x98] sm:$0xff] }
 0x724   :  { %5060 = vmatprep.subr.bf16.mxu0 %v5948_v33  ;;  %5087 = vmatprep.subr.bf16.mxu1 %v6814_v0  ;;  %v6869_v33 = vld [vmem:[#allocation32_spill] sm:$0xff] }
 0x727   :  { %5062 = vmatpush1.bf16.msra.mxu0 %v5958_v45  ;;  %5089 = vmatpush3.bf16.msra.mxu1 %v6065_v26  ;;  %v2407_v45 = vld [vmem:[#allocation4 + $0x90] sm:$0xff] }
 0x728   :  { %5064 = vmatprep.subr.bf16.mxu0 %v6821_v14  ;;  %5090 = vmatprep.subr.bf16.mxu1 %v6814_v0 }
 0x72b   :  { %5066 = vmatpush1.bf16.msra.mxu0 %v6861_v5  ;;  %5092 = vmatpush3.bf16.msra.mxu1 %v6862_v9 }
 0x72c   :  { %5068 = vmatprep.subr.bf16.mxu0 %v6863_v10  ;;  %5093 = vmatprep.subr.bf16.mxu1 %v6814_v0 }
 0x72f   :  { %5070 = vmatpush1.bf16.msra.mxu0 %v6864_v15  ;;  %5095 = vmatpush3.bf16.msra.mxu1 %v6865_v16 }
 0x730   :  { %5072 = vmatprep.subr.bf16.mxu0 %v6866_v21  ;;  %5096 = vmatprep.subr.bf16.mxu1 %v6814_v0 }
 0x733   :  { %5074 = vmatpush1.bf16.msra.mxu0 %v6867_v22  ;;  %5098 = vmatpush3.bf16.msra.mxu1 %v6868_v29 }
 0x734   :  { %5100 = vmatprep.subr.bf16.mxu0 %v6869_v33  ;;  %5131 = vmatprep.subr.bf16.mxu1 %v6814_v0  ;;  %v2579_v33 = vpop.permute.xlu0 %2578 }
 0x735   :  { %vm2580_vm6 = vcmp.eq.s32.totalorder %v2579_v33, 1  ;;  %v3174_v33 = vld [vmem:[#allocation18 + $0xe8] sm:$0xff] }
 0x7c9   :  { %v2479_v37 = vpop.f32.mrb[22].mxu0  ;;  %v2550_v55 = vpop.f32.mrb[26].mxu1 }
 0x7ca   :  { %v2554_v6 = vadd.f32 %v2479_v37, %v2407_v45  ;;  %v2481_v26 = vpop.f32.mrb[23].mxu0  ;;  %v4153_v14 = vpop.f32.mrb[27].mxu1  ;;  %v2568_v54 = vadd.f32 %v6870_v34, %v2550_v55 }
 0x7cb   :  { %v2561_v3 = vadd.f32 %v2481_v26, %v2408_v19  ;;  %v2585_v19 = vld [vmem:[#allocation7 + $0x28] sm:$0xff]  ;;  %v3154_v26 = vld [vmem:[#allocation18 + $0x48] sm:$0xff] }
 0x7cc   :  { %v3415_v11 = vmul.f32 -1.442695, %v2554_v6  ;;  %v3156_v14 = vld [vmem:[#allocation18 + $0x58] sm:$0xff] }
 0x7cd   :  { %v3416_v58 = vmul.f32 -1.442695, %v2561_v3  ;;  %v3153_v3 = vld [vmem:[#allocation18 + $0x40] sm:$0xff] }
 0x7ce   :  { %5363 = vpow2.f32 %v3415_v11  ;;  %v5163_v11 = vpack.c.bf16 %v3156_v14, %v3154_v26 }
 0x7cf   :  { %5365 = vpow2.f32 %v3416_v58  ;;  %v3155_v58 = vld [vmem:[#allocation18 + $0x50] sm:$0xff] }
 0x7d8   :  { %v5364_v50 = vpop.eup %5363 }
 0x7d9   :  { %v2558_v1 = vadd.f32 1.0, %v5364_v50  ;;  %v5366_v51 = vpop.eup %5365  ;;  %v5165_v50 = vpack.c.bf16 %v3155_v58, %v3153_v3  ;;  %v2935_v3 = vld [vmem:[#allocation7 + $0x8] sm:$0xff] }
 0x7da   :  { %v2565_v20 = vadd.f32 1.0, %v5366_v51  ;;  %v3160_v51 = vld [vmem:[#allocation18 + $0x78] sm:$0xff] }
 0x7db   :  { %5367 = vrcp.f32 %v2558_v1  ;;  %v3158_v1 = vld [vmem:[#allocation18 + $0x68] sm:$0xff] }
 0x7dc   :  { %5369 = vrcp.f32 %v2565_v20  ;;  %v5167_v20 = vpack.c.bf16 %v3160_v51, %v3158_v1 }
 0x7e5   :  { %v5368_v56 = vpop.eup %5367 }
 0x7e6   :  { %v2569_v24 = vmul.f32 %v5368_v56, %v2568_v54  ;;  %v5370_v10 = vpop.eup %5369  ;;  %v3157_v54 = vld [vmem:[#allocation18 + $0x60] sm:$0xff]  ;;  %v3159_v56 = vld [vmem:[#allocation18 + $0x70] sm:$0xff] }
 0x7e7   :  { %v2572_v16 = vsub.f32 1.0, %v5370_v10  ;;  %v2574_v29 = vmul.f32 %v5370_v10, %v6599_v59  ;;  %v3170_v10 = vld [vmem:[#allocation18 + $0xc8] sm:$0xff] }
 0x7e8   :  { %v2570_v62 = vadd.f32 %v2569_v24, %v2409_v42  ;;  %v5169_v42 = vpack.c.bf16 %v3159_v56, %v3157_v54  ;;  %v3162_v24 = vld [vmem:[#allocation18 + $0x88] sm:$0xff] }
 0x7e9   :  { %v2655_v36 = vpop.f32.mrb[24].mxu0  ;;  %v2726_v39 = vpop.f32.mrb[28].mxu1 }
 0x7ea   :  { %5371 = vtanh.f32 %v2570_v62  ;;  %v2730_v41 = vadd.f32 %v2655_v36, %v2583_v35  ;;  %v2657_v49 = vpop.f32.mrb[25].mxu0  ;;  %v4188_v8 = vpop.f32.mrb[29].mxu1  ;;  %v3164_v35 = vld [vmem:[#allocation18 + $0x98] sm:$0xff]  ;;  %v3161_v36 = vld [vmem:[#allocation18 + $0x80] sm:$0xff] }
 0x7eb   :  { %v2737_v9 = vadd.f32 %v2657_v49, %v2584_v48  ;;  %v5171_v62 = vpack.c.bf16 %v3164_v35, %v3162_v24  ;;  %v3166_v48 = vld [vmem:[#allocation18 + $0xa8] sm:$0xff]  ;;  %v3168_v49 = vld [vmem:[#allocation18 + $0xb8] sm:$0xff]  ;;  %v3165_v8 = vld [vmem:[#allocation18 + $0xa0] sm:$0xff] }
 0x7ec   :  { %v3417_v5 = vmul.f32 -1.442695, %v2730_v41 }
 0x7ed   :  { %v3418_v15 = vmul.f32 -1.442695, %v2737_v9  ;;  %v3167_v9 = vld [vmem:[#allocation18 + $0xb0] sm:$0xff] }
 0x7ee   :  { %5373 = vpow2.f32 %v3417_v5  ;;  %v5175_v5 = vpack.c.bf16 %v3168_v49, %v3166_v48 }
 0x7ef   :  { %5375 = vpow2.f32 %v3418_v15  ;;  %v3172_v15 = vld [vmem:[#allocation18 + $0xd8] sm:$0xff] }
 0x7f4   :  { %v5372_v21 = vpop.eup %5371 }
 0x7f5   :  { %v2573_v22 = vmul.f32 %v5372_v21, %v2572_v16  ;;  %v5177_v16 = vpack.c.bf16 %v3167_v9, %v3165_v8  ;;  %v5179_v21 = vpack.c.bf16 %v3172_v15, %v3170_v10  ;;  %v2936_v8 = vld [vmem:[#allocation7 + $0x10] sm:$0xff] }
 0x7f7   :  { %v2575_v45 = vadd.f32 %v2574_v29, %v2573_v22  ;;  %v3169_v22 = vld [vmem:[#allocation18 + $0xc0] sm:$0xff]  ;;  %v3171_v29 = vld [vmem:[#allocation18 + $0xd0] sm:$0xff] }
 0x7f8   :  { %v5374_v37 = vpop.eup %5373 }
 0x7f9   :  { %v2734_v55 = vadd.f32 1.0, %v5374_v37  ;;  %v6683_v6 = vsel %vm2580_vm6, %v2575_v45, %v6599_v59  ;;  %v5376_v59 = vpop.eup %5375  ;;  %v3176_v45 = vld [vmem:[#allocation18 + $0xf8] sm:$0xff]  ;;  %v5181_v37 = vpack.c.bf16 %v3171_v29, %v3169_v22  ;;  %v3115_v22 = vld [vmem:[#allocation16 + $0x10] sm:$0xff]  ;;  %v3105_v29 = vpop.permute.xlu0 %3104 }
 0x7fa   :  { %2830 = vmatmul.mubr.f32.vlgmr.msra.gmra.mrb[26].mxu0 %v6683_v6  ;;  %4222 = vmatmul.mubr.f32.vlgmr.msra.gmra.mrb[30].mxu1 %v6683_v6  ;;  %vm3106_vm7 = vcmp.eq.s32.totalorder %v3105_v29, 1 }
 0x7fb   :  { %5377 = vrcp.f32 %v2734_v55  ;;  %5102 = vmatpush1.bf16.msra.mxu0 %v5952_v38  ;;  %5133 = vmatpush3.bf16.msra.mxu1 %v6105_v4  ;;  %v2741_v38 = vadd.f32 1.0, %v5376_v59  ;;  %v5183_v55 = vpack.c.bf16 %v3176_v45, %v3174_v33  ;;  %v3173_v59 = vld [vmem:[#allocation18 + $0xe0] sm:$0xff] }
 0x7fc   :  { %5104 = vmatprep.subr.bf16.mxu0 %v5955_v43  ;;  %5134 = vmatprep.subr.bf16.mxu1 %v6814_v0  ;;  %v2744_v43 = vadd.f32 %v6530_v28, %v2726_v39  ;;  %v3163_v39 = vld [vmem:[#allocation18 + $0x90] sm:$0xff] }
 0x7fd   :  { %3003 = vmatprep.mubr.f32.mxu0 %v6815_v12  ;;  %4256 = vmatprep.mubr.msk.f32.mxu1 %vm5706_vm3, %v6815_v12  ;;  %5379 = vrcp.f32 %v2741_v38  ;;  %v5173_v41 = vpack.c.bf16 %v3163_v39, %v3161_v36  ;;  %v3175_v38 = vld [vmem:[#allocation18 + $0xf0] sm:$0xff] }
 0x7ff   :  { %5106 = vmatpush1.bf16.msra.mxu0 %v5961_v47  ;;  %5136 = vmatpush3.bf16.msra.mxu1 %v6112_v23 }
 0x800   :  { %5108 = vmatprep.subr.bf16.mxu0 %v5967_v52  ;;  %5137 = vmatprep.subr.bf16.mxu1 %v6814_v0 }
 0x803   :  { %5110 = vmatpush1.bf16.msra.mxu0 %v5973_v61  ;;  %5139 = vmatpush3.bf16.msra.mxu1 %v6120_v31  ;;  %v3145_v31 = vld [vmem:[#allocation18] sm:$0xff] }
 0x804   :  { %5112 = vmatprep.subr.bf16.mxu0 %v5979_v2  ;;  %5140 = vmatprep.subr.bf16.mxu1 %v6814_v0 }
 0x805   :  { %v5378_v4 = vpop.eup %5377 }
 0x806   :  { %v2745_v47 = vmul.f32 %v5378_v4, %v2744_v43  ;;  %v3114_v43 = vld [vmem:[#allocation16 + $0x8] sm:$0xff]  ;;  %v3116_v4 = vld [vmem:[#allocation16 + $0x18] sm:$0xff] }
 0x807   :  { %5114 = vmatpush1.bf16.msra.mxu0 %v5985_v13  ;;  %5142 = vmatpush3.bf16.msra.mxu1 %v6126_v44  ;;  %v5380_v61 = vpop.eup %5379  ;;  %v3147_v44 = vld [vmem:[#allocation18 + $0x10] sm:$0xff] }
 0x808   :  { %v2746_v52 = vadd.f32 %v2745_v47, %v2585_v19  ;;  %5116 = vmatprep.subr.bf16.mxu0 %v5991_v18  ;;  %5143 = vmatprep.subr.bf16.mxu1 %v6814_v0  ;;  %v2748_v2 = vsub.f32 1.0, %v5380_v61  ;;  %v5185_v19 = vpack.c.bf16 %v3175_v38, %v3173_v59  ;;  %v5187_v47 = vpack.c.bf16 %v3116_v4, %v3114_v43  ;;  %v3117_v43 = vld [vmem:[#allocation16 + $0x20] sm:$0xff]  ;;  %v3119_v4 = vld [vmem:[#allocation16 + $0x30] sm:$0xff] }
 0x80a   :  { %5381 = vtanh.f32 %v2746_v52  ;;  %v2759_v52 = vld [vmem:[#allocation4 + $0xa8] sm:$0xff] }
 0x80b   :  { %5118 = vmatpush1.bf16.msra.mxu0 %v5997_v27  ;;  %5145 = vmatpush3.bf16.msra.mxu1 %v6132_v60  ;;  %v2750_v27 = vmul.f32 %v5380_v61, %v6641_v25  ;;  %v5157_v60 = vpack.c.bf16 %v3147_v44, %v3145_v31 }
 0x80c   :  { %5120 = vmatprep.subr.bf16.mxu0 %v6001_v30  ;;  %5146 = vmatprep.subr.bf16.mxu1 %v6814_v0  ;;  %v2755_v30 = vpop.permute.xlu1 %2754 }
 0x80d   :  { %vm2756_vm3 = vcmp.eq.s32.totalorder %v2755_v30, 1 }
 0x80f   :  { %5122 = vmatpush1.bf16.msra.mxu0 %v6007_v40  ;;  %5148 = vmatpush3.bf16.msra.mxu1 %v6136_v17  ;;  %v3152_v17 = vld [vmem:[#allocation18 + $0x38] sm:$0xff] }
 0x810   :  { %5124 = vmatprep.subr.bf16.mxu0 %v6013_v46  ;;  %5149 = vmatprep.subr.bf16.mxu1 %v6814_v0 }
 0x813   :  { %5126 = vmatpush1.bf16.msra.mxu0 %v6026_v57  ;;  %5151 = vmatpush3.bf16.msra.mxu1 %v6140_v32  ;;  %v3146_v57 = vld [vmem:[#allocation18 + $0x8] sm:$0xff] }
 0x814   :  { %v5382_v13 = vpop.eup %5381  ;;  %5128 = vmatprep.subr.bf16.mxu0 %v6033_v63  ;;  %5152 = vmatprep.subr.bf16.mxu1 %v6814_v0  ;;  %v3148_v63 = vld [vmem:[#allocation18 + $0x18] sm:$0xff]  ;;  %v3151_v0 = vld [vmem:[#allocation18 + $0x30] sm:$0xff] }
 0x815   :  { %v2749_v18 = vmul.f32 %v5382_v13, %v2748_v2  ;;  %v5155_v23 = vpack.c.bf16 %v3148_v63, %v3146_v57 }
 0x817   :  { %5130 = vmatpush1.bf16.msra.mxu0 %v6043_v7  ;;  %5154 = vmatpush3.bf16.msra.mxu1 %v6144_v53  ;;  %v2751_v40 = vadd.f32 %v2750_v27, %v2749_v18  ;;  %v3150_v7 = vld [vmem:[#allocation18 + $0x28] sm:$0xff]  ;;  %v3149_v53 = vld [vmem:[#allocation18 + $0x20] sm:$0xff] }
 0x818   :  { %5156 = vmatprep.subr.bf16.mxu0 %v5155_v23  ;;  %v5159_v32 = vpack.c.bf16 %v3152_v17, %v3150_v7  ;;  %v2760_v18 = vld [vmem:[#allocation4 + $0xb0] sm:$0xff] }
 0x819   :  { %v6723_v46 = vsel %vm2756_vm3, %v2751_v40, %v6641_v25  ;;  %v5161_v25 = vpack.c.bf16 %v3151_v0, %v3149_v53  ;;  %v2934_v0 = vld [vmem:[#allocation7] sm:$0xff] }
 0x81a   :  { %3004 = vmatmul.mubr.f32.vlgmr.msra.gmra.mrb[28].mxu0 %v6723_v46  ;;  %4257 = vmatmul.mubr.f32.vlgmr.msra.gmra.mrb[32].mxu1 %v6723_v46 }
 0x81b   :  { %3241 = vmatprep.mubr.f32.mxu0 %v6815_v12  ;;  %5158 = vmatpush1.bf16.msra.mxu0 %v5157_v60 }
 0x81c   :  { %5160 = vmatprep.subr.bf16.mxu0 %v5159_v32  ;;  %v2761_v32 = vld [vmem:[#allocation4 + $0xb8] sm:$0xff] }
 0x81f   :  { %5162 = vmatpush1.bf16.msra.mxu0 %v5161_v25 }
 0x820   :  { %5164 = vmatprep.subr.bf16.mxu0 %v5163_v11 }
 0x823   :  { %5166 = vmatpush1.bf16.msra.mxu0 %v5165_v50 }
 0x824   :  { %5168 = vmatprep.subr.bf16.mxu0 %v5167_v20 }
 0x827   :  { %5170 = vmatpush1.bf16.msra.mxu0 %v5169_v42 }
 0x828   :  { %5172 = vmatprep.subr.bf16.mxu0 %v5171_v62 }
 0x82b   :  { %5174 = vmatpush1.bf16.msra.mxu0 %v5173_v41 }
 0x82c   :  { %5176 = vmatprep.subr.bf16.mxu0 %v5175_v5 }
 0x82f   :  { %5178 = vmatpush1.bf16.msra.mxu0 %v5177_v16 }
 0x830   :  { %5180 = vmatprep.subr.bf16.mxu0 %v5179_v21  ;;  %v3113_v21 = vld [vmem:[#allocation16] sm:$0xff] }
 0x831   :  { %v5189_v38 = vpack.c.bf16 %v3115_v22, %v3113_v21 }
 0x833   :  { %5182 = vmatpush1.bf16.msra.mxu0 %v5181_v37  ;;  %v3118_v37 = vld [vmem:[#allocation16 + $0x28] sm:$0xff] }
 0x834   :  { %5184 = vmatprep.subr.bf16.mxu0 %v5183_v55  ;;  %v3120_v55 = vld [vmem:[#allocation16 + $0x38] sm:$0xff] }
 0x837   :  { %5186 = vmatpush1.bf16.msra.mxu0 %v5185_v19 }
 0x838   :  { %5188 = vmatprep.subr.bf16.mxu0 %v5187_v47  ;;  %v3122_v47 = vld [vmem:[#allocation16 + $0x48] sm:$0xff] }
 0x8cd   :  { %v2831_v61 = vpop.f32.mrb[26].mxu0  ;;  %v2902_v2 = vpop.f32.mrb[30].mxu1 }
 0x8ce   :  { %v2906_v13 = vadd.f32 %v2831_v61, %v2759_v52  ;;  %v2833_v27 = vpop.f32.mrb[27].mxu0  ;;  %v4223_v30 = vpop.f32.mrb[31].mxu1  ;;  %v2920_v7 = vadd.f32 %v6870_v34, %v2902_v2  ;;  %v3124_v52 = vld [vmem:[#allocation16 + $0x58] sm:$0xff]  ;;  %v5193_v61 = vpack.c.bf16 %v3119_v4, %v3117_v43 }
 0x8cf   :  { %v2913_v57 = vadd.f32 %v2833_v27, %v2760_v18  ;;  %v5195_v2 = vpack.c.bf16 %v3124_v52, %v3122_v47  ;;  %v3123_v18 = vld [vmem:[#allocation16 + $0x50] sm:$0xff]  ;;  %v3126_v27 = vld [vmem:[#allocation16 + $0x68] sm:$0xff]  ;;  %v3128_v30 = vld [vmem:[#allocation16 + $0x78] sm:$0xff] }
 0x8d0   :  { %v3419_v40 = vmul.f32 -1.442695, %v2906_v13  ;;  %v3121_v13 = vld [vmem:[#allocation16 + $0x40] sm:$0xff] }
 0x8d1   :  { %v3420_v63 = vmul.f32 -1.442695, %v2913_v57  ;;  %v5199_v57 = vpack.c.bf16 %v3128_v30, %v3126_v27 }
 0x8d2   :  { %5383 = vpow2.f32 %v3419_v40  ;;  %v5197_v40 = vpack.c.bf16 %v3123_v18, %v3121_v13 }
 0x8d3   :  { %5385 = vpow2.f32 %v3420_v63  ;;  %v3125_v63 = vld [vmem:[#allocation16 + $0x60] sm:$0xff] }
 0x8dc   :  { %v5384_v23 = vpop.eup %5383 }
 0x8dd   :  { %v2910_v31 = vadd.f32 1.0, %v5384_v23  ;;  %v5386_v44 = vpop.eup %5385  ;;  %v3127_v23 = vld [vmem:[#allocation16 + $0x70] sm:$0xff] }
 0x8de   :  { %v2917_v60 = vadd.f32 1.0, %v5386_v44  ;;  %v5201_v44 = vpack.c.bf16 %v3127_v23, %v3125_v63 }
 0x8df   :  { %5387 = vrcp.f32 %v2910_v31  ;;  %v3132_v31 = vld [vmem:[#allocation16 + $0x98] sm:$0xff] }
 0x8e0   :  { %5389 = vrcp.f32 %v2917_v60 }
 0x8e9   :  { %v5388_v17 = vpop.eup %5387 }
 0x8ea   :  { %v2921_v53 = vmul.f32 %v5388_v17, %v2920_v7  ;;  %v5390_v20 = vpop.eup %5389  ;;  %v3129_v7 = vld [vmem:[#allocation16 + $0x80] sm:$0xff]  ;;  %v3134_v17 = vld [vmem:[#allocation16 + $0xa8] sm:$0xff] }
 0x8eb   :  { %v2924_v56 = vsub.f32 1.0, %v5390_v20  ;;  %v2926_v24 = vmul.f32 %v5390_v20, %v6683_v6  ;;  %v3144_v20 = vld [vmem:[#allocation16 + $0xf8] sm:$0xff] }
 0x8ec   :  { %v2922_v25 = vadd.f32 %v2921_v53, %v2761_v32  ;;  %v3136_v32 = vld [vmem:[#allocation16 + $0xb8] sm:$0xff] }
 0x8ed   :  { %v3005_v26 = vpop.f32.mrb[28].mxu0  ;;  %v3076_v14 = vpop.f32.mrb[32].mxu1 }
 0x8ee   :  { %5391 = vtanh.f32 %v2922_v25  ;;  %v3080_v11 = vadd.f32 %v3005_v26, %v2934_v0  ;;  %v3007_v58 = vpop.f32.mrb[29].mxu0  ;;  %v4258_v50 = vpop.f32.mrb[33].mxu1  ;;  %v3094_v48 = vadd.f32 %v6530_v28, %v3076_v14  ;;  %v5191_v28 = vpack.c.bf16 %v3120_v55, %v3118_v37  ;;  %v3133_v25 = vld [vmem:[#allocation16 + $0xa0] sm:$0xff]  ;;  %v3135_v26 = vld [vmem:[#allocation16 + $0xb0] sm:$0xff]  ;;  %v3138_v14 = vld [vmem:[#allocation16 + $0xc8] sm:$0xff] }
 0x8ef   :  { %v3087_v51 = vadd.f32 %v3007_v58, %v2935_v3  ;;  %v5207_v0 = vpack.c.bf16 %v3136_v32, %v3134_v17  ;;  %v5209_v3 = vpack.c.bf16 %v3135_v26, %v3133_v25  ;;  %v3137_v50 = vld [vmem:[#allocation16 + $0xc0] sm:$0xff] }
 0x8f0   :  { %v3421_v1 = vmul.f32 -1.442695, %v3080_v11  ;;  %v3140_v11 = vld [vmem:[#allocation16 + $0xd8] sm:$0xff] }
 0x8f1   :  { %v3422_v54 = vmul.f32 -1.442695, %v3087_v51  ;;  %v5211_v58 = vpack.c.bf16 %v3140_v11, %v3138_v14  ;;  %v3142_v51 = vld [vmem:[#allocation16 + $0xe8] sm:$0xff] }
 0x8f2   :  { %5393 = vpow2.f32 %v3421_v1  ;;  %v3139_v1 = vld [vmem:[#allocation16 + $0xd0] sm:$0xff] }
 0x8f3   :  { %5395 = vpow2.f32 %v3422_v54  ;;  %v5213_v54 = vpack.c.bf16 %v3139_v1, %v3137_v50 }
 0x8f8   :  { %v5392_v34 = vpop.eup %5391 }
 0x8f9   :  { %v2925_v42 = vmul.f32 %v5392_v34, %v2924_v56  ;;  %v5215_v56 = vpack.c.bf16 %v3144_v20, %v3142_v51  ;;  %v3141_v34 = vld [vmem:[#allocation16 + $0xe0] sm:$0xff] }
 0x8fb   :  { %v6730_v35 = vadd.f32 %v2926_v24, %v2925_v42  ;;  %v3143_v42 = vld [vmem:[#allocation16 + $0xf0] sm:$0xff] }
 0x8fc   :  { %v5394_v62 = vpop.eup %5393  ;;  %v5217_v24 = vpack.c.bf16 %v3143_v42, %v3141_v34 }
 0x8fd   :  { %v3084_v36 = vadd.f32 1.0, %v5394_v62  ;;  %v5396_v39 = vpop.eup %5395  ;;  %v2931_v62 = vpop.permute.xlu1 %2930 }
 0x8fe   :  { %v3091_v41 = vadd.f32 1.0, %v5396_v39  ;;  %vm2932_vm8 = vcmp.eq.s32.totalorder %v2931_v62, 1  ;;  %v3321_v39 = vlaneseq }
 0x8ff   :  { %5397 = vrcp.f32 %v3084_v36  ;;  %v2933_v36 = vsel %vm2932_vm8, %v6730_v35, %v6683_v6 }
 0x900   :  { %5399 = vrcp.f32 %v3091_v41  ;;  %v3322_v41 = vshrl.u32 %v3321_v39, 7 }
 0x909   :  { %v5398_v49 = vpop.eup %5397 }
 0x90a   :  { %v3095_v5 = vmul.f32 %v5398_v49, %v3094_v48  ;;  %v5400_v10 = vpop.eup %5399  ;;  %v3323_v48 = vsub.s32 0, %v3322_v41  ;;  %v3319_v49 = vld [vmem:[#allocation19] sm:$0x3] }
 0x90b   :  { %v3098_v15 = vsub.f32 1.0, %v5400_v10  ;;  %v3100_v45 = vmul.f32 %v5400_v10, %v6723_v46 }
 0x90c   :  { %v3096_v9 = vadd.f32 %v3095_v5, %v2936_v8  ;;  %v3327_v8 = vsub.s32 1, %v3322_v41  ;;  %v3324_v5 = vrot.slane %v3319_v49, %v3323_v48 }
 0x90e   :  { %5401 = vtanh.f32 %v3096_v9  ;;  %v3328_v9 = vrot.slane %v3319_v49, %v3327_v8 }
 0x918   :  { %v5402_v16 = vpop.eup %5401 }
 0x919   :  { %v3099_v33 = vmul.f32 %v5402_v16, %v3098_v15 }
 0x91b   :  { %v3101_v59 = vadd.f32 %v3100_v45, %v3099_v33 }
 0x91d   :  { %v3107_v19 = vsel %vm3106_vm7, %v3101_v59, %v6723_v46  ;;  %v3130_v46 = vld [vmem:[#allocation16 + $0x88] sm:$0xff] }
 0x91e   :  { %3242 = vmatmul.mubr.f32.vlgmr.msra.gmra.mrb[30].mxu0 %v3107_v19  ;;  %v5203_v60 = vpack.c.bf16 %v3132_v31, %v3130_v46 }
 0x91f   :  { %5190 = vmatpush1.bf16.msra.mxu0 %v5189_v38  ;;  %3312 = vmatprep.mubr.f32.mxu0 %v6815_v12  ;;  %v3131_v12 = vld [vmem:[#allocation16 + $0x90] sm:$0xff] }
 0x920   :  { %5192 = vmatprep.subr.bf16.mxu0 %v5191_v28  ;;  %v5205_v53 = vpack.c.bf16 %v3131_v12, %v3129_v7 }
 0x923   :  { %5194 = vmatpush1.bf16.msra.mxu0 %v5193_v61 }
 0x924   :  { %5196 = vmatprep.subr.bf16.mxu0 %v5195_v2 }
 0x927   :  { %5198 = vmatpush1.bf16.msra.mxu0 %v5197_v40 }
 0x928   :  { %5200 = vmatprep.subr.bf16.mxu0 %v5199_v57 }
 0x92b   :  { %5202 = vmatpush1.bf16.msra.mxu0 %v5201_v44 }
 0x92c   :  { %5204 = vmatprep.subr.bf16.mxu0 %v5203_v60 }
 0x92f   :  { %5206 = vmatpush1.bf16.msra.mxu0 %v5205_v53 }
 0x930   :  { %5208 = vmatprep.subr.bf16.mxu0 %v5207_v0 }
 0x933   :  { %5210 = vmatpush1.bf16.msra.mxu0 %v5209_v3 }
 0x934   :  { %5212 = vmatprep.subr.bf16.mxu0 %v5211_v58 }
 0x937   :  { %5214 = vmatpush1.bf16.msra.mxu0 %v5213_v54 }
 0x938   :  { %5216 = vmatprep.subr.bf16.mxu0 %v5215_v56 }
 0x93b   :  { %5218 = vmatpush1.bf16.msra.mxu0 %v5217_v24 }
 0x93e   :  { %3313 = vmatmul.mubr.f32.vlgmr.msra.gmra.mrb[30].mxu0 %v2933_v36 }
 0xa11   :  { %v3314_v10 = vpop.f32.mrb[30].mxu0 }
 0xa12   :  { %v3331_v15 = vadd.f32 %v3324_v5, %v3314_v10  ;;  %v3316_v16 = vpop.f32.mrb[31].mxu0 }
 0xa13   :  { %v3332_v21 = vadd.f32 %v3328_v9, %v3316_v16 }
 0xa14   :  { %3333 = vst [vmem:[#allocation21] sm:$0xff] %v3331_v15 }
 0xa15   :  { %v3337_v22 = vand.u32 2147483647, %v3332_v21 }
 0xa16   :  { %5640 = shalt.err (!%p5637_p0)
}
 0xa17   :  { %s5641_s20 = scalar_lea.hbm %s6772_s10, 128 }
 0xa18   :  { %p5642_p1 = scmp.ne.s32.totalorder %s6772_s10, %s5641_s20  ;;  %p5645_p2 = scmp.lt.u32.totalorder %s5641_s20, %s6772_s10 }
 0xa1a   :  { %p5647_p3 = pnand %p5645_p2, %p5642_p1 }
 0xa1c   :  { %5650 = shalt.err (!%p5647_p3)
}
 0xa1d   :  { %3362 = dma.vmem_to_hbm [thread:$0]  %s3360_s25, 128, %s6772_s10, [#allocation6]   ;;  %v3338_v6 = vsub.f32 0.0, %v3337_v22  ;;  %v3334_v43 = vmax.f32 %v3332_v21, 0.0  ;;  %vm3335_vm10 = vcmp.ne.f32.partialorder %v3332_v21, %v3332_v21 }
 0xa1e   :  { %s5708_s18 = smov [#allocation22]  }
 0xa1f   :  { %v3339_v35 = vmul.f32 1.442695, %v3338_v6  ;;  %s3369_s2 = sshll.u32 %s5708_s18, 4  ;;  %s3370_s2 = int_to_ptr.vmem [resolvable:$true] %s3369_s2 }
 0xa20   :  { %s5651_s10 = scalar_lea.vmem %s3370_s2, 128  ;;  %p5656_p5 = scmp.lt.s32.totalorder %s3370_s2, %s3370_s2 }
 0xa21   :  { %5403 = vpow2.f32 %v3339_v35  ;;  %p5652_p4 = scmp.ne.s32.totalorder %s3370_s2, %s5651_s10  ;;  %p5657_p6 = scmp.lt.s32.totalorder %s5651_s10, %s5651_s10 }
 0xa23   :  { %p5658_p7 = por %p5657_p6, %p5656_p5 }
 0xa25   :  { %p5659_p8 = pnand %p5658_p7, %p5652_p4 }
 0xa2b   :  { %v5404_v29 = vpop.eup %5403 }
 0xa2c   :  { %v3341_v33 = vadd.f32 1.0, %v5404_v29  ;;  %v3344_v45 = vmul.f32 -0.5, %v5404_v29  ;;  %v3347_v55 = vand.u32 2147483647, %v5404_v29 }
 0xa2e   :  { %5405 = vlog2.f32 %v3341_v33  ;;  %v3345_v37 = vadd.f32 1.0, %v3344_v45  ;;  %vm3348_vm9 = vcmp.lt.f32.partialorder %v3347_v55, 0.0004427343 }
 0xa30   :  { %v3346_v28 = vmul.f32 %v5404_v29, %v3345_v37 }
 0xa38   :  { %v5406_v59 = vpop.eup %5405 }
 0xa39   :  { %v3343_v38 = vmul.f32 0.6931472, %v5406_v59 }
 0xa3b   :  { %v3349_v4 = vsel %vm3348_vm9, %v3346_v28, %v3343_v38 }
 0xa3c   :  { %v3350_v19 = vadd.f32 %v3349_v4, %v3334_v43 }
 0xa3e   :  { %v3351_v47 = vsel %vm3335_vm10, %v3332_v21, %v3350_v19 }
 0xa3f   :  { %3352 = vst [vmem:[#allocation22] sm:$0xff] %v3351_v47 }
 0xa40   :  { %5662 = shalt.err (!%p5659_p8)
}
 0xa41   :  { %s5663_s6 = scalar_lea.hbm %s6773_s11, 128 }
 0xa42   :  { %p5664_p9 = scmp.ne.s32.totalorder %s6773_s11, %s5663_s6  ;;  %p5667_p10 = scmp.lt.u32.totalorder %s5663_s6, %s6773_s11 }
 0xa44   :  { %p5669_p11 = pnand %p5667_p10, %p5664_p9 }
 0xa46   :  { %5672 = shalt.err (!%p5669_p11)
}
 0xa47   :  { %3372 = dma.vmem_to_hbm [thread:$0]  %s3370_s2, 128, %s6773_s11, [#allocation23]  }
 0xa48   :  { %5685 = dma.done.wait [#allocation6], 128  }
 0xa49   :  { %5686 = vsyncadd [#allocation6], 4294967168 }
 0xa4a   :  { %5687 = dma.done.wait [#allocation23], 128  }
 0xa4b   :  { %5688 = vsyncadd [#allocation23], 4294967168 }
 0xa4c   :  { %3379 = vsyncpa [#allocation5], 1 }
 0xa4d   :  { %3380 = vsyncpa [#allocation8], 1 }
 0xa4e   :  { %3381 = vsyncpa [#allocation11], 1 }
 0xa4f   :  { %3382 = vsyncpa [#allocation14], 1 }
 0xa50   :  { %3383 = vsyncpa [#allocation17], 1 }
 0xa51   :  { %3384 = vsyncpa [#allocation20], 1 }
 0xa52   :  { %3385 = vsyncpa [#allocation6], 1 }
 0xa53   :  { %3386 = vsyncpa [#allocation23], 1 }

</bundles_post_ra>
